<compile_context>
chip_gen: v7x
topology: tpu7x:2x2x1
jax: 0.10.0
libtpu: 0.0.40
codegen_flags: <defaults>
</compile_context>

<pallas_src>
import functools

import jax
import jax.numpy as jnp
from jax.experimental import pallas as pl
from jax.experimental.pallas import tpu as pltpu  # noqa: F401  (TPU backend assumed)

_LANE = 128
_SUB = 8


def _ceil_to(x, m):
    return ((x + m - 1) // m) * m


# -----------------------------------------------------------------------------
# Pallas kernel: wavefront-fused 2-layer LSTM + MLP head + sigmoid + filtering
# -----------------------------------------------------------------------------
def _lstm_mlp_filter_kernel(
    x_ref,        # (T*NB, DX)  time-major rows (row = t*NB + b), zero-padded lanes/rows
    wih0_ref,     # (DX, 4H)    layer-0 input weights, zero-padded rows, g-cols pre-scaled x2
    b0_ref,       # (1, 4H)     b_ih0 + b_hh0, g entries pre-scaled x2
    wrec_ref,     # (2H, 8H)    bf16 fused recurrent block [[whh0, wih1],[0, whh1]], g-cols x2
    b1_ref,       # (1, 4H)     b_ih1 + b_hh1, g entries pre-scaled x2
    mw0_ref, mb0_ref,            # (H, h0),  (1, h0)
    mw1_ref, mb1_ref,            # (h0, h1), (1, h1)
    mw2_ref, mb2_ref,            # (h1, 2),  (1, 2)
    out_ref,      # (T*NB + NB, DX) lane-dense slab:
                  #   rows 0:T*NB,        lanes 0:2        -> lambdas (per timestep/row)
                  #   rows T*NB:T*NB+NB,  lanes 0:Dp       -> filtered pose
                  #   rows T*NB:T*NB+NB,  lanes Dp:Dp+Dc   -> filtered cam
    *, T, Dp, Dc,
):
    TNB, DX = x_ref.shape
    NB = TNB // T
    H = wrec_ref.shape[0] // 2
    H4 = 4 * H
    f32 = jnp.float32

    x_mat = x_ref[...]                                   # (T*NB, DX), one full-vreg load
    wrec = wrec_ref[...]                                 # (2H, 8H) bf16

    # ---- layer-0 input projection for every timestep: ONE batched MXU matmul ----
    xproj0 = jnp.dot(x_mat, wih0_ref[...], preferred_element_type=f32) \
        + jnp.broadcast_to(b0_ref[...], (TNB, H4))       # (T*NB, 4H)
    b1_b = jnp.broadcast_to(b1_ref[...], (NB, H4))       # hoisted (no per-step broadcast)

    def gates(sig4):
        # PyTorch gate order [i, f, g, o]; g columns were pre-scaled by 2 in the
        # wrapper so tanh(g) == 2*sigmoid(2g) - 1 comes out of the fused sigmoid.
        i = sig4[:, 0 * H:1 * H]
        f = sig4[:, 1 * H:2 * H]
        g = 2.0 * sig4[:, 2 * H:3 * H] - 1.0
        o = sig4[:, 3 * H:4 * H]
        return i, f, g, o

    # ---- wavefront step 0: layer-0 timestep 0 only (h0_{-1}=c0_{-1}=0 -> no matmul) ----
    i0, f0, g0, o0 = gates(jax.nn.sigmoid(xproj0[0:NB, :]))
    c0 = i0 * g0
    h0 = o0 * jnp.tanh(c0)
    c1 = jnp.zeros((NB, H), f32)
    h1 = jnp.zeros((NB, H), f32)
    h1_steps = []

    # ---- wavefront steps s = 1..T: layer-0 step s + layer-1 step s-1 share ONE matmul ----
    for s in range(1, T + 1):                             # static unroll (T small & fixed)
        lhs = jnp.concatenate([h0, h1], axis=-1).astype(jnp.bfloat16)   # (NB, 2H)
        rec = jnp.dot(lhs, wrec, preferred_element_type=f32)            # (NB, 8H)
        if s < T:
            pre = rec + jnp.concatenate(
                [xproj0[s * NB:(s + 1) * NB, :], b1_b], axis=-1)        # (NB, 8H)
            sig = jax.nn.sigmoid(pre)                    # one EUP pass for all 8 gates
            i0, f0, g0, o0 = gates(sig[:, :H4])
            i1, f1, g1, o1 = gates(sig[:, H4:])
            c0 = f0 * c0 + i0 * g0
            c1 = f1 * c1 + i1 * g1
            tc = jnp.tanh(jnp.concatenate([c0, c1], axis=-1))   # one EUP pass, both cells
            h0 = o0 * tc[:, :H]
            h1_new = o1 * tc[:, H:]
        else:                                            # final step: layer-1 step T-1 only
            i1, f1, g1, o1 = gates(jax.nn.sigmoid(rec[:, H4:] + b1_b))
            c1 = f1 * c1 + i1 * g1
            h1_new = o1 * jnp.tanh(c1)
        h1_steps.append(h1_new)
        h1 = h1_new

    # hidden states never touch VMEM scratch: stack the per-step registers once
    h1_all = jnp.concatenate(h1_steps, axis=0)           # (T*NB, H)

    # ---- MLP head + sigmoid, batched over all timesteps (off the serial chain) ----
    def leaky_relu(z):                                   # nn.LeakyReLU default slope 0.01
        return jnp.where(z > 0, z, 0.01 * z)

    z = leaky_relu(jnp.dot(h1_all, mw0_ref[...], preferred_element_type=f32) + mb0_ref[...])
    z = leaky_relu(jnp.dot(z, mw1_ref[...], preferred_element_type=f32) + mb1_ref[...])
    z = jnp.dot(z, mw2_ref[...], preferred_element_type=f32) + mb2_ref[...]
    lam = jax.nn.sigmoid(z)                              # (T*NB, 2)

    # ---- compute_filtered: suffix products -> one full-tile multiply -> tree reduce ----
    #   w_t = (1 - lambda_t) * prod_{s>t} lambda_s ; result = sum_t seq_t * w_t
    prod = jnp.ones((NB, 2), f32)
    w_steps = [None] * T
    for t in range(T - 1, -1, -1):                       # tiny (NB,2) unrolled reverse scan
        lam_t = lam[t * NB:(t + 1) * NB, :]
        w_steps[t] = (1.0 - lam_t) * prod
        prod = prod * lam_t
    w_all = jnp.concatenate(w_steps, axis=0)             # (T*NB, 2)

    lane = jax.lax.broadcasted_iota(jnp.int32, (TNB, DX), 1)
    w_lane = jnp.where(lane < Dp,
                       jnp.broadcast_to(w_all[:, 0:1], (TNB, DX)),
                       jnp.broadcast_to(w_all[:, 1:2], (TNB, DX)))
    weighted = x_mat * w_lane                            # padded lanes of x are zero

    n, acc = T, weighted                                 # aligned binary-tree reduce over T
    while n > 1:
        half = n // 2
        top = acc[:half * NB, :] + acc[half * NB:2 * half * NB, :]
        acc = jnp.concatenate([top, acc[2 * half * NB:, :]], axis=0) if n % 2 else top
        n = half + (n % 2)
    filtered = acc                                       # (NB, DX)

    # ---- single lane-dense output store ----
    lam_rows = jnp.concatenate([lam, jnp.zeros((TNB, DX - 2), f32)], axis=-1)   # (T*NB, DX)
    out_ref[...] = jnp.concatenate([lam_rows, filtered], axis=0)                # bulk store


# -----------------------------------------------------------------------------
# pallas_call wrapper (parameter prep: padding, g-column pre-scale, fused RHS)
# -----------------------------------------------------------------------------
def lstm_mlp_filter(x, d_pose, d_cam, params):
    """x: (B, T, Din) with Din = d_pose + d_cam (pose lanes first)."""
    B, T, Din = x.shape
    assert Din == d_pose + d_cam
    H = params["whh0_T"].shape[0]
    H4 = 4 * H
    NB = _ceil_to(B, _SUB)                      # batch rows padded to a sublane multiple
    DX = _ceil_to(max(Din, _LANE), _LANE)       # feature lanes padded to a lane multiple
    f32 = jnp.float32

    # time-major, batch- and lane-padded input: row = t*NB + b
    x_tb = jnp.transpose(x, (1, 0, 2)).astype(f32)
    x_tb = jnp.pad(x_tb, ((0, 0), (0, NB - B), (0, DX - Din))).reshape(T * NB, DX)

    # tanh-via-sigmoid: pre-scale every g column (gate layout [i, f, g, o]) by 2
    gcol = jnp.concatenate([jnp.ones((2 * H,), f32),
                            jnp.full((H,), 2.0, f32),
                            jnp.ones((H,), f32)])

    wih0 = jnp.pad(params["wih0_T"] * gcol[None, :], ((0, DX - Din), (0, 0)))   # (DX, 4H)
    b0 = params["b0"] * gcol[None, :]
    b1 = params["b1"] * gcol[None, :]

    # fused recurrent RHS:  [h0_{s-1} | h1_{s-2}] @ [[whh0, wih1], [0, whh1]]
    w_rec = jnp.concatenate(
        [jnp.concatenate([params["whh0_T"], params["wih1_T"]], axis=1),
         jnp.concatenate([jnp.zeros((H, H4), f32), params["whh1_T"]], axis=1)],
        axis=0) * jnp.concatenate([gcol, gcol])[None, :]
    w_rec = w_rec.astype(jnp.bfloat16)          # single-pass MXU operand; gate math stays f32

    out_rows = T * NB + NB
    slab = pl.pallas_call(
        functools.partial(_lstm_mlp_filter_kernel, T=T, Dp=d_pose, Dc=d_cam),
        out_shape=jax.ShapeDtypeStruct((out_rows, DX), f32),
    )(x_tb, wih0, b0, w_rec, b1,
      params["mw0_T"], params["mb0"], params["mw1_T"], params["mb1"],
      params["mw2_T"], params["mb2"])

    lam = slab[:T * NB, 0:2].reshape(T, NB, 2)[:, :B, :]        # (T, B, 2)
    ref_pose = slab[T * NB:T * NB + B, 0:d_pose]                # (B, d_pose)
    ref_cam = slab[T * NB:T * NB + B, d_pose:d_pose + d_cam]    # (B, d_cam)
    return lam, ref_pose, ref_cam


# -----------------------------------------------------------------------------
# Triangulation (A-matrix build + SVD + epilogue in plain JAX; XLA fuses the
# tiny elementwise tail with the SVD — cheaper than a dedicated kernel)
# -----------------------------------------------------------------------------
def triangulate_points_batched(cam_a, cam_b, scr_a, scr_b):
    B, N, _ = scr_a.shape
    ca = jnp.broadcast_to(cam_a[:, None], (B, N, 3, 4)).reshape(B * N, 3, 4)
    cb = jnp.broadcast_to(cam_b[:, None], (B, N, 3, 4)).reshape(B * N, 3, 4)
    sa = scr_a.reshape(B * N, 2)
    sb = scr_b.reshape(B * N, 2)
    r0 = sa[:, 0:1] * ca[:, 2, :] - ca[:, 0, :]
    r1 = sa[:, 1:2] * ca[:, 2, :] - ca[:, 1, :]
    r2 = sb[:, 0:1] * cb[:, 2, :] - cb[:, 0, :]
    r3 = sb[:, 1:2] * cb[:, 2, :] - cb[:, 1, :]
    A = jnp.stack([r0, r1, r2, r3], axis=1)                # (B*N, 4, 4)
    # TODO(synk): batched 4x4 SVD has no Pallas/Mosaic primitive; done with jnp.linalg.svd.
    _, _, vh = jnp.linalg.svd(A, full_matrices=False)
    hom = vh[:, -1]                                        # last right singular vector
    scale = jnp.maximum(jnp.max(jnp.abs(hom), axis=-1, keepdims=True), 1e-12)
    hom = hom / scale
    w = hom[:, 3:4]
    bad = jnp.abs(w) < 0.005
    w_safe = jnp.where(bad, jnp.ones_like(w), w)
    xyz = hom[:, 0:3] / w_safe
    xyz = jnp.where(bad, jnp.float32(float("nan")), xyz)
    return xyz.reshape(B, N, 3)


# -----------------------------------------------------------------------------
# Full forward pass (mirrors UncoupledLSTM.forward)
# -----------------------------------------------------------------------------
def uncoupled_lstm_forward(input_2d, input_cam, params, num_joints_out, out_features):
    B, T, J, F = input_2d.shape
    d_pose, d_cam = J * F, 12
    x = jnp.concatenate([input_2d.reshape(B, T, d_pose),
                         input_cam.reshape(B, T, d_cam)], axis=-1)      # (B, T, Din)

    lam_tb, ref_pose_flat, ref_cam_flat = lstm_mlp_filter(x, d_pose, d_cam, params)

    # Matches PyTorch: lambdas / ref_pose / ref_cam are computed but do not feed
    # the return value (returned here as aux).
    lam = jnp.transpose(lam_tb, (1, 0, 2))                 # (B, T, 2)
    ref_pose = ref_pose_flat.reshape(B, J, F)
    ref_cam = ref_cam_flat.reshape(B, 3, 4)

    tri = triangulate_points_batched(
        input_cam[:, 0], input_cam[:, T // 2], input_2d[:, 0], input_2d[:, T // 2])
    out = tri.reshape(B, 1, num_joints_out, out_features)
    return out, (lam, ref_pose, ref_cam)


# -----------------------------------------------------------------------------
# Deterministic parameter init (shapes from UncoupledLSTM.__init__)
# TODO(synk): kernel is specialized to num_cells == 2 (wavefront fusion assumes a 2-layer stack).
# -----------------------------------------------------------------------------
def init_params(key, num_joints_in, in_features, hidden_size, head_layers):
    Din = num_joints_in * in_features + 3 * 4
    H = hidden_size
    ks = jax.random.split(key, 12)

    def rnd(k, shape, scale=0.2):
        return (scale * jax.random.normal(k, shape)).astype(jnp.float32)

    return dict(
        # LSTM layer 0 (input Din) / layer 1 (input H); bias = b_ih + b_hh folded,
        # weights transposed (wih*_T = weight_ih.T), PyTorch gate order [i, f, g, o].
        wih0_T=rnd(ks[0], (Din, 4 * H)),
        whh0_T=rnd(ks[1], (H, 4 * H)),
        b0=rnd(ks[2], (1, 4 * H)),
        wih1_T=rnd(ks[3], (H, 4 * H)),
        whh1_T=rnd(ks[4], (H, 4 * H)),
        b1=rnd(ks[5], (1, 4 * H)),
        # MLP head: H -> head_layers[0] -> head_layers[1] -> 2
        mw0_T=rnd(ks[6], (H, head_layers[0])),
        mb0=rnd(ks[7], (1, head_layers[0])),
        mw1_T=rnd(ks[8], (head_layers[0], head_layers[1])),
        mb1=rnd(ks[9], (1, head_layers[1])),
        mw2_T=rnd(ks[10], (head_layers[1], 2)),
        mb2=rnd(ks[11], (1, 2)),
    )


if __name__ == "__main__":
    B, T = 2, 8
    num_joints_in, in_features = 17, 2
    num_joints_out, out_features = 17, 3
    hidden_size = 32
    head_layers = (16, 8)

    key = jax.random.PRNGKey(0)
    k1, k2 = jax.random.split(key)
    input_2d = jax.random.normal(k1, (B, T, num_joints_in, in_features), jnp.float32)
    input_cam = jax.random.normal(k2, (B, T, 3, 4), jnp.float32)

    params = init_params(jax.random.PRNGKey(42), num_joints_in, in_features,
                         hidden_size, head_layers)

    fwd = jax.jit(functools.partial(
        uncoupled_lstm_forward, params=params,
        num_joints_out=num_joints_out, out_features=out_features))

    out, (lam, ref_pose, ref_cam) = fwd(input_2d, input_cam)
    jax.block_until_ready((out, lam, ref_pose, ref_cam))

    assert out.shape == (B, 1, num_joints_out, out_features)
    assert lam.shape == (B, T, 2)
    assert ref_pose.shape == (B, num_joints_in, in_features)
    assert ref_cam.shape == (B, 3, 4)
    print("KERNEL_OK")
</pallas_src>

<mosaic_0001>
module attributes {stable_mosaic.version = 11 : i64} {
  func.func @_lstm_mlp_filter_kernel(%arg0: memref<64x128xf32, #tpu.memory_space<vmem>>, %arg1: memref<128x128xf32, #tpu.memory_space<vmem>>, %arg2: memref<1x128xf32, #tpu.memory_space<vmem>>, %arg3: memref<64x256xbf16, #tpu.memory_space<vmem>>, %arg4: memref<1x128xf32, #tpu.memory_space<vmem>>, %arg5: memref<32x16xf32, #tpu.memory_space<vmem>>, %arg6: memref<1x16xf32, #tpu.memory_space<vmem>>, %arg7: memref<16x8xf32, #tpu.memory_space<vmem>>, %arg8: memref<1x8xf32, #tpu.memory_space<vmem>>, %arg9: memref<8x2xf32, #tpu.memory_space<vmem>>, %arg10: memref<1x2xf32, #tpu.memory_space<vmem>>, %arg11: memref<72x128xf32, #tpu.memory_space<vmem>>) attributes {dimension_semantics = [], scalar_prefetch = 0 : i64, scratch_operands = 0 : i64, tpu.core_type = #tpu.core_type<tc>} {
    %c0 = arith.constant 0 : index
    %c0_0 = arith.constant 0 : index
    %0 = vector.load %arg0[%c0, %c0_0] : memref<64x128xf32, #tpu.memory_space<vmem>>, vector<64x128xf32>
    %c0_1 = arith.constant 0 : index
    %c0_2 = arith.constant 0 : index
    %1 = vector.load %arg3[%c0_1, %c0_2] : memref<64x256xbf16, #tpu.memory_space<vmem>>, vector<64x256xbf16>
    %c0_3 = arith.constant 0 : index
    %c0_4 = arith.constant 0 : index
    %2 = vector.load %arg1[%c0_3, %c0_4] : memref<128x128xf32, #tpu.memory_space<vmem>>, vector<128x128xf32>
    %cst = arith.constant dense<0.000000e+00> : vector<64x128xf32>
    %3 = tpu.matmul %0, %2, %cst {dimension_numbers = #tpu.dot_dimension_numbers<[1], [0], [0], [1], [0, 0, 1, 1], [], []>} : vector<64x128xf32>, vector<128x128xf32>, vector<64x128xf32> -> vector<64x128xf32>
    %c0_5 = arith.constant 0 : index
    %c0_6 = arith.constant 0 : index
    %4 = vector.load %arg2[%c0_5, %c0_6] : memref<1x128xf32, #tpu.memory_space<vmem>>, vector<1x128xf32>
    %5 = vector.shape_cast %4 : vector<1x128xf32> to vector<1x128xf32>
    %6 = vector.broadcast %5 : vector<1x128xf32> to vector<64x128xf32>
    %7 = arith.addf %3, %6 : vector<64x128xf32>
    %c0_7 = arith.constant 0 : index
    %c0_8 = arith.constant 0 : index
    %8 = vector.load %arg4[%c0_7, %c0_8] : memref<1x128xf32, #tpu.memory_space<vmem>>, vector<1x128xf32>
    %9 = vector.shape_cast %8 : vector<1x128xf32> to vector<1x128xf32>
    %10 = vector.broadcast %9 : vector<1x128xf32> to vector<8x128xf32>
    %11 = vector.extract_strided_slice %7 {offsets = [0, 0], sizes = [8, 128], strides = [1, 1]} : vector<64x128xf32> to vector<8x128xf32>
    %12 = arith.negf %11 : vector<8x128xf32>
    %13 = math.exp %12 : vector<8x128xf32>
    %cst_9 = arith.constant 1.000000e+00 : f32
    %14 = vector.broadcast %cst_9 : f32 to vector<8x128xf32>
    %15 = arith.addf %14, %13 : vector<8x128xf32>
    %16 = arith.divf %14, %15 : vector<8x128xf32>
    %17 = vector.extract_strided_slice %16 {offsets = [0, 0], sizes = [8, 32], strides = [1, 1]} : vector<8x128xf32> to vector<8x32xf32>
    %18 = vector.extract_strided_slice %16 {offsets = [0, 64], sizes = [8, 32], strides = [1, 1]} : vector<8x128xf32> to vector<8x32xf32>
    %cst_10 = arith.constant 2.000000e+00 : f32
    %19 = vector.broadcast %cst_10 : f32 to vector<8x32xf32>
    %20 = arith.mulf %19, %18 : vector<8x32xf32>
    %cst_11 = arith.constant 1.000000e+00 : f32
    %21 = vector.broadcast %cst_11 : f32 to vector<8x32xf32>
    %22 = arith.subf %20, %21 : vector<8x32xf32>
    %23 = vector.extract_strided_slice %16 {offsets = [0, 96], sizes = [8, 32], strides = [1, 1]} : vector<8x128xf32> to vector<8x32xf32>
    %24 = arith.mulf %17, %22 : vector<8x32xf32>
    %25 = math.tanh %24 : vector<8x32xf32>
    %26 = arith.mulf %23, %25 : vector<8x32xf32>
    %cst_12 = arith.constant 0.000000e+00 : f32
    %27 = vector.broadcast %cst_12 : f32 to vector<8x32xf32>
    %cst_13 = arith.constant 0.000000e+00 : f32
    %28 = vector.broadcast %cst_13 : f32 to vector<8x32xf32>
    %29 = tpu.concatenate %26, %28 in 1 : vector<8x32xf32>, vector<8x32xf32> -> vector<8x64xf32>
    %30 = arith.truncf %29 : vector<8x64xf32> to vector<8x64xbf16>
    %cst_14 = arith.constant dense<0.000000e+00> : vector<8x256xf32>
    %31 = tpu.matmul %30, %1, %cst_14 {dimension_numbers = #tpu.dot_dimension_numbers<[1], [0], [0], [1], [0, 0, 1, 1], [], []>} : vector<8x64xbf16>, vector<64x256xbf16>, vector<8x256xf32> -> vector<8x256xf32>
    %32 = vector.extract_strided_slice %7 {offsets = [8, 0], sizes = [8, 128], strides = [1, 1]} : vector<64x128xf32> to vector<8x128xf32>
    %33 = tpu.concatenate %32, %10 in 1 : vector<8x128xf32>, vector<8x128xf32> -> vector<8x256xf32>
    %34 = arith.addf %31, %33 : vector<8x256xf32>
    %35 = arith.negf %34 : vector<8x256xf32>
    %36 = math.exp %35 : vector<8x256xf32>
    %cst_15 = arith.constant 1.000000e+00 : f32
    %37 = vector.broadcast %cst_15 : f32 to vector<8x256xf32>
    %38 = arith.addf %37, %36 : vector<8x256xf32>
    %39 = arith.divf %37, %38 : vector<8x256xf32>
    %40 = vector.extract_strided_slice %39 {offsets = [0, 0], sizes = [8, 128], strides = [1, 1]} : vector<8x256xf32> to vector<8x128xf32>
    %41 = vector.extract_strided_slice %40 {offsets = [0, 0], sizes = [8, 32], strides = [1, 1]} : vector<8x128xf32> to vector<8x32xf32>
    %42 = vector.extract_strided_slice %40 {offsets = [0, 32], sizes = [8, 32], strides = [1, 1]} : vector<8x128xf32> to vector<8x32xf32>
    %43 = vector.extract_strided_slice %40 {offsets = [0, 64], sizes = [8, 32], strides = [1, 1]} : vector<8x128xf32> to vector<8x32xf32>
    %cst_16 = arith.constant 2.000000e+00 : f32
    %44 = vector.broadcast %cst_16 : f32 to vector<8x32xf32>
    %45 = arith.mulf %44, %43 : vector<8x32xf32>
    %cst_17 = arith.constant 1.000000e+00 : f32
    %46 = vector.broadcast %cst_17 : f32 to vector<8x32xf32>
    %47 = arith.subf %45, %46 : vector<8x32xf32>
    %48 = vector.extract_strided_slice %40 {offsets = [0, 96], sizes = [8, 32], strides = [1, 1]} : vector<8x128xf32> to vector<8x32xf32>
    %49 = vector.extract_strided_slice %39 {offsets = [0, 128], sizes = [8, 128], strides = [1, 1]} : vector<8x256xf32> to vector<8x128xf32>
    %50 = vector.extract_strided_slice %49 {offsets = [0, 0], sizes = [8, 32], strides = [1, 1]} : vector<8x128xf32> to vector<8x32xf32>
    %51 = vector.extract_strided_slice %49 {offsets = [0, 32], sizes = [8, 32], strides = [1, 1]} : vector<8x128xf32> to vector<8x32xf32>
    %52 = vector.extract_strided_slice %49 {offsets = [0, 64], sizes = [8, 32], strides = [1, 1]} : vector<8x128xf32> to vector<8x32xf32>
    %cst_18 = arith.constant 2.000000e+00 : f32
    %53 = vector.broadcast %cst_18 : f32 to vector<8x32xf32>
    %54 = arith.mulf %53, %52 : vector<8x32xf32>
    %cst_19 = arith.constant 1.000000e+00 : f32
    %55 = vector.broadcast %cst_19 : f32 to vector<8x32xf32>
    %56 = arith.subf %54, %55 : vector<8x32xf32>
    %57 = vector.extract_strided_slice %49 {offsets = [0, 96], sizes = [8, 32], strides = [1, 1]} : vector<8x128xf32> to vector<8x32xf32>
    %58 = arith.mulf %42, %24 : vector<8x32xf32>
    %59 = arith.mulf %41, %47 : vector<8x32xf32>
    %60 = arith.addf %58, %59 : vector<8x32xf32>
    %61 = arith.mulf %51, %27 : vector<8x32xf32>
    %62 = arith.mulf %50, %56 : vector<8x32xf32>
    %63 = arith.addf %61, %62 : vector<8x32xf32>
    %64 = tpu.concatenate %60, %63 in 1 : vector<8x32xf32>, vector<8x32xf32> -> vector<8x64xf32>
    %65 = math.tanh %64 : vector<8x64xf32>
    %66 = vector.extract_strided_slice %65 {offsets = [0, 0], sizes = [8, 32], strides = [1, 1]} : vector<8x64xf32> to vector<8x32xf32>
    %67 = arith.mulf %48, %66 : vector<8x32xf32>
    %68 = vector.extract_strided_slice %65 {offsets = [0, 32], sizes = [8, 32], strides = [1, 1]} : vector<8x64xf32> to vector<8x32xf32>
    %69 = arith.mulf %57, %68 : vector<8x32xf32>
    %70 = tpu.concatenate %67, %69 in 1 : vector<8x32xf32>, vector<8x32xf32> -> vector<8x64xf32>
    %71 = arith.truncf %70 : vector<8x64xf32> to vector<8x64xbf16>
    %cst_20 = arith.constant dense<0.000000e+00> : vector<8x256xf32>
    %72 = tpu.matmul %71, %1, %cst_20 {dimension_numbers = #tpu.dot_dimension_numbers<[1], [0], [0], [1], [0, 0, 1, 1], [], []>} : vector<8x64xbf16>, vector<64x256xbf16>, vector<8x256xf32> -> vector<8x256xf32>
    %73 = vector.extract_strided_slice %7 {offsets = [16, 0], sizes = [8, 128], strides = [1, 1]} : vector<64x128xf32> to vector<8x128xf32>
    %74 = tpu.concatenate %73, %10 in 1 : vector<8x128xf32>, vector<8x128xf32> -> vector<8x256xf32>
    %75 = arith.addf %72, %74 : vector<8x256xf32>
    %76 = arith.negf %75 : vector<8x256xf32>
    %77 = math.exp %76 : vector<8x256xf32>
    %cst_21 = arith.constant 1.000000e+00 : f32
    %78 = vector.broadcast %cst_21 : f32 to vector<8x256xf32>
    %79 = arith.addf %78, %77 : vector<8x256xf32>
    %80 = arith.divf %78, %79 : vector<8x256xf32>
    %81 = vector.extract_strided_slice %80 {offsets = [0, 0], sizes = [8, 128], strides = [1, 1]} : vector<8x256xf32> to vector<8x128xf32>
    %82 = vector.extract_strided_slice %81 {offsets = [0, 0], sizes = [8, 32], strides = [1, 1]} : vector<8x128xf32> to vector<8x32xf32>
    %83 = vector.extract_strided_slice %81 {offsets = [0, 32], sizes = [8, 32], strides = [1, 1]} : vector<8x128xf32> to vector<8x32xf32>
    %84 = vector.extract_strided_slice %81 {offsets = [0, 64], sizes = [8, 32], strides = [1, 1]} : vector<8x128xf32> to vector<8x32xf32>
    %cst_22 = arith.constant 2.000000e+00 : f32
    %85 = vector.broadcast %cst_22 : f32 to vector<8x32xf32>
    %86 = arith.mulf %85, %84 : vector<8x32xf32>
    %cst_23 = arith.constant 1.000000e+00 : f32
    %87 = vector.broadcast %cst_23 : f32 to vector<8x32xf32>
    %88 = arith.subf %86, %87 : vector<8x32xf32>
    %89 = vector.extract_strided_slice %81 {offsets = [0, 96], sizes = [8, 32], strides = [1, 1]} : vector<8x128xf32> to vector<8x32xf32>
    %90 = vector.extract_strided_slice %80 {offsets = [0, 128], sizes = [8, 128], strides = [1, 1]} : vector<8x256xf32> to vector<8x128xf32>
    %91 = vector.extract_strided_slice %90 {offsets = [0, 0], sizes = [8, 32], strides = [1, 1]} : vector<8x128xf32> to vector<8x32xf32>
    %92 = vector.extract_strided_slice %90 {offsets = [0, 32], sizes = [8, 32], strides = [1, 1]} : vector<8x128xf32> to vector<8x32xf32>
    %93 = vector.extract_strided_slice %90 {offsets = [0, 64], sizes = [8, 32], strides = [1, 1]} : vector<8x128xf32> to vector<8x32xf32>
    %cst_24 = arith.constant 2.000000e+00 : f32
    %94 = vector.broadcast %cst_24 : f32 to vector<8x32xf32>
    %95 = arith.mulf %94, %93 : vector<8x32xf32>
    %cst_25 = arith.constant 1.000000e+00 : f32
    %96 = vector.broadcast %cst_25 : f32 to vector<8x32xf32>
    %97 = arith.subf %95, %96 : vector<8x32xf32>
    %98 = vector.extract_strided_slice %90 {offsets = [0, 96], sizes = [8, 32], strides = [1, 1]} : vector<8x128xf32> to vector<8x32xf32>
    %99 = arith.mulf %83, %60 : vector<8x32xf32>
    %100 = arith.mulf %82, %88 : vector<8x32xf32>
    %101 = arith.addf %99, %100 : vector<8x32xf32>
    %102 = arith.mulf %92, %63 : vector<8x32xf32>
    %103 = arith.mulf %91, %97 : vector<8x32xf32>
    %104 = arith.addf %102, %103 : vector<8x32xf32>
    %105 = tpu.concatenate %101, %104 in 1 : vector<8x32xf32>, vector<8x32xf32> -> vector<8x64xf32>
    %106 = math.tanh %105 : vector<8x64xf32>
    %107 = vector.extract_strided_slice %106 {offsets = [0, 0], sizes = [8, 32], strides = [1, 1]} : vector<8x64xf32> to vector<8x32xf32>
    %108 = arith.mulf %89, %107 : vector<8x32xf32>
    %109 = vector.extract_strided_slice %106 {offsets = [0, 32], sizes = [8, 32], strides = [1, 1]} : vector<8x64xf32> to vector<8x32xf32>
    %110 = arith.mulf %98, %109 : vector<8x32xf32>
    %111 = tpu.concatenate %108, %110 in 1 : vector<8x32xf32>, vector<8x32xf32> -> vector<8x64xf32>
    %112 = arith.truncf %111 : vector<8x64xf32> to vector<8x64xbf16>
    %cst_26 = arith.constant dense<0.000000e+00> : vector<8x256xf32>
    %113 = tpu.matmul %112, %1, %cst_26 {dimension_numbers = #tpu.dot_dimension_numbers<[1], [0], [0], [1], [0, 0, 1, 1], [], []>} : vector<8x64xbf16>, vector<64x256xbf16>, vector<8x256xf32> -> vector<8x256xf32>
    %114 = vector.extract_strided_slice %7 {offsets = [24, 0], sizes = [8, 128], strides = [1, 1]} : vector<64x128xf32> to vector<8x128xf32>
    %115 = tpu.concatenate %114, %10 in 1 : vector<8x128xf32>, vector<8x128xf32> -> vector<8x256xf32>
    %116 = arith.addf %113, %115 : vector<8x256xf32>
    %117 = arith.negf %116 : vector<8x256xf32>
    %118 = math.exp %117 : vector<8x256xf32>
    %cst_27 = arith.constant 1.000000e+00 : f32
    %119 = vector.broadcast %cst_27 : f32 to vector<8x256xf32>
    %120 = arith.addf %119, %118 : vector<8x256xf32>
    %121 = arith.divf %119, %120 : vector<8x256xf32>
    %122 = vector.extract_strided_slice %121 {offsets = [0, 0], sizes = [8, 128], strides = [1, 1]} : vector<8x256xf32> to vector<8x128xf32>
    %123 = vector.extract_strided_slice %122 {offsets = [0, 0], sizes = [8, 32], strides = [1, 1]} : vector<8x128xf32> to vector<8x32xf32>
    %124 = vector.extract_strided_slice %122 {offsets = [0, 32], sizes = [8, 32], strides = [1, 1]} : vector<8x128xf32> to vector<8x32xf32>
    %125 = vector.extract_strided_slice %122 {offsets = [0, 64], sizes = [8, 32], strides = [1, 1]} : vector<8x128xf32> to vector<8x32xf32>
    %cst_28 = arith.constant 2.000000e+00 : f32
    %126 = vector.broadcast %cst_28 : f32 to vector<8x32xf32>
    %127 = arith.mulf %126, %125 : vector<8x32xf32>
    %cst_29 = arith.constant 1.000000e+00 : f32
    %128 = vector.broadcast %cst_29 : f32 to vector<8x32xf32>
    %129 = arith.subf %127, %128 : vector<8x32xf32>
    %130 = vector.extract_strided_slice %122 {offsets = [0, 96], sizes = [8, 32], strides = [1, 1]} : vector<8x128xf32> to vector<8x32xf32>
    %131 = vector.extract_strided_slice %121 {offsets = [0, 128], sizes = [8, 128], strides = [1, 1]} : vector<8x256xf32> to vector<8x128xf32>
    %132 = vector.extract_strided_slice %131 {offsets = [0, 0], sizes = [8, 32], strides = [1, 1]} : vector<8x128xf32> to vector<8x32xf32>
    %133 = vector.extract_strided_slice %131 {offsets = [0, 32], sizes = [8, 32], strides = [1, 1]} : vector<8x128xf32> to vector<8x32xf32>
    %134 = vector.extract_strided_slice %131 {offsets = [0, 64], sizes = [8, 32], strides = [1, 1]} : vector<8x128xf32> to vector<8x32xf32>
    %cst_30 = arith.constant 2.000000e+00 : f32
    %135 = vector.broadcast %cst_30 : f32 to vector<8x32xf32>
    %136 = arith.mulf %135, %134 : vector<8x32xf32>
    %cst_31 = arith.constant 1.000000e+00 : f32
    %137 = vector.broadcast %cst_31 : f32 to vector<8x32xf32>
    %138 = arith.subf %136, %137 : vector<8x32xf32>
    %139 = vector.extract_strided_slice %131 {offsets = [0, 96], sizes = [8, 32], strides = [1, 1]} : vector<8x128xf32> to vector<8x32xf32>
    %140 = arith.mulf %124, %101 : vector<8x32xf32>
    %141 = arith.mulf %123, %129 : vector<8x32xf32>
    %142 = arith.addf %140, %141 : vector<8x32xf32>
    %143 = arith.mulf %133, %104 : vector<8x32xf32>
    %144 = arith.mulf %132, %138 : vector<8x32xf32>
    %145 = arith.addf %143, %144 : vector<8x32xf32>
    %146 = tpu.concatenate %142, %145 in 1 : vector<8x32xf32>, vector<8x32xf32> -> vector<8x64xf32>
    %147 = math.tanh %146 : vector<8x64xf32>
    %148 = vector.extract_strided_slice %147 {offsets = [0, 0], sizes = [8, 32], strides = [1, 1]} : vector<8x64xf32> to vector<8x32xf32>
    %149 = arith.mulf %130, %148 : vector<8x32xf32>
    %150 = vector.extract_strided_slice %147 {offsets = [0, 32], sizes = [8, 32], strides = [1, 1]} : vector<8x64xf32> to vector<8x32xf32>
    %151 = arith.mulf %139, %150 : vector<8x32xf32>
    %152 = tpu.concatenate %149, %151 in 1 : vector<8x32xf32>, vector<8x32xf32> -> vector<8x64xf32>
    %153 = arith.truncf %152 : vector<8x64xf32> to vector<8x64xbf16>
    %cst_32 = arith.constant dense<0.000000e+00> : vector<8x256xf32>
    %154 = tpu.matmul %153, %1, %cst_32 {dimension_numbers = #tpu.dot_dimension_numbers<[1], [0], [0], [1], [0, 0, 1, 1], [], []>} : vector<8x64xbf16>, vector<64x256xbf16>, vector<8x256xf32> -> vector<8x256xf32>
    %155 = vector.extract_strided_slice %7 {offsets = [32, 0], sizes = [8, 128], strides = [1, 1]} : vector<64x128xf32> to vector<8x128xf32>
    %156 = tpu.concatenate %155, %10 in 1 : vector<8x128xf32>, vector<8x128xf32> -> vector<8x256xf32>
    %157 = arith.addf %154, %156 : vector<8x256xf32>
    %158 = arith.negf %157 : vector<8x256xf32>
    %159 = math.exp %158 : vector<8x256xf32>
    %cst_33 = arith.constant 1.000000e+00 : f32
    %160 = vector.broadcast %cst_33 : f32 to vector<8x256xf32>
    %161 = arith.addf %160, %159 : vector<8x256xf32>
    %162 = arith.divf %160, %161 : vector<8x256xf32>
    %163 = vector.extract_strided_slice %162 {offsets = [0, 0], sizes = [8, 128], strides = [1, 1]} : vector<8x256xf32> to vector<8x128xf32>
    %164 = vector.extract_strided_slice %163 {offsets = [0, 0], sizes = [8, 32], strides = [1, 1]} : vector<8x128xf32> to vector<8x32xf32>
    %165 = vector.extract_strided_slice %163 {offsets = [0, 32], sizes = [8, 32], strides = [1, 1]} : vector<8x128xf32> to vector<8x32xf32>
    %166 = vector.extract_strided_slice %163 {offsets = [0, 64], sizes = [8, 32], strides = [1, 1]} : vector<8x128xf32> to vector<8x32xf32>
    %cst_34 = arith.constant 2.000000e+00 : f32
    %167 = vector.broadcast %cst_34 : f32 to vector<8x32xf32>
    %168 = arith.mulf %167, %166 : vector<8x32xf32>
    %cst_35 = arith.constant 1.000000e+00 : f32
    %169 = vector.broadcast %cst_35 : f32 to vector<8x32xf32>
    %170 = arith.subf %168, %169 : vector<8x32xf32>
    %171 = vector.extract_strided_slice %163 {offsets = [0, 96], sizes = [8, 32], strides = [1, 1]} : vector<8x128xf32> to vector<8x32xf32>
    %172 = vector.extract_strided_slice %162 {offsets = [0, 128], sizes = [8, 128], strides = [1, 1]} : vector<8x256xf32> to vector<8x128xf32>
    %173 = vector.extract_strided_slice %172 {offsets = [0, 0], sizes = [8, 32], strides = [1, 1]} : vector<8x128xf32> to vector<8x32xf32>
    %174 = vector.extract_strided_slice %172 {offsets = [0, 32], sizes = [8, 32], strides = [1, 1]} : vector<8x128xf32> to vector<8x32xf32>
    %175 = vector.extract_strided_slice %172 {offsets = [0, 64], sizes = [8, 32], strides = [1, 1]} : vector<8x128xf32> to vector<8x32xf32>
    %cst_36 = arith.constant 2.000000e+00 : f32
    %176 = vector.broadcast %cst_36 : f32 to vector<8x32xf32>
    %177 = arith.mulf %176, %175 : vector<8x32xf32>
    %cst_37 = arith.constant 1.000000e+00 : f32
    %178 = vector.broadcast %cst_37 : f32 to vector<8x32xf32>
    %179 = arith.subf %177, %178 : vector<8x32xf32>
    %180 = vector.extract_strided_slice %172 {offsets = [0, 96], sizes = [8, 32], strides = [1, 1]} : vector<8x128xf32> to vector<8x32xf32>
    %181 = arith.mulf %165, %142 : vector<8x32xf32>
    %182 = arith.mulf %164, %170 : vector<8x32xf32>
    %183 = arith.addf %181, %182 : vector<8x32xf32>
    %184 = arith.mulf %174, %145 : vector<8x32xf32>
    %185 = arith.mulf %173, %179 : vector<8x32xf32>
    %186 = arith.addf %184, %185 : vector<8x32xf32>
    %187 = tpu.concatenate %183, %186 in 1 : vector<8x32xf32>, vector<8x32xf32> -> vector<8x64xf32>
    %188 = math.tanh %187 : vector<8x64xf32>
    %189 = vector.extract_strided_slice %188 {offsets = [0, 0], sizes = [8, 32], strides = [1, 1]} : vector<8x64xf32> to vector<8x32xf32>
    %190 = arith.mulf %171, %189 : vector<8x32xf32>
    %191 = vector.extract_strided_slice %188 {offsets = [0, 32], sizes = [8, 32], strides = [1, 1]} : vector<8x64xf32> to vector<8x32xf32>
    %192 = arith.mulf %180, %191 : vector<8x32xf32>
    %193 = tpu.concatenate %190, %192 in 1 : vector<8x32xf32>, vector<8x32xf32> -> vector<8x64xf32>
    %194 = arith.truncf %193 : vector<8x64xf32> to vector<8x64xbf16>
    %cst_38 = arith.constant dense<0.000000e+00> : vector<8x256xf32>
    %195 = tpu.matmul %194, %1, %cst_38 {dimension_numbers = #tpu.dot_dimension_numbers<[1], [0], [0], [1], [0, 0, 1, 1], [], []>} : vector<8x64xbf16>, vector<64x256xbf16>, vector<8x256xf32> -> vector<8x256xf32>
    %196 = vector.extract_strided_slice %7 {offsets = [40, 0], sizes = [8, 128], strides = [1, 1]} : vector<64x128xf32> to vector<8x128xf32>
    %197 = tpu.concatenate %196, %10 in 1 : vector<8x128xf32>, vector<8x128xf32> -> vector<8x256xf32>
    %198 = arith.addf %195, %197 : vector<8x256xf32>
    %199 = arith.negf %198 : vector<8x256xf32>
    %200 = math.exp %199 : vector<8x256xf32>
    %cst_39 = arith.constant 1.000000e+00 : f32
    %201 = vector.broadcast %cst_39 : f32 to vector<8x256xf32>
    %202 = arith.addf %201, %200 : vector<8x256xf32>
    %203 = arith.divf %201, %202 : vector<8x256xf32>
    %204 = vector.extract_strided_slice %203 {offsets = [0, 0], sizes = [8, 128], strides = [1, 1]} : vector<8x256xf32> to vector<8x128xf32>
    %205 = vector.extract_strided_slice %204 {offsets = [0, 0], sizes = [8, 32], strides = [1, 1]} : vector<8x128xf32> to vector<8x32xf32>
    %206 = vector.extract_strided_slice %204 {offsets = [0, 32], sizes = [8, 32], strides = [1, 1]} : vector<8x128xf32> to vector<8x32xf32>
    %207 = vector.extract_strided_slice %204 {offsets = [0, 64], sizes = [8, 32], strides = [1, 1]} : vector<8x128xf32> to vector<8x32xf32>
    %cst_40 = arith.constant 2.000000e+00 : f32
    %208 = vector.broadcast %cst_40 : f32 to vector<8x32xf32>
    %209 = arith.mulf %208, %207 : vector<8x32xf32>
    %cst_41 = arith.constant 1.000000e+00 : f32
    %210 = vector.broadcast %cst_41 : f32 to vector<8x32xf32>
    %211 = arith.subf %209, %210 : vector<8x32xf32>
    %212 = vector.extract_strided_slice %204 {offsets = [0, 96], sizes = [8, 32], strides = [1, 1]} : vector<8x128xf32> to vector<8x32xf32>
    %213 = vector.extract_strided_slice %203 {offsets = [0, 128], sizes = [8, 128], strides = [1, 1]} : vector<8x256xf32> to vector<8x128xf32>
    %214 = vector.extract_strided_slice %213 {offsets = [0, 0], sizes = [8, 32], strides = [1, 1]} : vector<8x128xf32> to vector<8x32xf32>
    %215 = vector.extract_strided_slice %213 {offsets = [0, 32], sizes = [8, 32], strides = [1, 1]} : vector<8x128xf32> to vector<8x32xf32>
    %216 = vector.extract_strided_slice %213 {offsets = [0, 64], sizes = [8, 32], strides = [1, 1]} : vector<8x128xf32> to vector<8x32xf32>
    %cst_42 = arith.constant 2.000000e+00 : f32
    %217 = vector.broadcast %cst_42 : f32 to vector<8x32xf32>
    %218 = arith.mulf %217, %216 : vector<8x32xf32>
    %cst_43 = arith.constant 1.000000e+00 : f32
    %219 = vector.broadcast %cst_43 : f32 to vector<8x32xf32>
    %220 = arith.subf %218, %219 : vector<8x32xf32>
    %221 = vector.extract_strided_slice %213 {offsets = [0, 96], sizes = [8, 32], strides = [1, 1]} : vector<8x128xf32> to vector<8x32xf32>
    %222 = arith.mulf %206, %183 : vector<8x32xf32>
    %223 = arith.mulf %205, %211 : vector<8x32xf32>
    %224 = arith.addf %222, %223 : vector<8x32xf32>
    %225 = arith.mulf %215, %186 : vector<8x32xf32>
    %226 = arith.mulf %214, %220 : vector<8x32xf32>
    %227 = arith.addf %225, %226 : vector<8x32xf32>
    %228 = tpu.concatenate %224, %227 in 1 : vector<8x32xf32>, vector<8x32xf32> -> vector<8x64xf32>
    %229 = math.tanh %228 : vector<8x64xf32>
    %230 = vector.extract_strided_slice %229 {offsets = [0, 0], sizes = [8, 32], strides = [1, 1]} : vector<8x64xf32> to vector<8x32xf32>
    %231 = arith.mulf %212, %230 : vector<8x32xf32>
    %232 = vector.extract_strided_slice %229 {offsets = [0, 32], sizes = [8, 32], strides = [1, 1]} : vector<8x64xf32> to vector<8x32xf32>
    %233 = arith.mulf %221, %232 : vector<8x32xf32>
    %234 = tpu.concatenate %231, %233 in 1 : vector<8x32xf32>, vector<8x32xf32> -> vector<8x64xf32>
    %235 = arith.truncf %234 : vector<8x64xf32> to vector<8x64xbf16>
    %cst_44 = arith.constant dense<0.000000e+00> : vector<8x256xf32>
    %236 = tpu.matmul %235, %1, %cst_44 {dimension_numbers = #tpu.dot_dimension_numbers<[1], [0], [0], [1], [0, 0, 1, 1], [], []>} : vector<8x64xbf16>, vector<64x256xbf16>, vector<8x256xf32> -> vector<8x256xf32>
    %237 = vector.extract_strided_slice %7 {offsets = [48, 0], sizes = [8, 128], strides = [1, 1]} : vector<64x128xf32> to vector<8x128xf32>
    %238 = tpu.concatenate %237, %10 in 1 : vector<8x128xf32>, vector<8x128xf32> -> vector<8x256xf32>
    %239 = arith.addf %236, %238 : vector<8x256xf32>
    %240 = arith.negf %239 : vector<8x256xf32>
    %241 = math.exp %240 : vector<8x256xf32>
    %cst_45 = arith.constant 1.000000e+00 : f32
    %242 = vector.broadcast %cst_45 : f32 to vector<8x256xf32>
    %243 = arith.addf %242, %241 : vector<8x256xf32>
    %244 = arith.divf %242, %243 : vector<8x256xf32>
    %245 = vector.extract_strided_slice %244 {offsets = [0, 0], sizes = [8, 128], strides = [1, 1]} : vector<8x256xf32> to vector<8x128xf32>
    %246 = vector.extract_strided_slice %245 {offsets = [0, 0], sizes = [8, 32], strides = [1, 1]} : vector<8x128xf32> to vector<8x32xf32>
    %247 = vector.extract_strided_slice %245 {offsets = [0, 32], sizes = [8, 32], strides = [1, 1]} : vector<8x128xf32> to vector<8x32xf32>
    %248 = vector.extract_strided_slice %245 {offsets = [0, 64], sizes = [8, 32], strides = [1, 1]} : vector<8x128xf32> to vector<8x32xf32>
    %cst_46 = arith.constant 2.000000e+00 : f32
    %249 = vector.broadcast %cst_46 : f32 to vector<8x32xf32>
    %250 = arith.mulf %249, %248 : vector<8x32xf32>
    %cst_47 = arith.constant 1.000000e+00 : f32
    %251 = vector.broadcast %cst_47 : f32 to vector<8x32xf32>
    %252 = arith.subf %250, %251 : vector<8x32xf32>
    %253 = vector.extract_strided_slice %245 {offsets = [0, 96], sizes = [8, 32], strides = [1, 1]} : vector<8x128xf32> to vector<8x32xf32>
    %254 = vector.extract_strided_slice %244 {offsets = [0, 128], sizes = [8, 128], strides = [1, 1]} : vector<8x256xf32> to vector<8x128xf32>
    %255 = vector.extract_strided_slice %254 {offsets = [0, 0], sizes = [8, 32], strides = [1, 1]} : vector<8x128xf32> to vector<8x32xf32>
    %256 = vector.extract_strided_slice %254 {offsets = [0, 32], sizes = [8, 32], strides = [1, 1]} : vector<8x128xf32> to vector<8x32xf32>
    %257 = vector.extract_strided_slice %254 {offsets = [0, 64], sizes = [8, 32], strides = [1, 1]} : vector<8x128xf32> to vector<8x32xf32>
    %cst_48 = arith.constant 2.000000e+00 : f32
    %258 = vector.broadcast %cst_48 : f32 to vector<8x32xf32>
    %259 = arith.mulf %258, %257 : vector<8x32xf32>
    %cst_49 = arith.constant 1.000000e+00 : f32
    %260 = vector.broadcast %cst_49 : f32 to vector<8x32xf32>
    %261 = arith.subf %259, %260 : vector<8x32xf32>
    %262 = vector.extract_strided_slice %254 {offsets = [0, 96], sizes = [8, 32], strides = [1, 1]} : vector<8x128xf32> to vector<8x32xf32>
    %263 = arith.mulf %247, %224 : vector<8x32xf32>
    %264 = arith.mulf %246, %252 : vector<8x32xf32>
    %265 = arith.addf %263, %264 : vector<8x32xf32>
    %266 = arith.mulf %256, %227 : vector<8x32xf32>
    %267 = arith.mulf %255, %261 : vector<8x32xf32>
    %268 = arith.addf %266, %267 : vector<8x32xf32>
    %269 = tpu.concatenate %265, %268 in 1 : vector<8x32xf32>, vector<8x32xf32> -> vector<8x64xf32>
    %270 = math.tanh %269 : vector<8x64xf32>
    %271 = vector.extract_strided_slice %270 {offsets = [0, 0], sizes = [8, 32], strides = [1, 1]} : vector<8x64xf32> to vector<8x32xf32>
    %272 = arith.mulf %253, %271 : vector<8x32xf32>
    %273 = vector.extract_strided_slice %270 {offsets = [0, 32], sizes = [8, 32], strides = [1, 1]} : vector<8x64xf32> to vector<8x32xf32>
    %274 = arith.mulf %262, %273 : vector<8x32xf32>
    %275 = tpu.concatenate %272, %274 in 1 : vector<8x32xf32>, vector<8x32xf32> -> vector<8x64xf32>
    %276 = arith.truncf %275 : vector<8x64xf32> to vector<8x64xbf16>
    %cst_50 = arith.constant dense<0.000000e+00> : vector<8x256xf32>
    %277 = tpu.matmul %276, %1, %cst_50 {dimension_numbers = #tpu.dot_dimension_numbers<[1], [0], [0], [1], [0, 0, 1, 1], [], []>} : vector<8x64xbf16>, vector<64x256xbf16>, vector<8x256xf32> -> vector<8x256xf32>
    %278 = vector.extract_strided_slice %7 {offsets = [56, 0], sizes = [8, 128], strides = [1, 1]} : vector<64x128xf32> to vector<8x128xf32>
    %279 = tpu.concatenate %278, %10 in 1 : vector<8x128xf32>, vector<8x128xf32> -> vector<8x256xf32>
    %280 = arith.addf %277, %279 : vector<8x256xf32>
    %281 = arith.negf %280 : vector<8x256xf32>
    %282 = math.exp %281 : vector<8x256xf32>
    %cst_51 = arith.constant 1.000000e+00 : f32
    %283 = vector.broadcast %cst_51 : f32 to vector<8x256xf32>
    %284 = arith.addf %283, %282 : vector<8x256xf32>
    %285 = arith.divf %283, %284 : vector<8x256xf32>
    %286 = vector.extract_strided_slice %285 {offsets = [0, 0], sizes = [8, 128], strides = [1, 1]} : vector<8x256xf32> to vector<8x128xf32>
    %287 = vector.extract_strided_slice %286 {offsets = [0, 0], sizes = [8, 32], strides = [1, 1]} : vector<8x128xf32> to vector<8x32xf32>
    %288 = vector.extract_strided_slice %286 {offsets = [0, 32], sizes = [8, 32], strides = [1, 1]} : vector<8x128xf32> to vector<8x32xf32>
    %289 = vector.extract_strided_slice %286 {offsets = [0, 64], sizes = [8, 32], strides = [1, 1]} : vector<8x128xf32> to vector<8x32xf32>
    %cst_52 = arith.constant 2.000000e+00 : f32
    %290 = vector.broadcast %cst_52 : f32 to vector<8x32xf32>
    %291 = arith.mulf %290, %289 : vector<8x32xf32>
    %cst_53 = arith.constant 1.000000e+00 : f32
    %292 = vector.broadcast %cst_53 : f32 to vector<8x32xf32>
    %293 = arith.subf %291, %292 : vector<8x32xf32>
    %294 = vector.extract_strided_slice %286 {offsets = [0, 96], sizes = [8, 32], strides = [1, 1]} : vector<8x128xf32> to vector<8x32xf32>
    %295 = vector.extract_strided_slice %285 {offsets = [0, 128], sizes = [8, 128], strides = [1, 1]} : vector<8x256xf32> to vector<8x128xf32>
    %296 = vector.extract_strided_slice %295 {offsets = [0, 0], sizes = [8, 32], strides = [1, 1]} : vector<8x128xf32> to vector<8x32xf32>
    %297 = vector.extract_strided_slice %295 {offsets = [0, 32], sizes = [8, 32], strides = [1, 1]} : vector<8x128xf32> to vector<8x32xf32>
    %298 = vector.extract_strided_slice %295 {offsets = [0, 64], sizes = [8, 32], strides = [1, 1]} : vector<8x128xf32> to vector<8x32xf32>
    %cst_54 = arith.constant 2.000000e+00 : f32
    %299 = vector.broadcast %cst_54 : f32 to vector<8x32xf32>
    %300 = arith.mulf %299, %298 : vector<8x32xf32>
    %cst_55 = arith.constant 1.000000e+00 : f32
    %301 = vector.broadcast %cst_55 : f32 to vector<8x32xf32>
    %302 = arith.subf %300, %301 : vector<8x32xf32>
    %303 = vector.extract_strided_slice %295 {offsets = [0, 96], sizes = [8, 32], strides = [1, 1]} : vector<8x128xf32> to vector<8x32xf32>
    %304 = arith.mulf %288, %265 : vector<8x32xf32>
    %305 = arith.mulf %287, %293 : vector<8x32xf32>
    %306 = arith.addf %304, %305 : vector<8x32xf32>
    %307 = arith.mulf %297, %268 : vector<8x32xf32>
    %308 = arith.mulf %296, %302 : vector<8x32xf32>
    %309 = arith.addf %307, %308 : vector<8x32xf32>
    %310 = tpu.concatenate %306, %309 in 1 : vector<8x32xf32>, vector<8x32xf32> -> vector<8x64xf32>
    %311 = math.tanh %310 : vector<8x64xf32>
    %312 = vector.extract_strided_slice %311 {offsets = [0, 0], sizes = [8, 32], strides = [1, 1]} : vector<8x64xf32> to vector<8x32xf32>
    %313 = arith.mulf %294, %312 : vector<8x32xf32>
    %314 = vector.extract_strided_slice %311 {offsets = [0, 32], sizes = [8, 32], strides = [1, 1]} : vector<8x64xf32> to vector<8x32xf32>
    %315 = arith.mulf %303, %314 : vector<8x32xf32>
    %316 = tpu.concatenate %313, %315 in 1 : vector<8x32xf32>, vector<8x32xf32> -> vector<8x64xf32>
    %317 = arith.truncf %316 : vector<8x64xf32> to vector<8x64xbf16>
    %cst_56 = arith.constant dense<0.000000e+00> : vector<8x256xf32>
    %318 = tpu.matmul %317, %1, %cst_56 {dimension_numbers = #tpu.dot_dimension_numbers<[1], [0], [0], [1], [0, 0, 1, 1], [], []>} : vector<8x64xbf16>, vector<64x256xbf16>, vector<8x256xf32> -> vector<8x256xf32>
    %319 = vector.extract_strided_slice %318 {offsets = [0, 128], sizes = [8, 128], strides = [1, 1]} : vector<8x256xf32> to vector<8x128xf32>
    %320 = arith.addf %319, %10 : vector<8x128xf32>
    %321 = arith.negf %320 : vector<8x128xf32>
    %322 = math.exp %321 : vector<8x128xf32>
    %cst_57 = arith.constant 1.000000e+00 : f32
    %323 = vector.broadcast %cst_57 : f32 to vector<8x128xf32>
    %324 = arith.addf %323, %322 : vector<8x128xf32>
    %325 = arith.divf %323, %324 : vector<8x128xf32>
    %326 = vector.extract_strided_slice %325 {offsets = [0, 0], sizes = [8, 32], strides = [1, 1]} : vector<8x128xf32> to vector<8x32xf32>
    %327 = vector.extract_strided_slice %325 {offsets = [0, 32], sizes = [8, 32], strides = [1, 1]} : vector<8x128xf32> to vector<8x32xf32>
    %328 = vector.extract_strided_slice %325 {offsets = [0, 64], sizes = [8, 32], strides = [1, 1]} : vector<8x128xf32> to vector<8x32xf32>
    %cst_58 = arith.constant 2.000000e+00 : f32
    %329 = vector.broadcast %cst_58 : f32 to vector<8x32xf32>
    %330 = arith.mulf %329, %328 : vector<8x32xf32>
    %cst_59 = arith.constant 1.000000e+00 : f32
    %331 = vector.broadcast %cst_59 : f32 to vector<8x32xf32>
    %332 = arith.subf %330, %331 : vector<8x32xf32>
    %333 = vector.extract_strided_slice %325 {offsets = [0, 96], sizes = [8, 32], strides = [1, 1]} : vector<8x128xf32> to vector<8x32xf32>
    %334 = arith.mulf %327, %309 : vector<8x32xf32>
    %335 = arith.mulf %326, %332 : vector<8x32xf32>
    %336 = arith.addf %334, %335 : vector<8x32xf32>
    %337 = math.tanh %336 : vector<8x32xf32>
    %338 = arith.mulf %333, %337 : vector<8x32xf32>
    %339 = tpu.concatenate %69, %110, %151, %192, %233, %274, %315, %338 in 0 : vector<8x32xf32>, vector<8x32xf32>, vector<8x32xf32>, vector<8x32xf32>, vector<8x32xf32>, vector<8x32xf32>, vector<8x32xf32>, vector<8x32xf32> -> vector<64x32xf32>
    %c0_60 = arith.constant 0 : index
    %c0_61 = arith.constant 0 : index
    %340 = vector.load %arg5[%c0_60, %c0_61] : memref<32x16xf32, #tpu.memory_space<vmem>>, vector<32x16xf32>
    %cst_62 = arith.constant dense<0.000000e+00> : vector<64x16xf32>
    %341 = tpu.matmul %339, %340, %cst_62 {dimension_numbers = #tpu.dot_dimension_numbers<[1], [0], [0], [1], [0, 0, 1, 1], [], []>} : vector<64x32xf32>, vector<32x16xf32>, vector<64x16xf32> -> vector<64x16xf32>
    %c0_63 = arith.constant 0 : index
    %c0_64 = arith.constant 0 : index
    %342 = vector.load %arg6[%c0_63, %c0_64] : memref<1x16xf32, #tpu.memory_space<vmem>>, vector<1x16xf32>
    %343 = vector.broadcast %342 : vector<1x16xf32> to vector<64x16xf32>
    %344 = arith.addf %341, %343 : vector<64x16xf32>
    %cst_65 = arith.constant 0.000000e+00 : f32
    %345 = vector.broadcast %cst_65 : f32 to vector<64x16xf32>
    %346 = arith.cmpf ogt, %344, %345 : vector<64x16xf32>
    %cst_66 = arith.constant 0.00999999977 : f32
    %347 = vector.broadcast %cst_66 : f32 to vector<64x16xf32>
    %348 = arith.mulf %347, %344 : vector<64x16xf32>
    %349 = arith.select %346, %344, %348 : vector<64x16xi1>, vector<64x16xf32>
    %c0_67 = arith.constant 0 : index
    %c0_68 = arith.constant 0 : index
    %350 = vector.load %arg7[%c0_67, %c0_68] : memref<16x8xf32, #tpu.memory_space<vmem>>, vector<16x8xf32>
    %cst_69 = arith.constant dense<0.000000e+00> : vector<64x8xf32>
    %351 = tpu.matmul %349, %350, %cst_69 {dimension_numbers = #tpu.dot_dimension_numbers<[1], [0], [0], [1], [0, 0, 1, 1], [], []>} : vector<64x16xf32>, vector<16x8xf32>, vector<64x8xf32> -> vector<64x8xf32>
    %c0_70 = arith.constant 0 : index
    %c0_71 = arith.constant 0 : index
    %352 = vector.load %arg8[%c0_70, %c0_71] : memref<1x8xf32, #tpu.memory_space<vmem>>, vector<1x8xf32>
    %353 = vector.broadcast %352 : vector<1x8xf32> to vector<64x8xf32>
    %354 = arith.addf %351, %353 : vector<64x8xf32>
    %cst_72 = arith.constant 0.000000e+00 : f32
    %355 = vector.broadcast %cst_72 : f32 to vector<64x8xf32>
    %356 = arith.cmpf ogt, %354, %355 : vector<64x8xf32>
    %cst_73 = arith.constant 0.00999999977 : f32
    %357 = vector.broadcast %cst_73 : f32 to vector<64x8xf32>
    %358 = arith.mulf %357, %354 : vector<64x8xf32>
    %359 = arith.select %356, %354, %358 : vector<64x8xi1>, vector<64x8xf32>
    %c0_74 = arith.constant 0 : index
    %c0_75 = arith.constant 0 : index
    %360 = vector.load %arg9[%c0_74, %c0_75] : memref<8x2xf32, #tpu.memory_space<vmem>>, vector<8x2xf32>
    %cst_76 = arith.constant dense<0.000000e+00> : vector<64x2xf32>
    %361 = tpu.matmul %359, %360, %cst_76 {dimension_numbers = #tpu.dot_dimension_numbers<[1], [0], [0], [1], [0, 0, 1, 1], [], []>} : vector<64x8xf32>, vector<8x2xf32>, vector<64x2xf32> -> vector<64x2xf32>
    %c0_77 = arith.constant 0 : index
    %c0_78 = arith.constant 0 : index
    %362 = vector.load %arg10[%c0_77, %c0_78] : memref<1x2xf32, #tpu.memory_space<vmem>>, vector<1x2xf32>
    %363 = vector.broadcast %362 : vector<1x2xf32> to vector<64x2xf32>
    %364 = arith.addf %361, %363 : vector<64x2xf32>
    %365 = arith.negf %364 : vector<64x2xf32>
    %366 = math.exp %365 : vector<64x2xf32>
    %cst_79 = arith.constant 1.000000e+00 : f32
    %367 = vector.broadcast %cst_79 : f32 to vector<64x2xf32>
    %368 = arith.addf %367, %366 : vector<64x2xf32>
    %369 = arith.divf %367, %368 : vector<64x2xf32>
    %cst_80 = arith.constant 1.000000e+00 : f32
    %370 = vector.broadcast %cst_80 : f32 to vector<8x2xf32>
    %371 = vector.extract_strided_slice %369 {offsets = [56, 0], sizes = [8, 2], strides = [1, 1]} : vector<64x2xf32> to vector<8x2xf32>
    %cst_81 = arith.constant 1.000000e+00 : f32
    %372 = vector.broadcast %cst_81 : f32 to vector<8x2xf32>
    %373 = arith.subf %372, %371 : vector<8x2xf32>
    %374 = arith.mulf %373, %370 : vector<8x2xf32>
    %375 = arith.mulf %370, %371 : vector<8x2xf32>
    %376 = vector.extract_strided_slice %369 {offsets = [48, 0], sizes = [8, 2], strides = [1, 1]} : vector<64x2xf32> to vector<8x2xf32>
    %cst_82 = arith.constant 1.000000e+00 : f32
    %377 = vector.broadcast %cst_82 : f32 to vector<8x2xf32>
    %378 = arith.subf %377, %376 : vector<8x2xf32>
    %379 = arith.mulf %378, %375 : vector<8x2xf32>
    %380 = arith.mulf %375, %376 : vector<8x2xf32>
    %381 = vector.extract_strided_slice %369 {offsets = [40, 0], sizes = [8, 2], strides = [1, 1]} : vector<64x2xf32> to vector<8x2xf32>
    %cst_83 = arith.constant 1.000000e+00 : f32
    %382 = vector.broadcast %cst_83 : f32 to vector<8x2xf32>
    %383 = arith.subf %382, %381 : vector<8x2xf32>
    %384 = arith.mulf %383, %380 : vector<8x2xf32>
    %385 = arith.mulf %380, %381 : vector<8x2xf32>
    %386 = vector.extract_strided_slice %369 {offsets = [32, 0], sizes = [8, 2], strides = [1, 1]} : vector<64x2xf32> to vector<8x2xf32>
    %cst_84 = arith.constant 1.000000e+00 : f32
    %387 = vector.broadcast %cst_84 : f32 to vector<8x2xf32>
    %388 = arith.subf %387, %386 : vector<8x2xf32>
    %389 = arith.mulf %388, %385 : vector<8x2xf32>
    %390 = arith.mulf %385, %386 : vector<8x2xf32>
    %391 = vector.extract_strided_slice %369 {offsets = [24, 0], sizes = [8, 2], strides = [1, 1]} : vector<64x2xf32> to vector<8x2xf32>
    %cst_85 = arith.constant 1.000000e+00 : f32
    %392 = vector.broadcast %cst_85 : f32 to vector<8x2xf32>
    %393 = arith.subf %392, %391 : vector<8x2xf32>
    %394 = arith.mulf %393, %390 : vector<8x2xf32>
    %395 = arith.mulf %390, %391 : vector<8x2xf32>
    %396 = vector.extract_strided_slice %369 {offsets = [16, 0], sizes = [8, 2], strides = [1, 1]} : vector<64x2xf32> to vector<8x2xf32>
    %cst_86 = arith.constant 1.000000e+00 : f32
    %397 = vector.broadcast %cst_86 : f32 to vector<8x2xf32>
    %398 = arith.subf %397, %396 : vector<8x2xf32>
    %399 = arith.mulf %398, %395 : vector<8x2xf32>
    %400 = arith.mulf %395, %396 : vector<8x2xf32>
    %401 = vector.extract_strided_slice %369 {offsets = [8, 0], sizes = [8, 2], strides = [1, 1]} : vector<64x2xf32> to vector<8x2xf32>
    %cst_87 = arith.constant 1.000000e+00 : f32
    %402 = vector.broadcast %cst_87 : f32 to vector<8x2xf32>
    %403 = arith.subf %402, %401 : vector<8x2xf32>
    %404 = arith.mulf %403, %400 : vector<8x2xf32>
    %405 = arith.mulf %400, %401 : vector<8x2xf32>
    %406 = vector.extract_strided_slice %369 {offsets = [0, 0], sizes = [8, 2], strides = [1, 1]} : vector<64x2xf32> to vector<8x2xf32>
    %cst_88 = arith.constant 1.000000e+00 : f32
    %407 = vector.broadcast %cst_88 : f32 to vector<8x2xf32>
    %408 = arith.subf %407, %406 : vector<8x2xf32>
    %409 = arith.mulf %408, %405 : vector<8x2xf32>
    %410 = tpu.concatenate %409, %404, %399, %394, %389, %384, %379, %374 in 0 : vector<8x2xf32>, vector<8x2xf32>, vector<8x2xf32>, vector<8x2xf32>, vector<8x2xf32>, vector<8x2xf32>, vector<8x2xf32>, vector<8x2xf32> -> vector<64x2xf32>
    %411 = tpu.iota {dimensions = array<i32: 1>} : vector<64x128xi32>
    %c34_i32 = arith.constant 34 : i32
    %412 = vector.broadcast %c34_i32 : i32 to vector<64x128xi32>
    %413 = arith.cmpi slt, %411, %412 : vector<64x128xi32>
    %414 = vector.extract_strided_slice %410 {offsets = [0, 0], sizes = [64, 1], strides = [1, 1]} : vector<64x2xf32> to vector<64x1xf32>
    %415 = vector.shape_cast %414 : vector<64x1xf32> to vector<64x1xf32>
    %416 = vector.broadcast %415 : vector<64x1xf32> to vector<64x128xf32>
    %417 = vector.extract_strided_slice %410 {offsets = [0, 1], sizes = [64, 1], strides = [1, 1]} : vector<64x2xf32> to vector<64x1xf32>
    %418 = vector.shape_cast %417 : vector<64x1xf32> to vector<64x1xf32>
    %419 = vector.broadcast %418 : vector<64x1xf32> to vector<64x128xf32>
    %420 = arith.select %413, %416, %419 : vector<64x128xi1>, vector<64x128xf32>
    %421 = arith.mulf %0, %420 : vector<64x128xf32>
    %422 = vector.extract_strided_slice %421 {offsets = [0, 0], sizes = [32, 128], strides = [1, 1]} : vector<64x128xf32> to vector<32x128xf32>
    %423 = vector.extract_strided_slice %421 {offsets = [32, 0], sizes = [32, 128], strides = [1, 1]} : vector<64x128xf32> to vector<32x128xf32>
    %424 = arith.addf %422, %423 : vector<32x128xf32>
    %425 = vector.extract_strided_slice %424 {offsets = [0, 0], sizes = [16, 128], strides = [1, 1]} : vector<32x128xf32> to vector<16x128xf32>
    %426 = vector.extract_strided_slice %424 {offsets = [16, 0], sizes = [16, 128], strides = [1, 1]} : vector<32x128xf32> to vector<16x128xf32>
    %427 = arith.addf %425, %426 : vector<16x128xf32>
    %428 = vector.extract_strided_slice %427 {offsets = [0, 0], sizes = [8, 128], strides = [1, 1]} : vector<16x128xf32> to vector<8x128xf32>
    %429 = vector.extract_strided_slice %427 {offsets = [8, 0], sizes = [8, 128], strides = [1, 1]} : vector<16x128xf32> to vector<8x128xf32>
    %430 = arith.addf %428, %429 : vector<8x128xf32>
    %cst_89 = arith.constant 0.000000e+00 : f32
    %431 = vector.broadcast %cst_89 : f32 to vector<64x126xf32>
    %432 = tpu.concatenate %369, %431 in 1 : vector<64x2xf32>, vector<64x126xf32> -> vector<64x128xf32>
    %433 = tpu.concatenate %432, %430 in 0 : vector<64x128xf32>, vector<8x128xf32> -> vector<72x128xf32>
    %c0_90 = arith.constant 0 : index
    %c0_91 = arith.constant 0 : index
    %434 = vector.load %arg11[%c0_90, %c0_91] : memref<72x128xf32, #tpu.memory_space<vmem>>, vector<72x128xf32>
    tpu.vector_store %arg11[%c0_90, %c0_91], %433 {strides = array<i32>} : memref<72x128xf32, #tpu.memory_space<vmem>>, vector<72x128xf32>,
    return
  }
}

</mosaic_0001>

<bundles_post_ra>
// kernel: squeeze.32
= control target key start
LH: loop header
LB: loop body
LE: loop exit
PB: predicated region body
PF: predicated region fallthrough
CT: control target
= control target key end

     0   :  { %s10_s10 = smov 3  ;;  %vm12_vm0 = vcmask 138240   ;;  %s29_s11 = smov 17   ;;  %vm19_vm1 = vcmask 277640   ;;  %s49_s0 = inlined_call_operand.vmem [shape: f32[2,1,17,2], index: 0, kind: input, shape index: {}]   ;;  %s50_s1 = inlined_call_operand.vmem [shape: f32[34,2], index: 1, kind: output, shape index: {}]  }
   0x1   :  { %v27_v0 = vld [vmem:[%s49_s0 + $0x2] sm:$0x3]  ;;  %v8_v1 = vld [vmem:[%s49_s0] sm:$0x3]  ;;  %s15_s0 = smov 3 }
   0x2   :  { %7 = vst [vmem:[#allocation1 + $0x8] sm:$0x3] %v27_v0  ;;  %9 = vst [vmem:[#allocation1] sm:$0x3] %v8_v1 }
   0x9   :  { %v16_v2 = vld [vmem:[#allocation1 + $0x1] ss:$8 sm:%s15_s0]   ;;  %v11_v3 = vld [vmem:[#allocation1] ss:$8 sm:%s10_s10]  }
   0xa   :  { %17 = vrot.lane.b32.xlu0 %v16_v2, %s29_s11  ;;  %13 = vst.msk [vmem:[#allocation0] sm:$0x3] %vm12_vm0, %v11_v3  }
  0x7c   :  { %v18_v4 = vpop.permute.xlu0 %17  }
  0x7d   :  { %20 = vst.msk [vmem:[#allocation0] sm:$0x3] %vm19_vm1, %v18_v4  }
  0x84   :  { %v24_v5 = vld [vmem:[#allocation0] sm:$0x3] }
  0x85   :  { %26 = vst [vmem:[%s50_s1] sm:$0x3] %v24_v5 }

// kernel: custom-call.53
= control target key start
LH: loop header
LB: loop body
LE: loop exit
PB: predicated region body
PF: predicated region fallthrough
CT: control target
= control target key end

     0   :  { %s477_s0 = inlined_call_operand.vmem [shape: f32[34,8,4], index: 0, kind: input, shape index: {}]   ;;  %s478_s1 = inlined_call_operand.vmem [shape: f32[34,8,4], index: 1, kind: output, shape index: {0}]   ;;  %s479_s2 = inlined_call_operand.vmem [shape: f32[34,4], index: 2, kind: output, shape index: {1}]  }
   0x1   :  { %v37_v0 = vld [vmem:[%s477_s0] sm:$0xff]  ;;  %v39_v1 = vld [vmem:[%s477_s0 + $0x8] sm:$0xff]  ;;  %v41_v2 = vld [vmem:[%s477_s0 + $0x10] sm:$0xff] }
   0x2   :  { %v43_v3 = vld [vmem:[%s477_s0 + $0x18] sm:$0xff]  ;;  %49 = vst [vmem:[#allocation1] sm:$0xff] %v37_v0  ;;  %53 = vst [vmem:[#allocation1 + $0x8] sm:$0xff] %v39_v1 }
   0x3   :  { %57 = vst [vmem:[#allocation1 + $0x10] sm:$0xff] %v41_v2  ;;  %61 = vst [vmem:[#allocation1 + $0x18] sm:$0xff] %v43_v3 }
   0x4   :  { %v380_v4 = vmov 0.0   ;;  %s409_s17 = smov 0  }
   0x5   :  { %62 = vst [vmem:[#allocation2] sm:$0xff] %v380_v4 }
   0x6 LB: > { %v72_v5 = vlaneseq  ;;  %s330_s18 = sshll.u32 %s374_s17, 3  ;;  %v418_v7 = vstv %s374_s17  ;;  %s429_s19 = sadd.s32 1, %s374_s17   ;;  %v381_v57 = vmov 1.0   ;;  %s374_s17 = sphi %s409_s17, %s482_s17  }
   0x7   : > { %s420_s0 = scalar_lea.vmem [#allocation1], %s330_s18  ;;  %s156_s21 = scalar_lea.vmem [#allocation2], %s374_s17 }
   0x8   : > { %v415_v6 = vshrl.u32 %v72_v5, 7  ;;  %s99_s20 = scalar_lea.vmem %s420_s0, %s374_s17 [#allocation1]  ;;  %s150_s22 = scalar_lea.vmem [#allocation4], %s374_s17 }
   0x9   : > { %p321_p0 = scmp.ge.s32.totalorder %s429_s19, 4 }
   0xa   : > { %v71_v8 = vld [vmem:[%s420_s0] sm:$0xff]  ;;  %vm76_vm0 = vcmp.gt.s32.totalorder %v415_v6, %v418_v7  ;;  %s135_s0 = smov %s420_s0  ;;  %v138_v6 = vmov %v415_v6  ;;  %s376_s23 = smov (!%p321_p0), %s429_s19  }
   0xb   : > { %v79_v9 = vsel %vm76_vm0, %v71_v8, 0.0  ;;  %v139_v10 = vld [vmem:[%s135_s0] sm:$0xff]  ;;  %vm142_vm1 = vcmp.gt.s32.totalorder %v138_v6, %v418_v7  ;;  %vm143_vm2 = vcmp.lt.s32.totalorder %v138_v6, 8 }
   0xc   : > { %v80_v11 = vmul.f32 %v79_v9, %v79_v9  ;;  %vm431_vm3 = vmand %vm142_vm1, %vm143_vm2  ;;  %v100_v20 = vld [vmem:[%s99_s20] ss:$0 sm:$0xff] }
   0xd   : > { %v145_v13 = vsel %vm431_vm3, %v139_v10, 0.0  ;;  %v101_v21 = vand.u32 2147483647, %v100_v20  ;;  %vm126_vm9 = vcmp.lt.f32.partialorder %v100_v20, 0.0 }
   0xe   : > { %v81_v14 = vrot.slane %v80_v11, 4 }
   0xf   : > { %v102_v26 = vmax.f32 %v101_v21, 0.0 }
  0x10   : > { %v82_v15 = vadd.f32 %v81_v14, %v80_v11 }
  0x12   : > { %v83_v16 = vrot.slane %v82_v15, 2 }
  0x14   : > { %v84_v17 = vadd.f32 %v83_v16, %v82_v15 }
  0x16   : > { %v85_v18 = vrot.slane %v84_v17, 1 }
  0x18   : > { %v86_v19 = vadd.f32 %v85_v18, %v84_v17 }
  0x1a   : > { %354 = vrsqrt.f32 %v86_v19  ;;  %vm89_vm4 = vcmp.eq.f32.partialorder %v86_v19, inf  ;;  %v92_v23 = vand.u32 2147483648, %v86_v19  ;;  %vm91_vm5 = vcmp.eq.f32.partialorder %v86_v19, 0.0 }
  0x24   : > { %v355_v22 = vpop.eup %354 }
  0x25   : > { %v88_v24 = vmul.f32 %v355_v22, %v86_v19 }
  0x27   : > { %v90_v25 = vsel %vm89_vm4, %v86_v19, %v88_v24 }
  0x28   : > { %v93_v27 = vsel %vm91_vm5, %v92_v23, %v90_v25 }
  0x29   : > { %v103_v28 = vand.u32 2147483647, %v93_v27 }
  0x2b   : > { %v104_v29 = vmax.f32 %v102_v26, %v103_v28 }
  0x2d   : > { %356 = vrcp.f32 %v104_v29  ;;  %vm116_vm8 = vcmp.eq.f32.partialorder %v104_v29, 0.0 }
  0x37   : > { %v357_v30 = vpop.eup %356 }
  0x38   : > { %v106_v31 = vmul.f32 %v357_v30, %v101_v21  ;;  %v109_v32 = vmul.f32 0.0, %v357_v30  ;;  %v113_v33 = vmul.f32 %v357_v30, %v103_v28 }
  0x3a   : > { %v107_v34 = vmul.f32 %v106_v31, %v106_v31  ;;  %v110_v35 = vmul.f32 %v109_v32, %v109_v32  ;;  %v114_v36 = vmul.f32 %v113_v33, %v113_v33 }
  0x3c   : > { %v111_v37 = vadd.f32 %v110_v35, %v107_v34 }
  0x3e   : > { %v115_v38 = vadd.f32 %v114_v36, %v111_v37 }
  0x40   : > { %358 = vrsqrt.f32 %v115_v38  ;;  %vm119_vm6 = vcmp.eq.f32.partialorder %v115_v38, inf  ;;  %v122_v40 = vand.u32 2147483648, %v115_v38  ;;  %vm121_vm7 = vcmp.eq.f32.partialorder %v115_v38, 0.0 }
  0x4a   : > { %v359_v39 = vpop.eup %358 }
  0x4b   : > { %v118_v41 = vmul.f32 %v359_v39, %v115_v38 }
  0x4d   : > { %v120_v42 = vsel %vm119_vm6, %v115_v38, %v118_v41 }
  0x4e   : > { %v123_v43 = vsel %vm121_vm7, %v122_v40, %v120_v42 }
  0x4f   : > { %v124_v44 = vmul.f32 %v123_v43, %v104_v29 }
  0x51   : > { %v125_v45 = vsel %vm116_vm8, 0.0, %v124_v44 }
  0x52   : > { %v127_v46 = vxor.u32 2147483648, %v125_v45 }
  0x54   : > { %v128_v47 = vsel %vm126_vm9, %v125_v45, %v127_v46 }
  0x55   : > { %360 = vrcp.f32 %v128_v47  ;;  %v132_v48 = vsel %vm91_vm5, %v100_v20, %v128_v47  ;;  %v129_v50 = vsub.f32 %v128_v47, %v100_v20 }
  0x56   : > { %v134_v49 = vsub.f32 %v100_v20, %v132_v48 }
  0x58   : > { %362 = vrcp.f32 %v134_v49 }
  0x5f   : > { %v361_v51 = vpop.eup %360 }
  0x60   : > { %v131_v52 = vmul.f32 %v361_v51, %v129_v50 }
  0x61   : > { %322 = sbr.rel (%p321_p0) target bundleno = 134 (0x86), region = 143 }
  0x62   : > { %v363_v53 = vpop.eup %362  ;;  %v133_v54 = vsel %vm91_vm5, 0.0, %v131_v52 }
  0x63   : > { %v147_v55 = vmul.f32 %v363_v53, %v145_v13  ;;  %157 = vst [vmem:[%s156_s21] sm:$0x1] %v133_v54 }
  0x65   : > { %v148_v56 = vsel %vm91_vm5, 0.0, %v147_v55 }
  0x66   : > { %149 = vst [vmem:[#allocation4] sm:$0xff] %v148_v56 }
  0x67   : > { %151 = vst [vmem:[%s150_s22] sm:$0x1] %v381_v57 }
  0x68 LB: >> { %v167_v6 = vmov %v415_v6  ;;  %s333_s24 = sshll.u32 %s378_s23, 3  ;;  %s162_s23 = sadd.s32 1, %s378_s23   ;;  %s378_s23 = sphi %s376_s23, %s162_s23  }
  0x69   : >> { %s171_s25 = scalar_lea.vmem [#allocation1], %s333_s24  ;;  %vm174_vm10 = vcmp.lt.s32.totalorder %v167_v6, 8  ;;  %v184_v6 = vmov %v415_v6  ;;  %p161_p1 = scmp.ge.s32.totalorder %s162_s23, 4 }
  0x6a   : >> { %v172_v59 = vld [vmem:[%s171_s25] sm:$0xff]  ;;  %vm193_vm11 = vcmp.ge.s32.totalorder %v184_v6, %v418_v7 }
  0x6e   : >> { %v169_v58 = vld [vmem:[#allocation4] sm:$0xff] }
  0x6f   : >> { %v173_v60 = vmul.f32 %v172_v59, %v169_v58 }
  0x71   : >> { %v175_v61 = vsel %vm174_vm10, %v173_v60, 0.0 }
  0x72   : >> { %v176_v62 = vrot.slane %v175_v61, 4 }
  0x74   : >> { %v177_v63 = vadd.f32 %v176_v62, %v175_v61 }
  0x76   : >> { %v178_v0 = vrot.slane %v177_v63, 2 }
  0x78   : >> { %v179_v1 = vadd.f32 %v178_v0, %v177_v63 }
  0x7a   : >> { %v180_v2 = vrot.slane %v179_v1, 1 }
  0x7c   : >> { %v181_v3 = vadd.f32 %v180_v2, %v179_v1 }
  0x7e   : >> { %v185_v4 = vmul.f32 %v181_v3, %v133_v54 }
  0x7f   : > { %164 = sbr.rel (!%p161_p1) target bundleno = 104 (0x68), region = 149 }
  0x80   : >> { %v188_v5 = vmul.f32 %v185_v4, %v169_v58 }
  0x82   : >> { %v194_v8 = vsub.f32 %v172_v59, %v188_v5 }
  0x84   : >> { %v195_v9 = vsel %vm193_vm11, %v194_v8, %v172_v59 }
  0x85   : >> { %196 = vst [vmem:[%s171_s25] sm:$0xff] %v195_v9 }
  0x86 PF: > { %v199_v6 = vmov %v415_v6  ;;  %s482_s17 = smov %s429_s19 }
  0x87   : > { %vm206_vm12 = vcmp.gt.s32.totalorder %v199_v6, %v418_v7  ;;  %vm209_vm13 = vcmp.eq.s32.totalorder %v199_v6, %v418_v7 }
  0x88   :  { %v215_v14 = vld [vmem:[#allocation2] sm:$0xf] (%p321_p0) }
  0x89   :  { %67 = sbr.rel (!%p321_p0) target bundleno = 6 (0x6), region = 160  ;;  %217 = vst [vmem:[#allocation3] sm:$0xf] (%p321_p0), %v215_v14 }
  0x8c   : > { %v201_v10 = vld [vmem:[#allocation4] sm:$0xff]  ;;  %v204_v11 = vld [vmem:[%s420_s0] sm:$0xff] }
  0x8d   : > { %v207_v12 = vsel %vm206_vm12, %v201_v10, %v204_v11 }
  0x8e   : > { %v210_v13 = vsel %vm209_vm13, %v132_v48, %v207_v12 }
  0x8f   : > { %211 = vst [vmem:[%s420_s0] sm:$0xff] %v210_v13 }
  0x90   :  { %v277_v17 = vld [vmem:[#allocation3] sm:$0xf] }
  0x91   :  { %278 = vst [vmem:[%s479_s2] sm:$0xf] %v277_v17 }
  0x96   :  { %v251_v15 = vld [vmem:[#allocation1] sm:$0xff]  ;;  %v253_v16 = vld [vmem:[#allocation1 + $0x8] sm:$0xff]  ;;  %v255_v6 = vld [vmem:[#allocation1 + $0x10] sm:$0xff] }
  0x97   :  { %252 = vst [vmem:[%s478_s1] sm:$0xff] %v251_v15  ;;  %254 = vst [vmem:[%s478_s1 + $0x8] sm:$0xff] %v253_v16  ;;  %v257_v7 = vld [vmem:[#allocation1 + $0x18] sm:$0xff] }
  0x98   :  { %256 = vst [vmem:[%s478_s1 + $0x10] sm:$0xff] %v255_v6  ;;  %258 = vst [vmem:[%s478_s1 + $0x18] sm:$0xff] %v257_v7 }

// kernel: custom-call.54
= control target key start
LH: loop header
LB: loop body
LE: loop exit
PB: predicated region body
PF: predicated region fallthrough
CT: control target
= control target key end

     0   :  { %s247_s6 = smov 0   ;;  %s281_s0 = inlined_call_operand.vmem [shape: f32[34,4,4], index: 0, kind: input, shape index: {}]   ;;  %s282_s1 = inlined_call_operand.vmem [shape: f32[34,4,4], index: 1, kind: output, shape index: {}]  }
   0x1 LB: > { %s209_s7 = sadd.s32 4294967295, %s235_s6   ;;  %p211_p0 = scmp.ge.s32.totalorder %s235_s6, 34  ;;  %s235_s6 = sphi %s247_s6, %s7_s6  }
   0x2   : > { %s23_s8 = sand.u32 (!%p211_p0), 1, %s235_s6   ;;  %s213_s9 = sshll.u32 (!%p211_p0), %s235_s6, 2 }
   0x3   : > { %21 = sbr.rel (%p211_p0) target bundleno = 10 (0xa), region = 16  ;;  %s212_s10 = sshll.u32 (!%p211_p0), %s23_s8, 2 }
   0x4   : > { %s27_s13 = scalar_lea.vmem (!%p211_p0), %s281_s0, %s213_s9  ;;  %s25_s14 = scalar_lea.vmem (!%p211_p0), [#allocation1], %s212_s10 }
   0x5   : > { %v43_v0 = vld [vmem:[%s27_s13] sm:$0xf] (!%p211_p0) }
   0x6   : > { %44 = vst [vmem:[%s25_s14] sm:$0xf] (!%p211_p0), %v43_v0 }
   0xa PF: > { %p214_p1 = scmp.ge.s32.totalorder %s235_s6, 1  ;;  %p60_p2 = scmp.lt.s32.totalorder %s235_s6, 35 }
   0xc   : > { %p61_p3 = pnand %p214_p1, %p60_p2 }
   0xd   : > { %s263_s15 = sand.u32 (!%p61_p3), 1, %s209_s7   ;;  %v82_v1 = vlaneseq (!%p61_p3)  ;;  %vm96_vm1 = vcmask (!%p61_p3), 31744   ;;  %s218_s19 = sshll.u32 (!%p61_p3), %s209_s7, 2 }
   0xe   : > { %64 = sbr.rel (%p61_p3) target bundleno = 479 (0x1df), region = 50  ;;  %s215_s16 = sshll.u32 (!%p61_p3), %s263_s15, 2 }
   0xf   : > { %s73_s17 = scalar_lea.vmem (!%p61_p3), [#allocation1], %s215_s16  ;;  %v83_v3 = vand.u32 (!%p61_p3), 127, %v82_v1  ;;  %v85_v4 = vshrl.u32 (!%p61_p3), %v82_v1, 7  ;;  %s77_s18 = scalar_lea.vmem (!%p61_p3), [#allocation3], %s215_s16 }
  0x10   : > { %v80_v2 = vld [vmem:[%s73_s17] sm:$0xf] (!%p61_p3)  ;;  %s139_s22 = scalar_lea.vmem (!%p61_p3), %s282_s1, %s218_s19 }
  0x11   : > { %81 = vst [vmem:[#allocation0] sm:$0xf] (!%p61_p3), %v80_v2  ;;  %vm91_vm0 = vcmp.eq.s32.totalorder (!%p61_p3), %v83_v3, 0  ;;  %vm87_vm2 = vcmp.eq.s32.totalorder (!%p61_p3), %v83_v3, %v85_v4  ;;  %vm100_vm3 = vcmp.eq.s32.totalorder (!%p61_p3), %v83_v3, 1  ;;  %vm111_vm4 = vcmp.eq.s32.totalorder (!%p61_p3), %v83_v3, 2 }
  0x12   : > { %vm122_vm5 = vcmp.eq.s32.totalorder (!%p61_p3), %v83_v3, 3 }
  0x18   : > { %v88_v5 = vld [vmem:[#allocation0] sm:$0xff] }
  0x19   : > { %v95_v6 = vld [vmem:[#allocation0 + $0x1] ss:$0 sm:$0xff]  ;;  %v92_v7 = vsel %vm91_vm0, %v88_v5, 1.0  ;;  %v106_v11 = vld [vmem:[#allocation0 + $0x2] ss:$0 sm:$0xff] }
  0x1a   : > { %v97_v8 = vsel %vm96_vm1, %v95_v6, 0.0  ;;  %v93_v9 = vsel %vm87_vm2, %v92_v7, 0.0  ;;  %v108_v12 = vsel %vm96_vm1, %v106_v11, 0.0  ;;  %v117_v16 = vld [vmem:[#allocation0 + $0x3] ss:$0 sm:$0xff] }
  0x1b   : > { %v101_v10 = vmul.f32 %v97_v8, %v93_v9  ;;  %v119_v17 = vsel %vm96_vm1, %v117_v16, 0.0 }
  0x1d   : > { %102 = vadd.xlane.f32.xlu0 %v101_v10 }
  0xaa   : > { %v103_v13 = vpop.xlane.xlu0 %102 }
  0xab   : > { %v104_v14 = vsel %vm100_vm3, %v103_v13, %v93_v9 }
  0xac   : > { %v112_v15 = vmul.f32 %v108_v12, %v104_v14 }
  0xae   : > { %113 = vadd.xlane.f32.xlu0 %v112_v15 }
 0x13b   : > { %v114_v18 = vpop.xlane.xlu0 %113 }
 0x13c   : > { %v115_v19 = vsel %vm111_vm4, %v114_v18, %v104_v14 }
 0x13d   : > { %v123_v20 = vmul.f32 %v119_v17, %v115_v19 }
 0x13f   : > { %124 = vadd.xlane.f32.xlu1 %v123_v20 }
 0x1cc   : > { %v125_v21 = vpop.xlane.xlu1 %124 }
 0x1cd   : > { %v126_v22 = vsel %vm122_vm5, %v125_v21, %v115_v19 }
 0x1ce   : > { %127 = vst [vmem:[#allocation2] sm:$0xff] %v126_v22 }
 0x1d5   : > { %v131_v23 = vld [vmem:[#allocation2] sm:$0xf] }
 0x1d6   : > { %133 = vst [vmem:[%s77_s18] sm:$0xf] %v131_v23 }
 0x1dd   : > { %v155_v24 = vld [vmem:[%s77_s18] sm:$0xf] }
 0x1de   : > { %156 = vst [vmem:[%s139_s22] sm:$0xf] %v155_v24 }
 0x1df PF: > { %s7_s6 = sadd.s32 1, %s235_s6  }
 0x1e0   : > { %p4_p4 = scmp.ge.s32.totalorder %s7_s6, 36  }
 0x1e2   :  { %6 = sbr.rel (!%p4_p4) target bundleno = 1 (0x1), region = 113 }

// kernel: custom-call.46
= control target key start
LH: loop header
LB: loop body
LE: loop exit
PB: predicated region body
PF: predicated region fallthrough
CT: control target
= control target key end

     0   :  { %s6_s0 = inlined_call_operand.hbm [shape: pred[34], index: 0, kind: output, shape index: {}]  }

// kernel: custom-call.51
= control target key start
LH: loop header
LB: loop body
LE: loop exit
PB: predicated region body
PF: predicated region fallthrough
CT: control target
= control target key end

     0   :  { %s367_s6 = smov 0   ;;  %s369_s7 = smov 0   ;;  %s414_s0 = inlined_call_operand.vmem [shape: f32[34,4,4], index: 0, kind: input, shape index: {}]   ;;  %s415_s1 = inlined_call_operand.vmem [shape: f32[34,4,4], index: 1, kind: output, shape index: {}]  }
   0x1   :  { %s371_s8 = smov 0  }
   0x2 LB: > { %s287_s9 = sadd.s32 4294967295, %s354_s8   ;;  %s26_s10 = sadd.s32 1, %s350_s7  ;;  %s354_s8 = sphi %s371_s8, %s7_s8   ;;  %s350_s7 = sphi %s369_s7, %s417_s7   ;;  %s346_s6 = sphi %s367_s6, %s416_s6  }
   0x3   : > { %p28_p0 = scmp.ge.s32.totalorder %s26_s10, 34  ;;  %p289_p1 = scmp.ge.s32.totalorder %s354_s8, 34 }
   0x4   : > { %s42_s11 = sand.u32 (!%p289_p1), 1, %s354_s8   ;;  %s291_s12 = sshll.u32 (!%p289_p1), %s350_s7, 2 }
   0x5   : > { %s419_s10 = smov (%p28_p0, %s26_s10), 0  ;;  %40 = sbr.rel (%p289_p1) target bundleno = 12 (0xc), region = 16 }
   0x6   : > { %s290_s13 = sshll.u32 (!%p289_p1), %s42_s11, 2  ;;  %s48_s16 = scalar_lea.vmem (!%p289_p1), %s414_s0, %s291_s12 }
   0x7   : > { %v64_v0 = vld [vmem:[%s48_s16] sm:$0xf] (!%p289_p1)  ;;  %s44_s17 = scalar_lea.vmem (!%p289_p1), [#allocation1], %s290_s13 }
   0x8   : > { %65 = vst [vmem:[%s44_s17] sm:$0xf] (!%p289_p1), %v64_v0 }
   0xc PF: > { %p292_p2 = scmp.ge.s32.totalorder %s354_s8, 1  ;;  %p81_p3 = scmp.lt.s32.totalorder %s354_s8, 35 }
   0xe   : > { %p82_p4 = pnand %p292_p2, %p81_p3 }
   0xf   : > { %v356_v1 = vmov (!%p82_p4), 0.0   ;;  %s394_s18 = sand.u32 (!%p82_p4), 1, %s287_s9   ;;  %vm104_vm0 = vcmask (!%p82_p4), 7168   ;;  %vm122_vm1 = vcmask (!%p82_p4), 15368   ;;  %vm139_vm2 = vcmask (!%p82_p4), 1047553   ;;  %s296_s22 = sshll.u32 (!%p82_p4), %s346_s6, 2 }
  0x10   : > { %85 = sbr.rel (%p82_p4) target bundleno = 711 (0x2c7), region = 50  ;;  %103 = vst [vmem:[#allocation2] sm:$0xff] (!%p82_p4), %v356_v1  ;;  %s293_s19 = sshll.u32 (!%p82_p4), %s394_s18, 2  ;;  %vm140_vm3 = vmand (!%p82_p4), %vm122_vm1, %vm139_vm2  ;;  %vm144_vm4 = vcmask (!%p82_p4), 23568   ;;  %vm161_vm5 = vcmask (!%p82_p4), 1047554   ;;  %vm166_vm7 = vcmask (!%p82_p4), 31768  }
  0x11   : > { %s94_s20 = scalar_lea.vmem (!%p82_p4), [#allocation1], %s293_s19  ;;  %vm162_vm6 = vmand (!%p82_p4), %vm144_vm4, %vm161_vm5  ;;  %vm183_vm8 = vcmask (!%p82_p4), 1047555   ;;  %s98_s21 = scalar_lea.vmem (!%p82_p4), [#allocation3], %s293_s19 }
  0x12   : > { %v101_v5 = vld [vmem:[%s94_s20] sm:$0xf] (!%p82_p4)  ;;  %vm184_vm9 = vmand (!%p82_p4), %vm166_vm7, %vm183_vm8  ;;  %s201_s25 = scalar_lea.vmem (!%p82_p4), %s415_s1, %s296_s22 }
  0x13   : > { %102 = vst [vmem:[#allocation0] sm:$0xf] (!%p82_p4), %v101_v5 }
  0x17   : > { %v105_v2 = vld [vmem:[#allocation2] ss:$0 sm:$0xff] }
  0x18   : > { %v107_v3 = vmul.f32 %v105_v2, %v105_v2  ;;  %v114_v4 = vmul.f32 0.0, %v105_v2 }
  0x1a   : > { %108 = vadd.xlane.f32.xlu0 %v107_v3  ;;  %v106_v6 = vld [vmem:[#allocation0] ss:$0 sm:$0xff]  ;;  %v126_v18 = vld [vmem:[#allocation0 + $0x1] ss:$0 sm:$0xff]  ;;  %v148_v30 = vld [vmem:[#allocation0 + $0x2] ss:$0 sm:$0xff] }
  0x1b   : > { %v112_v10 = vld [vmem:[#allocation0] sm:$0xff] }
  0x1c   : > { %v170_v42 = vld [vmem:[#allocation0 + $0x3] ss:$0 sm:$0xff] }
  0x1e   : > { %115 = vadd.xlane.f32.xlu0 %v114_v4 }
  0xa7   : > { %v109_v7 = vpop.xlane.xlu0 %108 }
  0xa8   : > { %v110_v8 = vsub.f32 %v106_v6, %v109_v7 }
  0xaa   : > { %324 = vrsqrt.f32 %v110_v8 }
  0xab   : > { %v116_v9 = vpop.xlane.xlu0 %115 }
  0xac   : > { %v117_v11 = vsub.f32 %v112_v10, %v116_v9 }
  0xb4   : > { %v325_v12 = vpop.eup %324 }
  0xb5   : > { %v118_v13 = vmul.f32 %v325_v12, %v117_v11 }
  0xb7   : > { %v119_v14 = vsel %vm104_vm0, %v118_v13, 0.0 }
  0xb8   : > { %121 = vst [vmem:[#allocation2] sm:$0xff] %v119_v14 }
  0xbf   : > { %v124_v15 = vld [vmem:[#allocation2 + $0x1] ss:$0 sm:$0xff] }
  0xc0   : > { %v127_v16 = vmul.f32 %v124_v15, %v124_v15  ;;  %v134_v17 = vmul.f32 %v124_v15, %v119_v14 }
  0xc2   : > { %128 = vadd.xlane.f32.xlu1 %v127_v16 }
  0xc6   : > { %135 = vadd.xlane.f32.xlu1 %v134_v17 }
 0x14f   : > { %v129_v19 = vpop.xlane.xlu1 %128 }
 0x150   : > { %v130_v20 = vsub.f32 %v126_v18, %v129_v19 }
 0x152   : > { %326 = vrsqrt.f32 %v130_v20 }
 0x153   : > { %v136_v21 = vpop.xlane.xlu1 %135 }
 0x154   : > { %v137_v22 = vsub.f32 %v112_v10, %v136_v21 }
 0x15c   : > { %v327_v23 = vpop.eup %326 }
 0x15d   : > { %v138_v24 = vmul.f32 %v327_v23, %v137_v22 }
 0x15f   : > { %v141_v25 = vsel %vm140_vm3, %v138_v24, 0.0 }
 0x160   : > { %v142_v26 = vadd.f32 %v141_v25, %v119_v14 }
 0x162   : > { %143 = vst [vmem:[#allocation2] sm:$0xff] %v142_v26 }
 0x169   : > { %v146_v27 = vld [vmem:[#allocation2 + $0x2] ss:$0 sm:$0xff] }
 0x16a   : > { %v156_v28 = vmul.f32 %v146_v27, %v142_v26  ;;  %v149_v29 = vmul.f32 %v146_v27, %v146_v27 }
 0x16c   : > { %157 = vadd.xlane.f32.xlu1 %v156_v28  ;;  %150 = vadd.xlane.f32.xlu0 %v149_v29 }
 0x1f9   : > { %v151_v31 = vpop.xlane.xlu0 %150  ;;  %v158_v33 = vpop.xlane.xlu1 %157 }
 0x1fa   : > { %v152_v32 = vsub.f32 %v148_v30, %v151_v31  ;;  %v159_v34 = vsub.f32 %v112_v10, %v158_v33 }
 0x1fc   : > { %328 = vrsqrt.f32 %v152_v32 }
 0x206   : > { %v329_v35 = vpop.eup %328 }
 0x207   : > { %v160_v36 = vmul.f32 %v329_v35, %v159_v34 }
 0x209   : > { %v163_v37 = vsel %vm162_vm6, %v160_v36, 0.0 }
 0x20a   : > { %v164_v38 = vadd.f32 %v163_v37, %v142_v26 }
 0x20c   : > { %165 = vst [vmem:[#allocation2] sm:$0xff] %v164_v38 }
 0x213   : > { %v168_v39 = vld [vmem:[#allocation2 + $0x3] ss:$0 sm:$0xff] }
 0x214   : > { %v178_v40 = vmul.f32 %v168_v39, %v164_v38  ;;  %v171_v41 = vmul.f32 %v168_v39, %v168_v39 }
 0x216   : > { %179 = vadd.xlane.f32.xlu1 %v178_v40  ;;  %172 = vadd.xlane.f32.xlu0 %v171_v41 }
 0x2a3   : > { %v173_v43 = vpop.xlane.xlu0 %172  ;;  %v180_v45 = vpop.xlane.xlu1 %179 }
 0x2a4   : > { %v174_v44 = vsub.f32 %v170_v42, %v173_v43  ;;  %v181_v46 = vsub.f32 %v112_v10, %v180_v45 }
 0x2a6   : > { %330 = vrsqrt.f32 %v174_v44 }
 0x2b0   : > { %v331_v47 = vpop.eup %330 }
 0x2b1   : > { %v182_v48 = vmul.f32 %v331_v47, %v181_v46 }
 0x2b3   : > { %v185_v49 = vsel %vm184_vm9, %v182_v48, 0.0 }
 0x2b4   : > { %v186_v50 = vadd.f32 %v185_v49, %v164_v38 }
 0x2b6   : > { %187 = vst [vmem:[#allocation2] sm:$0xff] %v186_v50 }
 0x2bd   : > { %v191_v51 = vld [vmem:[#allocation2] sm:$0xf] }
 0x2be   : > { %193 = vst [vmem:[%s98_s21] sm:$0xf] %v191_v51 }
 0x2c5   : > { %v217_v52 = vld [vmem:[%s98_s21] sm:$0xf] }
 0x2c6   : > { %218 = vst [vmem:[%s201_s25] sm:$0xf] %v217_v52 }
 0x2c7 PF: > { %s7_s8 = sadd.s32 1, %s354_s8   ;;  %s416_s6 = smov %s350_s7 }
 0x2c8   : > { %p4_p5 = scmp.ge.s32.totalorder %s7_s8, 36   ;;  %s417_s7 = smov %s419_s10 }
 0x2ca   :  { %6 = sbr.rel (!%p4_p5) target bundleno = 2 (0x2), region = 116 }

// kernel: custom-call.52
= control target key start
LH: loop header
LB: loop body
LE: loop exit
PB: predicated region body
PF: predicated region fallthrough
CT: control target
= control target key end

     0   :  { %s394_s10 = smov 0   ;;  %s444_s0 = inlined_call_operand.vmem [shape: f32[34,1,4,4], index: 0, kind: input, shape index: {}]   ;;  %s445_s1 = inlined_call_operand.vmem [shape: f32[34,1,4,4], index: 1, kind: output, shape index: {}]  }
   0x1   :  { %v17_v0 = vld [vmem:[%s444_s0] sm:$0xff]   ;;  %v21_v1 = vld [vmem:[%s444_s0 + $0x8] sm:$0xff]  }
   0x2   :  { %18 = vst [vmem:[#allocation1] sm:$0xff] %v17_v0   ;;  %22 = vst [vmem:[#allocation1 + $0x8] sm:$0xff] %v21_v1  }
   0x9   :  { %v57_v2 = vld [vmem:[#allocation1 + $0xc] sm:$0xf]  ;;  %v62_v3 = vld [vmem:[#allocation1 + $0x8] sm:$0xf]  ;;  %v66_v4 = vld [vmem:[#allocation1 + $0x4] sm:$0xf] }
   0xa   :  { %59 = vst [vmem:[#allocation0 + $0x18] sm:$0xf] %v57_v2  ;;  %64 = vst [vmem:[#allocation0 + $0x10] sm:$0xf] %v62_v3  ;;  %v69_v5 = vld [vmem:[#allocation1] sm:$0xf] }
   0xb   :  { %68 = vst [vmem:[#allocation0 + $0x8] sm:$0xf] %v66_v4  ;;  %70 = vst [vmem:[#allocation0] sm:$0xf] %v69_v5 }
   0xc LB: > { %v87_v6 = vlaneseq  ;;  %s329_s11 = sshll.u32 %s396_s10, 3  ;;  %v90_v9 = vstv %s396_s10  ;;  %s81_s0 = scalar_lea.vmem [#allocation5], %s396_s10  ;;  %s396_s10 = sphi %s394_s10, %s76_s10  }
   0xd   : > { %s78_s12 = sadd.s32 %s396_s10, %s329_s11  ;;  %s84_s14 = scalar_lea.vmem [#allocation0], %s329_s11 }
   0xe   : > { %v88_v7 = vshrl.u32 %v87_v6, 7  ;;  %s79_s13 = scalar_lea.vmem [#allocation0], %s78_s12  ;;  %s85_s15 = scalar_lea.vmem [#allocation4], %s329_s11 }
   0xf   : > { %s76_s10 = sadd.s32 1, %s396_s10  }
  0x10   : > { %vm91_vm0 = vcmp.ge.s32.totalorder %v90_v9, %v88_v7  ;;  %vm92_vm1 = vcmp.lt.s32.totalorder %v88_v7, 4  ;;  %p73_p0 = scmp.ge.s32.totalorder %s76_s10, 4  }
  0x11   : > { %vm93_vm2 = vmand %vm91_vm0, %vm92_vm1  ;;  %s398_s16 = smov (%p73_p0), 0  }
  0x12   : > { %v80_v8 = vld [vmem:[%s79_s13] ss:$0 sm:$0xff] }
  0x13   : > { %82 = vst [vmem:[%s81_s0] sm:$0x1] %v80_v8  ;;  %374 = vrcp.f32 %v80_v8  ;;  %v86_v10 = vld [vmem:[%s84_s14] sm:$0xff] }
  0x14   : > { %v94_v11 = vsel %vm93_vm2, %v86_v10, 0.0 }
  0x1c   :  { %75 = sbr.rel (!%p73_p0) target bundleno = 12 (0xc), region = 151 }
  0x1d   : > { %v375_v12 = vpop.eup %374 }
  0x1e   : > { %v96_v13 = vmul.f32 %v375_v12, %v94_v11 }
  0x20   : > { %v97_v14 = vxor.u32 2147483648, %v96_v13 }
  0x22   : > { %98 = vst [vmem:[%s85_s15] sm:$0xff] %v97_v14 }
  0x23 LB: > { %v105_v15 = vstv %s400_s16  ;;  %s331_s17 = sshll.u32 %s400_s16, 3  ;;  %v410_v16 = vmov 0.0   ;;  %s104_s16 = sadd.s32 1, %s400_s16   ;;  %s400_s16 = sphi %s398_s16, %s104_s16  }
  0x24   : > { %vm109_vm3 = vcmp.eq.s32.totalorder %v105_v15, %v88_v7  ;;  %s111_s18 = scalar_lea.vmem [#allocation2], %s331_s17  ;;  %p101_p1 = scmp.ge.s32.totalorder %s104_s16, 4  }
  0x25   : > { %v112_v17 = vsel %vm109_vm3, -1.0, %v410_v16  ;;  %v411_v18 = vmov (%p101_p1), 1.0   ;;  %s428_s19 = smov (%p101_p1), 1  }
  0x26   : > { %113 = vst [vmem:[%s111_s18] sm:$0xff] %v112_v17  ;;  %103 = sbr.rel (!%p101_p1) target bundleno = 35 (0x23), region = 162 }
  0x27   :  { %114 = vst [vmem:[#allocation2] sm:$0x1] (%p101_p1), %v411_v18 }
  0x2d LB: > { %s332_s20 = sshll.u32 %s404_s19, 3  ;;  %s126_s22 = scalar_lea.vmem [#allocation2], %s404_s19  ;;  %s404_s19 = sphi %s428_s19, %s120_s19  }
  0x2e   : > { %v124_v19 = vld [vmem:[#allocation2] sm:$0xff]  ;;  %s122_s21 = scalar_lea.vmem [#allocation4], %s332_s20  ;;  %s120_s19 = sadd.s32 1, %s404_s19  }
  0x2f   : > { %v123_v20 = vld [vmem:[%s122_s21] sm:$0xff]  ;;  %p117_p2 = scmp.ge.s32.totalorder %s120_s19, 4  }
  0x30   : > { %v125_v21 = vmul.f32 %v124_v19, %v123_v20  ;;  %s406_s23 = smov (%p117_p2), 0  }
  0x32   : > { %v127_v22 = vrot.slane %v125_v21, 4 }
  0x34   : > { %v128_v23 = vadd.f32 %v127_v22, %v125_v21 }
  0x36   : > { %v129_v24 = vrot.slane %v128_v23, 2 }
  0x38   : > { %v130_v25 = vadd.f32 %v129_v24, %v128_v23 }
  0x3a   : > { %v131_v26 = vrot.slane %v130_v25, 1 }
  0x3c   : > { %v132_v27 = vadd.f32 %v131_v26, %v130_v25 }
  0x3e   : > { %133 = vst [vmem:[%s126_s22] sm:$0x1] %v132_v27 }
  0x45   : > { %v138_v28 = vld [vmem:[#allocation2 + $0x8] sm:$0xff] }
  0x46   : > { %v139_v29 = vmul.f32 %v138_v28, %v123_v20 }
  0x48   : > { %v142_v30 = vrot.slane %v139_v29, 4 }
  0x4a   : > { %v143_v31 = vadd.f32 %v142_v30, %v139_v29 }
  0x4c   : > { %v144_v32 = vrot.slane %v143_v31, 2 }
  0x4e   : > { %v145_v33 = vadd.f32 %v144_v32, %v143_v31 }
  0x50   : > { %v146_v34 = vrot.slane %v145_v33, 1 }
  0x52   : > { %v147_v35 = vadd.f32 %v146_v34, %v145_v33 }
  0x54   : > { %334 = vst [vmem:[%s126_s22 + $0x8] sm:$0x1] %v147_v35 }
  0x5b   : > { %v153_v36 = vld [vmem:[#allocation2 + $0x10] sm:$0xff] }
  0x5c   : > { %v154_v37 = vmul.f32 %v153_v36, %v123_v20 }
  0x5e   : > { %v157_v38 = vrot.slane %v154_v37, 4 }
  0x60   : > { %v158_v39 = vadd.f32 %v157_v38, %v154_v37 }
  0x62   : > { %v159_v40 = vrot.slane %v158_v39, 2 }
  0x64   : > { %v160_v41 = vadd.f32 %v159_v40, %v158_v39 }
  0x66   : > { %v161_v42 = vrot.slane %v160_v41, 1 }
  0x68   : > { %v162_v43 = vadd.f32 %v161_v42, %v160_v41 }
  0x6a   : > { %336 = vst [vmem:[%s126_s22 + $0x10] sm:$0x1] %v162_v43 }
  0x71   : > { %v168_v44 = vld [vmem:[#allocation2 + $0x18] sm:$0xff] }
  0x72   : > { %v169_v45 = vmul.f32 %v168_v44, %v123_v20 }
  0x74   : > { %v172_v46 = vrot.slane %v169_v45, 4 }
  0x76   : > { %v173_v47 = vadd.f32 %v172_v46, %v169_v45 }
  0x78   : > { %v174_v48 = vrot.slane %v173_v47, 2 }
  0x7a   : > { %v175_v49 = vadd.f32 %v174_v48, %v173_v47  ;;  %119 = sbr.rel (!%p117_p2) target bundleno = 45 (0x2d), region = 173 }
  0x7c   : > { %v176_v50 = vrot.slane %v175_v49, 1 }
  0x7e   : > { %v177_v51 = vadd.f32 %v176_v50, %v175_v49 }
  0x80   : > { %338 = vst [vmem:[%s126_s22 + $0x18] sm:$0x1] %v177_v51 }
  0x81 LB: > { %s185_s24 = scalar_lea.vmem [#allocation5], %s408_s23  ;;  %s339_s25 = sshll.u32 %s408_s23, 3  ;;  %s408_s23 = sphi %s406_s23, %s184_s23  }
  0x82   : > { %v186_v52 = vld [vmem:[%s185_s24] ss:$0 sm:$0xff]  ;;  %s188_s26 = scalar_lea.vmem [#allocation2], %s339_s25  ;;  %s184_s23 = sadd.s32 1, %s408_s23  }
  0x83   : > { %376 = vrcp.f32 %v186_v52  ;;  %vm192_vm4 = vweird.f32 %v186_v52  ;;  %p181_p3 = scmp.ge.s32.totalorder %s184_s23, 4  }
  0x87   : > { %v189_v53 = vld [vmem:[%s188_s26] sm:$0xff] }
  0x8b   :  { %183 = sbr.rel (!%p181_p3) target bundleno = 129 (0x81), region = 184 }
  0x8d   : > { %v377_v54 = vpop.eup %376 }
  0x8e   : > { %v191_v55 = vmul.f32 %v377_v54, %v189_v53 }
  0x90   : > { %v193_v56 = vsel %vm192_vm4, %v189_v53, %v191_v55 }
  0x91   : > { %194 = vst [vmem:[%s188_s26] sm:$0xff] %v193_v56 }
  0x98   :  { %v198_v57 = vld [vmem:[#allocation2] sm:$0xf]  ;;  %v202_v58 = vld [vmem:[#allocation2 + $0x8] sm:$0xf]  ;;  %v207_v59 = vld [vmem:[#allocation2 + $0x10] sm:$0xf] }
  0x99   :  { %200 = vst [vmem:[#allocation3] sm:$0xf] %v198_v57  ;;  %205 = vst [vmem:[#allocation3 + $0x4] sm:$0xf] %v202_v58  ;;  %v213_v60 = vld [vmem:[#allocation2 + $0x18] sm:$0xf] }
  0x9a   :  { %211 = vst [vmem:[#allocation3 + $0x8] sm:$0xf] %v207_v59  ;;  %217 = vst [vmem:[#allocation3 + $0xc] sm:$0xf] %v213_v60 }
  0xa0   :  { %v233_v61 = vld [vmem:[#allocation3] sm:$0xff]  }
  0xa1   :  { %234 = vst [vmem:[%s445_s1] sm:$0xff] %v233_v61   ;;  %v237_v62 = vld [vmem:[#allocation3 + $0x8] sm:$0xff]  }
  0xa2   :  { %238 = vst [vmem:[%s445_s1 + $0x8] sm:$0xff] %v237_v62  }

// kernel: custom-call.22
= control target key start
LH: loop header
LB: loop body
LE: loop exit
PB: predicated region body
PF: predicated region fallthrough
CT: control target
= control target key end

     0   :  { %s1694_s30 = smov 0   ;;  %s1696_s10 = smov 0   ;;  %s2020_s0 = inlined_call_operand.vmem [shape: f32[34,2,2], index: 0, kind: input, shape index: {}]   ;;  %s2021_s1 = inlined_call_operand.vmem [shape: f32[34,2,2], index: 1, kind: input, shape index: {}]   ;;  %s2022_s2 = inlined_call_operand.vmem [shape: f32[34,2,2], index: 2, kind: input, shape index: {}]   ;;  %s2023_s3 = inlined_call_operand.vmem [shape: f32[34,2,2], index: 3, kind: input, shape index: {}]   ;;  %s2024_s4 = inlined_call_operand.vmem [shape: f32[34,2], index: 4, kind: output, shape index: {0}]   ;;  %s2025_s5 = inlined_call_operand.vmem [shape: f32[34,2], index: 5, kind: output, shape index: {1}]   ;;  %s2026_s6 = inlined_call_operand.vmem [shape: f32[34,2,2], index: 6, kind: output, shape index: {2}]   ;;  %s2027_s7 = inlined_call_operand.vmem [shape: f32[34,2,2], index: 7, kind: output, shape index: {3}]   ;;  %s2028_s8 = inlined_call_operand.vmem [shape: f32[34,2,2], index: 8, kind: output, shape index: {4}]   ;;  %s2029_s9 = inlined_call_operand.vmem [shape: f32[34,2,2], index: 9, kind: output, shape index: {5}]  }
   0x1   :  { %s1698_s11 = smov 0  }
   0x2 LB: > { %s1710_s12 = sadd.s32 4294967295, %s1631_s11   ;;  %s1713_s13 = sadd.s32 1, %s1631_s11   ;;  %s1631_s11 = sphi %s1698_s11, %s2048_s11   ;;  %s1627_s10 = sphi %s1696_s10, %s2047_s10   ;;  %s1623_s30 = sphi %s1694_s30, %s2046_s30  }
   0x3   : > { %s20_s14 = sshrl.u32 %s1631_s11, 3  ;;  %s21_s15 = sshrl.u32 %s1713_s13, 3 }
   0x4   : > { %s22_s16 = ssub.s32 %s20_s14, %s21_s15  ;;  %s25_s17 = sadd.s32 1, %s1627_s10 }
   0x5   : > { %p23_p0 = scmp.eq.s32.totalorder %s22_s16, 0  ;;  %p35_p1 = scmp.ne.s32.totalorder %s1627_s10, %s1623_s30 }
   0x6   : > { %p36_p2 = scmp.eq.s32.totalorder %s1710_s12, 33  ;;  %p1492_p4 = scmp.ge.s32.totalorder %s1631_s11, 34 }
   0x7   : > { %s1722_s18 = scalar_select %p23_p0, %s1627_s10, %s25_s17  }
   0x8   : > { %p1724_p3 = por %p36_p2, %p35_p1  ;;  %86 = sbr.rel (%p1492_p4) target bundleno = 17 (0x11), region = 16 }
   0x9   : > { %2030 = sst [smem:[#allocation31_spill]] %s1722_s18  ;;  %s88_s20 = sand.u32 (!%p1492_p4), 1, %s1631_s11  }
   0xa   : > { %s1494_s21 = sshll.u32 (!%p1492_p4), %s1631_s11, 1  ;;  %s1493_s22 = sshll.u32 (!%p1492_p4), %s88_s20, 1 }
   0xb   : > { %s92_s25 = scalar_lea.vmem (!%p1492_p4), %s2020_s0, %s1494_s21  ;;  %s90_s26 = scalar_lea.vmem (!%p1492_p4), [#allocation1], %s1493_s22 }
   0xc   : > { %v108_v0 = vld [vmem:[%s92_s25] sm:$0x3] (!%p1492_p4)  ;;  %s129_s29 = scalar_lea.vmem (!%p1492_p4), %s2021_s1, %s1494_s21  ;;  %s166_s16 = scalar_lea.vmem (!%p1492_p4), %s2022_s2, %s1494_s21 }
   0xd   : > { %109 = vst [vmem:[%s90_s26] sm:$0x3] (!%p1492_p4), %v108_v0  ;;  %v145_v1 = vld [vmem:[%s129_s29] sm:$0x3] (!%p1492_p4)  ;;  %s127_s17 = scalar_lea.vmem (!%p1492_p4), [#allocation3], %s1493_s22  ;;  %s203_s23 = scalar_lea.vmem (!%p1492_p4), %s2023_s3, %s1494_s21 }
   0xe   : > { %146 = vst [vmem:[%s127_s17] sm:$0x3] (!%p1492_p4), %v145_v1  ;;  %v182_v2 = vld [vmem:[%s166_s16] sm:$0x3] (!%p1492_p4)  ;;  %s164_s24 = scalar_lea.vmem (!%p1492_p4), [#allocation5], %s1493_s22  ;;  %s201_s25 = scalar_lea.vmem (!%p1492_p4), [#allocation7], %s1493_s22 }
   0xf   : > { %183 = vst [vmem:[%s164_s24] sm:$0x3] %v182_v2  ;;  %v219_v3 = vld [vmem:[%s203_s23] sm:$0x3] }
  0x10   : > { %220 = vst [vmem:[%s201_s25] sm:$0x3] %v219_v3 }
  0x11 PF: > { %p1501_p5 = scmp.ge.s32.totalorder %s1631_s11, 1  ;;  %p236_p6 = scmp.lt.s32.totalorder %s1631_s11, 35 }
  0x13   : > { %p237_p7 = pnand %p1501_p5, %p236_p6 }
  0x15   : > { %240 = sbr.rel (%p237_p7) target bundleno = 991 (0x3df), region = 140 }
  0x1c   : > { %s259_s26 = sand.u32 1, %s1710_s12   ;;  %s277_s27 = sand.u32 1, %s1623_s30   ;;  %v337_v4 = vlaneseq  ;;  %v1641_v5 = vmov 0.0  }
  0x1d   : > { %s1747_s28 = sshll.u32 %s259_s26, 1  ;;  %s1749_s18 = sshll.u32 %s277_s27, 3  ;;  %332 = vst [vmem:[#allocation10] sm:$0xff] %v1641_v5  ;;  %333 = vst [vmem:[#allocation12] sm:$0xff] %v1641_v5 }
  0x1e   : > { %334 = vst [vmem:[#allocation14] sm:$0xff] %v1641_v5  ;;  %335 = vst [vmem:[#allocation16] sm:$0xff] %v1641_v5  ;;  %v1751_v6 = vand.u32 127, %v337_v4  ;;  %v1753_v7 = vshrl.u32 %v337_v4, 7  ;;  %s261_s11 = scalar_lea.vmem [#allocation1], %s1747_s28  ;;  %s265_s30 = scalar_lea.vmem [#allocation3], %s1747_s28 }
  0x1f   : > { %v304_v8 = vld [vmem:[%s261_s11] sm:$0x3]  ;;  %v308_v9 = vld [vmem:[%s265_s30] sm:$0x3]  ;;  %s269_s21 = scalar_lea.vmem [#allocation5], %s1747_s28  ;;  %s273_s22 = scalar_lea.vmem [#allocation7], %s1747_s28 }
  0x20   : > { %305 = vst [vmem:[#allocation0] sm:$0x3] %v304_v8  ;;  %309 = vst [vmem:[#allocation2] sm:$0x3] %v308_v9  ;;  %v312_v10 = vld [vmem:[%s269_s21] sm:$0x3]  ;;  %v339_v6 = vmov %v1751_v6  ;;  %v342_v7 = vmov %v1753_v7 }
  0x21   : > { %v316_v11 = vld [vmem:[%s273_s22] sm:$0x3]  ;;  %313 = vst [vmem:[#allocation4] sm:$0x3] %v312_v10  ;;  %v352_v6 = vmov %v1751_v6  ;;  %v355_v7 = vmov %v1753_v7  ;;  %s320_s29 = smov [#allocation18]  ;;  %s323_s14 = smov [#allocation19]  ;;  %vm346_vm0 = vcmp.eq.s32.totalorder %v342_v7, %v339_v6 }
  0x22   : > { %317 = vst [vmem:[#allocation6] sm:$0x3] %v316_v11  ;;  %vm359_vm1 = vcmp.eq.s32.totalorder %v355_v7, %v352_v6  ;;  %s336_s15 = smov [#allocation10]  ;;  %s349_s16 = smov [#allocation16]  ;;  %vm1381_vm2 = vcmp.lt.s32.totalorder %v1751_v6, 2  ;;  %v1373_v6 = vmov %v1751_v6  ;;  %v1376_v7 = vmov %v1753_v7 }
  0x23   : > { %s326_s17 = smov [#allocation20]  ;;  %s329_s20 = smov [#allocation21]  ;;  %vm1386_vm3 = vcmp.eq.s32.totalorder %v1376_v7, %v1373_v6  ;;  %v1424_v6 = vmov %v1751_v6  ;;  %v1393_v7 = vmov %v1753_v7 }
  0x24   : > { %v343_v12 = vld [vmem:[%s336_s15] sm:$0x3]  ;;  %s1377_s30 = smov [#allocation18]  ;;  %s1394_s21 = smov [#allocation19]  ;;  %v1390_v6 = vmov %v1751_v6  ;;  %v1427_v7 = vmov %v1753_v7 }
  0x25   : > { %v356_v13 = vld [vmem:[%s349_s16] sm:$0x3]  ;;  %v347_v16 = vsel %vm346_vm0, 1.0, %v343_v12  ;;  %s1411_s22 = smov [#allocation20]  ;;  %v1407_v6 = vmov %v1751_v6  ;;  %v1410_v7 = vmov %v1753_v7  ;;  %vm1437_vm4 = vcmp.eq.s32.totalorder %v1427_v7, %v1424_v6 }
  0x26   : > { %v360_v17 = vsel %vm359_vm1, 1.0, %v356_v13  ;;  %348 = vst [vmem:[%s336_s15] sm:$0x3] %v347_v16 }
  0x27   : > { %v321_v14 = vld [vmem:[#allocation0] sm:$0xff]  ;;  %v324_v15 = vld [vmem:[#allocation2] sm:$0xff]  ;;  %361 = vst [vmem:[%s349_s16] sm:$0x3] %v360_v17 }
  0x28   : > { %322 = vst [vmem:[%s320_s29] sm:$0xff] %v321_v14  ;;  %325 = vst [vmem:[%s323_s14] sm:$0xff] %v324_v15  ;;  %v327_v18 = vld [vmem:[#allocation4] sm:$0xff]  ;;  %s1428_s29 = smov [#allocation21] }
  0x29   : > { %v330_v19 = vld [vmem:[#allocation6] sm:$0xff]  ;;  %328 = vst [vmem:[%s326_s17] sm:$0xff] %v327_v18 }
  0x2a   : > { %331 = vst [vmem:[%s329_s20] sm:$0xff] %v330_v19 }
  0x2f   : > { %v1383_v20 = vld [vmem:[%s1377_s30] sm:$0x3] }
  0x30   : > { %v1400_v21 = vld [vmem:[%s1394_s21] sm:$0x3]  ;;  %v1384_v22 = vsel %vm1381_vm2, %v1383_v20, 0.0 }
  0x31   : > { %v1401_v23 = vsel %vm1381_vm2, %v1400_v21, 0.0  ;;  %v1417_v24 = vld [vmem:[%s1411_s22] sm:$0x3]  ;;  %v1385_v26 = vmul.f32 %v1384_v22, %v1384_v22 }
  0x32   : > { %v1434_v25 = vld [vmem:[%s1428_s29] sm:$0x3]  ;;  %v1402_v27 = vmul.f32 %v1401_v23, %v1401_v23  ;;  %v1418_v28 = vsel %vm1381_vm2, %v1417_v24, 0.0 }
  0x33   : > { %v1435_v29 = vsel %vm1381_vm2, %v1434_v25, 0.0  ;;  %v1419_v30 = vmul.f32 %v1418_v28, %v1418_v28  ;;  %v1387_v33 = vsel %vm1386_vm3, 0.0, %v1385_v26 }
  0x34   : > { %v1404_v31 = vadd.f32 %v1402_v27, %v1385_v26  ;;  %v1436_v32 = vmul.f32 %v1435_v29, %v1435_v29  ;;  %v1403_v34 = vadd.f32 %v1402_v27, %v1387_v33 }
  0x36   : > { %v1421_v35 = vadd.f32 %v1419_v30, %v1404_v31  ;;  %v1420_v36 = vadd.f32 %v1419_v30, %v1403_v34  ;;  %v1438_v37 = vsel %vm1437_vm4, 0.0, %v1436_v32 }
  0x38   : > { %v1440_v38 = vadd.f32 %v1436_v32, %v1421_v35  ;;  %v1439_v39 = vadd.f32 %v1438_v37, %v1420_v36 }
  0x3a   : > { %1441 = vadd.xlane.f32.xlu0 %v1440_v38 }
  0x3e   : > { %1449 = vadd.xlane.f32.xlu0 %v1439_v39 }
  0xc7   : > { %v1442_v40 = vpop.xlane.xlu0 %1441 }
  0xc8   : > { %v1443_v41 = vrot.slane %v1442_v40, 4 }
  0xca   : > { %v1444_v42 = vadd.f32 %v1443_v41, %v1442_v40 }
  0xcb   : > { %v1450_v43 = vpop.xlane.xlu0 %1449 }
  0xcc   : > { %v1445_v44 = vrot.slane %v1444_v42, 2  ;;  %v1451_v45 = vrot.slane %v1450_v43, 4 }
  0xce   : > { %v1452_v46 = vadd.f32 %v1451_v45, %v1450_v43  ;;  %v1446_v47 = vadd.f32 %v1445_v44, %v1444_v42 }
  0xd0   : > { %v1453_v48 = vrot.slane %v1452_v46, 2  ;;  %v1447_v50 = vrot.slane %v1446_v47, 1 }
  0xd2   : > { %v1454_v49 = vadd.f32 %v1453_v48, %v1452_v46  ;;  %v1448_v53 = vadd.f32 %v1447_v50, %v1446_v47 }
  0xd4   : > { %v1455_v51 = vrot.slane %v1454_v49, 1 }
  0xd6   : > { %v1456_v52 = vadd.f32 %v1455_v51, %v1454_v49 }
  0xd8   : > { %1542 = vpush %v1456_v52 }
  0xd9   : > { %1544 = vpush %v1448_v53 }
 0x109   : > { %s1543_s14 = spop %1542 }
 0x10a   : > { %s1545_s15 = spop %1544 }
 0x10b   : > { %s1459_s16 = smul.f32 1e-10, %s1545_s15 }
 0x10d   : > { %p1460_p8 = scmp.le.f32.partialorder %s1543_s14, %s1459_s16 }
 0x10e   : > { %s1787_s17 = smov (!%p1460_p8), 0  }
 0x10f   : > { %1463 = sbr.rel (%p1460_p8) target bundleno = 953 (0x3b9), region = 475 }
 0x116 LB: >> { %s1792_s20 = smov 0   ;;  %s1635_s17 = sphi %s1787_s17, %s2032_s17  }
 0x117 LB: >>> { %s466_s30 = smov [#allocation18]  ;;  %v470_v6 = vmov %v1751_v6  ;;  %v473_v7 = vmov %v1753_v7  ;;  %s486_s21 = smov [#allocation19]  ;;  %vm789_vm14 = vcmp.eq.s32.totalorder %v1753_v7, 0  ;;  %vm801_vm15 = vcmp.eq.s32.totalorder %v1753_v7, 1  ;;  %s1639_s20 = sphi %s1792_s20, %s465_s20  }
 0x118   : >>> { %v490_v6 = vmov %v1751_v6  ;;  %v493_v7 = vmov %v1753_v7  ;;  %v474_v54 = vld [vmem:[%s466_s30] sm:$0x3]  ;;  %vm477_vm5 = vcmp.eq.s32.totalorder %v473_v7, %v470_v6  ;;  %s506_s22 = smov [#allocation21]  ;;  %s467_s29 = smov [#allocation22] }
 0x119   : >>> { %vm497_vm6 = vcmp.eq.s32.totalorder %v493_v7, %v490_v6  ;;  %v510_v6 = vmov %v1751_v6  ;;  %v513_v7 = vmov %v1753_v7  ;;  %v478_v55 = vsel %vm477_vm5, %v474_v54, 0.0  ;;  %v494_v56 = vld [vmem:[%s486_s21] sm:$0x3]  ;;  %s487_s14 = smov [#allocation23]  ;;  %s507_s15 = smov [#allocation24] }
 0x11a   : >>> { %vm517_vm7 = vcmp.eq.s32.totalorder %v513_v7, %v510_v6  ;;  %v479_v57 = vrot.slane %v478_v55, 4  ;;  %v498_v58 = vsel %vm497_vm6, %v494_v56, 0.0  ;;  %v514_v59 = vld [vmem:[%s506_s22] sm:$0x3]  ;;  %s530_s16 = smov [#allocation23]  ;;  %s528_s30 = smov [#allocation22]  ;;  %v579_v6 = vmov %v1751_v6 }
 0x11b   : >>> { %v499_v60 = vrot.slane %v498_v58, 4  ;;  %v518_v61 = vsel %vm517_vm7, %v514_v59, 0.0  ;;  %s532_s21 = smov [#allocation24]  ;;  %s567_s22 = smov [#allocation25]  ;;  %v582_v7 = vmov %v1753_v7  ;;  %v594_v6 = vmov %v1751_v6 }
 0x11c   : >>> { %v480_v62 = vadd.f32 %v479_v57, %v478_v55  ;;  %v519_v63 = vrot.slane %v518_v61, 4  ;;  %v597_v7 = vmov %v1753_v7  ;;  %vm584_vm12 = vcmp.eq.s32.totalorder %v582_v7, %v579_v6  ;;  %s1811_s24 = smov [#allocation20]  ;;  %s1817_s23 = smov [#allocation12] }
 0x11d   : >>> { %v500_v0 = vadd.f32 %v499_v60, %v498_v58  ;;  %vm599_vm13 = vcmp.eq.s32.totalorder %v597_v7, %v594_v6  ;;  %s829_s11 = smov [#allocation29]  ;;  %s1823_s27 = smov [#allocation16]  ;;  %v615_v55 = vld [vmem:[%s1811_s24] sm:$0x3]  ;;  %v692_v6 = vmov %v1751_v6  ;;  %v695_v7 = vmov %v1753_v7 }
 0x11e   : >>> { %v481_v1 = vrot.slane %v480_v62, 2  ;;  %v520_v2 = vadd.f32 %v519_v63, %v518_v61  ;;  %v838_v58 = vld [vmem:[%s1817_s23] sm:$0x3]  ;;  %s607_s26 = smov [#allocation30]  ;;  %s831_s25 = smov [#allocation30]  ;;  %v706_v6 = vmov %v1751_v6  ;;  %v709_v7 = vmov %v1753_v7 }
 0x11f   : >>> { %v501_v3 = vrot.slane %v500_v0, 2  ;;  %v840_v61 = vld [vmem:[%s1823_s27] sm:$0x3]  ;;  %vm699_vm0 = vcmp.eq.s32.totalorder %v695_v7, %v692_v6  ;;  %v665_v6 = vmov %v1751_v6  ;;  %v668_v7 = vmov %v1753_v7  ;;  %s465_s20 = sadd.s32 1, %s1639_s20  }
 0x120   : >>> { %v482_v4 = vadd.f32 %v481_v1, %v480_v62  ;;  %v521_v5 = vrot.slane %v520_v2, 2  ;;  %v679_v6 = vmov %v1751_v6  ;;  %v682_v7 = vmov %v1753_v7  ;;  %p462_p9 = scmp.ge.s32.totalorder %s465_s20, 3  }
 0x121   : >>> { %v502_v8 = vadd.f32 %v501_v3, %v500_v0  ;;  %vm714_vm1 = vcmp.eq.s32.totalorder %v709_v7, %v706_v6  ;;  %vm673_vm3 = vcmp.eq.s32.totalorder %v668_v7, %v665_v6  ;;  %vm686_vm4 = vcmp.eq.s32.totalorder %v682_v7, %v679_v6 }
 0x122   : >>> { %v483_v9 = vrot.slane %v482_v4, 1  ;;  %v522_v10 = vadd.f32 %v521_v5, %v520_v2  ;;  %vm728_vm5 = vcmp.eq.s32.totalorder %v1751_v6, 0  ;;  %vm732_vm6 = vcmp.eq.s32.totalorder %v1751_v6, 1 }
 0x123   : >>> { %v503_v11 = vrot.slane %v502_v8, 1  ;;  %v366_v6 = vmov (%p462_p9), %v1751_v6  ;;  %v369_v7 = vmov (%p462_p9), %v1753_v7 }
 0x124   : >>> { %v484_v12 = vadd.f32 %v483_v9, %v482_v4  ;;  %v523_v13 = vrot.slane %v522_v10, 1  ;;  %v419_v6 = vmov (%p462_p9), %v1751_v6  ;;  %vm381_vm7 = vcmp.eq.s32.totalorder (%p462_p9), %v369_v7, %v366_v6 }
 0x125   : >>> { %v504_v14 = vadd.f32 %v503_v11, %v502_v8  ;;  %v422_v7 = vmov (%p462_p9), %v1753_v7  ;;  %v385_v6 = vmov (%p462_p9), %v1751_v6 }
 0x126   : >>> { %485 = vst [vmem:[%s467_s29] sm:$0x1] %v484_v12  ;;  %v524_v15 = vadd.f32 %v523_v13, %v522_v10  ;;  %s569_s29 = smov [#allocation26]  ;;  %v388_v7 = vmov (%p462_p9), %v1753_v7  ;;  %v402_v6 = vmov (%p462_p9), %v1751_v6 }
 0x127   : >>> { %505 = vst [vmem:[%s487_s14] sm:$0x1] %v504_v14  ;;  %s526_s14 = smov [#allocation27]  ;;  %v405_v7 = vmov (%p462_p9), %v1753_v7 }
 0x128   : >>> { %525 = vst [vmem:[%s507_s15] sm:$0x1] %v524_v15  ;;  %s527_s15 = smov [#allocation28]  ;;  %s571_s14 = smov %s526_s14 }
 0x129   : >>> { %s573_s15 = smov %s527_s15 }
 0x12d   : >>> { %v529_v18 = vld [vmem:[%s528_s30] sm:$0xff]  ;;  %s590_s30 = smov [#allocation28] }
 0x12e   : >>> { %v531_v16 = vld [vmem:[%s530_s16] sm:$0xff]  ;;  %v552_v31 = vand.u32 2147483647, %v529_v18  ;;  %s575_s16 = smov [#allocation27] }
 0x12f   : >>> { %v535_v17 = vmul.f32 2.0, %v531_v16  ;;  %v533_v19 = vld [vmem:[%s532_s21] sm:$0xff]  ;;  %v553_v36 = vand.u32 2147483647, %v531_v16  ;;  %s588_s21 = smov [#allocation29] }
 0x130   : >>> { %v534_v20 = vsub.f32 %v533_v19, %v529_v18  ;;  %v554_v32 = vand.u32 2147483647, %v533_v19 }
 0x131   : >>> { %1593 = vrcp.f32 %v535_v17 }
 0x132   : >>> { %v555_v35 = vmin.f32 %v552_v31, %v554_v32 }
 0x134   : >>> { %v556_v37 = vmul.f32 1.1920929e-08, %v555_v35 }
 0x136   : >>> { %vm557_vm11 = vcmp.le.f32.partialorder %v553_v36, %v556_v37 }
 0x13b   : >>> { %v1594_v21 = vpop.eup %1593 }
 0x13c   : >>> { %v537_v22 = vmul.f32 %v1594_v21, %v534_v20 }
 0x13e   : >>> { %v539_v23 = vmul.f32 %v537_v22, %v537_v22  ;;  %vm538_vm10 = vcmp.ge.f32.partialorder %v537_v22, 0.0 }
 0x140   : >>> { %v540_v24 = vadd.f32 1.0, %v539_v23 }
 0x142   : >>> { %1595 = vrsqrt.f32 %v540_v24  ;;  %vm543_vm8 = vcmp.eq.f32.partialorder %v540_v24, inf  ;;  %v546_v26 = vand.u32 2147483648, %v540_v24  ;;  %vm545_vm9 = vcmp.eq.f32.partialorder %v540_v24, 0.0 }
 0x14c   : >>> { %v1596_v25 = vpop.eup %1595 }
 0x14d   : >>> { %v542_v27 = vmul.f32 %v1596_v25, %v540_v24 }
 0x14f   : >>> { %v544_v28 = vsel %vm543_vm8, %v540_v24, %v542_v27  ;;  %vm434_vm8 = vcmp.eq.s32.totalorder (%p462_p9), %v422_v7, %v419_v6 }
 0x150   : >>> { %v547_v29 = vsel %vm545_vm9, %v546_v26, %v544_v28 }
 0x151   : >>> { %v548_v30 = vxor.u32 2147483648, %v547_v29 }
 0x153   : >>> { %v549_v33 = vsel %vm538_vm10, %v547_v29, %v548_v30 }
 0x154   : >>> { %v550_v34 = vadd.f32 %v549_v33, %v537_v22 }
 0x156   : >>> { %1597 = vrcp.f32 %v550_v34 }
 0x160   : >>> { %v1598_v38 = vpop.eup %1597 }
 0x161   : >>> { %v558_v39 = vsel %vm557_vm11, 0.0, %v1598_v38 }
 0x162   : >>> { %v559_v40 = vmul.f32 %v558_v39, %v558_v39  ;;  %v563_v41 = vmul.f32 %v558_v39, %v531_v16 }
 0x164   : >>> { %v560_v42 = vadd.f32 1.0, %v559_v40  ;;  %v564_v43 = vsub.f32 %v529_v18, %v563_v41  ;;  %v566_v44 = vadd.f32 %v563_v41, %v533_v19 }
 0x166   : >>> { %1599 = vrsqrt.f32 %v560_v42  ;;  %568 = vst [vmem:[%s567_s22] sm:$0xff] %v564_v43  ;;  %570 = vst [vmem:[%s569_s29] sm:$0xff] %v566_v44  ;;  %s605_s22 = smov [#allocation29]  ;;  %s1807_s29 = smov [#allocation18] }
 0x167   : >>> { %v613_v53 = vld [vmem:[%s1807_s29] sm:$0x3] }
 0x170   : >>> { %v1600_v45 = vpop.eup %1599 }
 0x171   : >>> { %572 = vst [vmem:[%s571_s14] sm:$0xff] %v1600_v45  ;;  %v562_v46 = vmul.f32 %v1600_v45, %v558_v39  ;;  %s603_s14 = smov [#allocation30] }
 0x173   : >>> { %574 = vst [vmem:[%s573_s15] sm:$0xff] %v562_v46  ;;  %s1809_s15 = smov [#allocation19] }
 0x174   : >>> { %v614_v54 = vld [vmem:[%s1809_s15] sm:$0x3] }
 0x178   : >>> { %v576_v47 = vld [vmem:[%s575_s16] ss:$0 sm:$0xff]  ;;  %s1813_s16 = smov [#allocation21] }
 0x179   : >>> { %v585_v48 = vsel %vm584_vm12, %v576_v47, 0.0  ;;  %v616_v56 = vld [vmem:[%s1813_s16] sm:$0x3] }
 0x17a   : >>> { %586 = vadd.xlane.f32.xlu0 %v585_v48  ;;  %v591_v49 = vld [vmem:[%s590_s30] ss:$0 sm:$0xff]  ;;  %s1815_s30 = smov [#allocation10] }
 0x17b   : >>> { %v600_v50 = vsel %vm599_vm13, %v591_v49, 0.0  ;;  %v837_v57 = vld [vmem:[%s1815_s30] sm:$0x3] }
 0x17e   : >>> { %601 = vadd.xlane.f32.xlu0 %v600_v50 }
 0x207   : >>> { %v587_v51 = vpop.xlane.xlu0 %586 }
 0x208   : >>> { %589 = vst [vmem:[%s588_s21] sm:$0xff] %v587_v51  ;;  %s1819_s21 = smov [#allocation14] }
 0x209   : >>> { %v839_v59 = vld [vmem:[%s1819_s21] sm:$0x3] }
 0x20b   : >>> { %v602_v52 = vpop.xlane.xlu0 %601 }
 0x20c   : >>> { %604 = vst [vmem:[%s603_s14] sm:$0xff] %v602_v52  ;;  %s1843_s14 = smov [#allocation21] }
 0x20f   : >>> { %v606_v60 = vld [vmem:[%s605_s22] sm:$0xff]  ;;  %s1841_s22 = smov [#allocation20] }
 0x210   : >>> { %v830_v62 = vld [vmem:[%s829_s11] sm:$0xff]  ;;  %v617_v63 = vmul.f32 %v613_v53, %v606_v60  ;;  %v620_v0 = vmul.f32 %v614_v54, %v606_v60  ;;  %v624_v1 = vmul.f32 %v615_v55, %v606_v60  ;;  %v627_v2 = vmul.f32 %v616_v56, %v606_v60  ;;  %s1839_s11 = smov [#allocation10] }
 0x211   : >>> { %v841_v3 = vmul.f32 %v837_v57, %v830_v62  ;;  %v844_v4 = vmul.f32 %v838_v58, %v830_v62  ;;  %v848_v5 = vmul.f32 %v839_v59, %v830_v62  ;;  %v851_v8 = vmul.f32 %v840_v61, %v830_v62 }
 0x213   : >>> { %v608_v9 = vld [vmem:[%s607_s26] sm:$0xff]  ;;  %s635_s26 = smov [#allocation28] }
 0x214   : >>> { %v832_v10 = vld [vmem:[%s831_s25] sm:$0xff]  ;;  %v618_v11 = vmul.f32 %v615_v55, %v608_v9  ;;  %v621_v12 = vmul.f32 %v616_v56, %v608_v9  ;;  %v623_v13 = vmul.f32 %v613_v53, %v608_v9  ;;  %v626_v14 = vmul.f32 %v614_v54, %v608_v9  ;;  %s633_s25 = smov [#allocation27] }
 0x215   : >>> { %v842_v15 = vmul.f32 %v839_v59, %v832_v10  ;;  %v845_v16 = vmul.f32 %v840_v61, %v832_v10  ;;  %v847_v17 = vmul.f32 %v837_v57, %v832_v10  ;;  %v850_v18 = vmul.f32 %v838_v58, %v832_v10  ;;  %v634_v27 = vld [vmem:[%s633_s25] ss:$0 sm:$0xff]  ;;  %s662_s25 = smov [#allocation25] }
 0x216   : >>> { %v619_v19 = vsub.f32 %v617_v63, %v618_v11  ;;  %v622_v20 = vsub.f32 %v620_v0, %v621_v12  ;;  %v625_v21 = vadd.f32 %v624_v1, %v623_v13  ;;  %v628_v22 = vadd.f32 %v627_v2, %v626_v14  ;;  %v636_v28 = vld [vmem:[%s635_s26] ss:$0 sm:$0xff]  ;;  %s661_s26 = smov [#allocation18] }
 0x217   : >>> { %v843_v23 = vsub.f32 %v841_v3, %v842_v15  ;;  %v846_v24 = vsub.f32 %v844_v4, %v845_v16  ;;  %v849_v25 = vadd.f32 %v848_v5, %v847_v17  ;;  %v852_v26 = vadd.f32 %v851_v8, %v850_v18  ;;  %v669_v63 = vld [vmem:[%s662_s25] ss:$0 sm:$0xff]  ;;  %s905_s25 = sadd.s32 (%p462_p9), 1, %s1635_s17  }
 0x218   : >>> { %630 = vst [vmem:[%s1809_s15] sm:$0x3] %v622_v20  ;;  %632 = vst [vmem:[%s1813_s16] sm:$0x3] %v628_v22  ;;  %s1845_s15 = smov [#allocation18]  ;;  %s703_s16 = smov [#allocation26] }
 0x219   : >>> { %629 = vst [vmem:[%s1807_s29] sm:$0x3] %v619_v19  ;;  %631 = vst [vmem:[%s1811_s24] sm:$0x3] %v625_v21  ;;  %s1847_s24 = smov [#allocation14]  ;;  %s1855_s29 = smov [#allocation19]  ;;  %v710_v59 = vld [vmem:[%s703_s16] ss:$0 sm:$0xff] }
 0x21a   : >>> { %853 = vst [vmem:[%s1815_s30] sm:$0x3] %v843_v23  ;;  %854 = vst [vmem:[%s1817_s23] sm:$0x3] %v846_v24  ;;  %s1849_s23 = smov [#allocation12]  ;;  %s689_s30 = smov [#allocation20] }
 0x21b   : >>> { %855 = vst [vmem:[%s1819_s21] sm:$0x3] %v849_v25  ;;  %856 = vst [vmem:[%s1823_s27] sm:$0x3] %v852_v26  ;;  %s1853_s27 = smov [#allocation16]  ;;  %s702_s21 = smov [#allocation21] }
 0x21c   : >>> { %s805_s16 = smov [#allocation19]  ;;  %p458_p10 = scmp.ge.s32.totalorder (%p462_p9), %s905_s25, 15 }
 0x21d   : >> { %s2032_s17 = smov (%p462_p9), %s905_s25 }
 0x21f   : >>> { %v644_v30 = vld [vmem:[%s1843_s14] sm:$0x3] }
 0x220   : >>> { %v643_v29 = vld [vmem:[%s1841_s22] sm:$0x3]  ;;  %v652_v36 = vmul.f32 %v644_v30, %v636_v28  ;;  %v655_v42 = vmul.f32 %v644_v30, %v634_v27 }
 0x221   : >>> { %v641_v31 = vld [vmem:[%s1845_s15] sm:$0x3]  ;;  %v651_v35 = vmul.f32 %v643_v29, %v634_v27  ;;  %v654_v37 = vmul.f32 %v643_v29, %v636_v28 }
 0x222   : >>> { %v859_v32 = vld [vmem:[%s1839_s11] ss:$0 sm:$0xff]  ;;  %v1521_v34 = vld [vmem:[%s1839_s11 + $0x1] ss:$0 sm:$0xff]  ;;  %v645_v48 = vmul.f32 %v641_v31, %v634_v27  ;;  %v648_v49 = vmul.f32 %v641_v31, %v636_v28 }
 0x223   : >>> { %v1520_v33 = vld [vmem:[%s1839_s11 - $0x1] sm:$0x2]  ;;  %v1523_v40 = vld [vmem:[%s1847_s24 + $0x1] sm:$0x1]  ;;  %v653_v47 = vsub.f32 %v651_v35, %v652_v36  ;;  %v656_v53 = vadd.f32 %v655_v42, %v654_v37 }
 0x224   : >>> { %v866_v38 = vsel %vm789_vm14, %v859_v32, %v1520_v33  ;;  %v870_v39 = vld [vmem:[%s1847_s24] ss:$0 sm:$0xff]  ;;  %v878_v43 = vsel %vm801_vm15, %v1521_v34, %v1523_v40  ;;  %v1525_v45 = vld [vmem:[%s1849_s23 + $0x1] ss:$0 sm:$0xff] }
 0x225   : >>> { %v883_v41 = vld [vmem:[%s1849_s23] ss:$0 sm:$0xff]  ;;  %869 = vst [vmem:[%s1839_s11] sm:$0x3] %v866_v38  ;;  %880 = vst [vmem:[%s1847_s24] sm:$0x3] %v878_v43  ;;  %v1527_v51 = vld [vmem:[%s1853_s27 + $0x1] sm:$0x1] }
 0x226   : >>> { %v1524_v44 = vld [vmem:[%s1849_s23 - $0x1] sm:$0x2]  ;;  %1522 = vst [vmem:[%s1839_s11 + $0x1] sm:$0x1] %v870_v39  ;;  %v902_v54 = vsel %vm801_vm15, %v1525_v45, %v1527_v51  ;;  %659 = vst [vmem:[%s1841_s22] sm:$0x3] %v653_v47  ;;  %s676_s11 = smov [#allocation19] }
 0x227   : >>> { %v894_v46 = vld [vmem:[%s1853_s27] ss:$0 sm:$0xff]  ;;  %v890_v50 = vsel %vm789_vm14, %v883_v41, %v1524_v44  ;;  %660 = vst [vmem:[%s1843_s14] sm:$0x3] %v656_v53  ;;  %s1897_s22 = smov [#allocation20]  ;;  %s1642_s14 = smov 1  }
 0x228   : >>> { %v642_v52 = vld [vmem:[%s1855_s29] sm:$0x3]  ;;  %893 = vst [vmem:[%s1849_s23] sm:$0x3] %v890_v50  ;;  %904 = vst [vmem:[%s1853_s27] sm:$0x3] %v902_v54  ;;  %s718_s24 = smov [#allocation19]  ;;  %s1900_s27 = smov [#allocation21] }
 0x229   : >>> { %v646_v55 = vmul.f32 %v642_v52, %v636_v28  ;;  %v649_v56 = vmul.f32 %v642_v52, %v634_v27  ;;  %1526 = vst [vmem:[%s1849_s23 + $0x1] sm:$0x1] %v894_v46  ;;  %s1643_s23 = smov 127  }
 0x22b   : >>> { %v647_v57 = vsub.f32 %v645_v48, %v646_v55  ;;  %v650_v58 = vadd.f32 %v649_v56, %v648_v49 }
 0x22d   : >>> { %657 = vst [vmem:[%s1845_s15] sm:$0x3] %v647_v57  ;;  %658 = vst [vmem:[%s1855_s29] sm:$0x3] %v650_v58  ;;  %v696_v60 = vld [vmem:[%s689_s30] sm:$0x3]  ;;  %s717_s15 = smov [#allocation18]  ;;  %s781_s29 = smov [#allocation18] }
 0x22e   : >>> { %v700_v61 = vsel %vm699_vm0, 0.0, %v696_v60  ;;  %v711_v62 = vld [vmem:[%s702_s21] sm:$0x3] }
 0x22f   : >>> { %701 = vst [vmem:[%s689_s30] sm:$0x3] %v700_v61  ;;  %v715_v0 = vsel %vm714_vm1, %v710_v59, %v711_v62  ;;  %s782_s30 = smov [#allocation20] }
 0x230   : >>> { %716 = vst [vmem:[%s702_s21] sm:$0x3] %v715_v0  ;;  %s806_s21 = smov [#allocation21] }
 0x234   : >>> { %v670_v1 = vld [vmem:[%s661_s26] sm:$0x3] }
 0x235   : >>> { %v683_v2 = vld [vmem:[%s676_s11] sm:$0x3]  ;;  %v674_v3 = vsel %vm673_vm3, %v669_v63, %v670_v1 }
 0x236   : >>> { %v687_v4 = vsel %vm686_vm4, 0.0, %v683_v2  ;;  %675 = vst [vmem:[%s661_s26] sm:$0x3] %v674_v3  ;;  %v755_v5 = vld [vmem:[%s1897_s22] sm:$0x3]  ;;  %s370_s26 = smov (%p462_p9), [#allocation18] }
 0x237   : >>> { %688 = vst [vmem:[%s676_s11] sm:$0x3] %v687_v4  ;;  %756 = vrot.lane.b32.xlu0 %v755_v5, %s1642_s14  ;;  %v751_v11 = vld [vmem:[%s1900_s27] sm:$0x3]  ;;  %s389_s11 = smov (%p462_p9), [#allocation19] }
 0x238   : >>> { %v772_v12 = vld [vmem:[%s1900_s27] sm:$0x3] }
 0x239   : >>> { %v754_v30 = vld [vmem:[%s1897_s22] sm:$0x3] }
 0x23d   : >>> { %v723_v8 = vld [vmem:[%s717_s15] sm:$0x3] }
 0x23e   : >>> { %724 = vrot.lane.b32.xlu1 %v723_v8, %s1642_s14  ;;  %v719_v9 = vld [vmem:[%s718_s24] sm:$0x3] }
 0x23f   : >>> { %v740_v10 = vld [vmem:[%s718_s24] sm:$0x3] }
 0x240   : >>> { %v722_v18 = vld [vmem:[%s717_s15] sm:$0x3] }
 0x242   : >>> { %720 = vrot.lane.b32.xlu1 %v719_v9, %s1642_s14 }
 0x246   : >>> { %741 = vrot.lane.b32.xlu1 %v740_v10, %s1643_s23 }
 0x24a   : >>> { %752 = vrot.lane.b32.xlu1 %v751_v11, %s1642_s14  ;;  %s423_s14 = smov (%p462_p9), [#allocation21] }
 0x24e   : >>> { %773 = vrot.lane.b32.xlu1 %v772_v12, %s1643_s23 }
 0x2a9   : >>> { %v757_v20 = vpop.permute.xlu0 %756 }
 0x2aa   : >>> { %v761_v22 = vsel %vm728_vm5, %v755_v5, %v757_v20 }
 0x2b0   : >>> { %v725_v13 = vpop.permute.xlu1 %724 }
 0x2b1   : >>> { %v729_v14 = vsel %vm728_vm5, %v723_v8, %v725_v13 }
 0x2b4   : >>> { %v721_v15 = vpop.permute.xlu1 %720 }
 0x2b5   : >>> { %v733_v16 = vsel %vm732_vm6, %v721_v15, %v729_v14 }
 0x2b6   : >>> { %v739_v17 = vsel %vm1381_vm2, %v733_v16, 0.0 }
 0x2b7   : >>> { %747 = vst [vmem:[%s717_s15] sm:$0x3] %v739_v17 }
 0x2b8   : >>> { %v742_v19 = vpop.permute.xlu1 %741 }
 0x2b9   : >>> { %v746_v21 = vsel %vm732_vm6, %v722_v18, %v742_v19 }
 0x2ba   : >>> { %748 = vst [vmem:[%s718_s24] sm:$0x3] %v746_v21 }
 0x2bc   : >>> { %v753_v23 = vpop.permute.xlu1 %752 }
 0x2bd   : >>> { %v765_v24 = vsel %vm732_vm6, %v753_v23, %v761_v22 }
 0x2be   : >>> { %v783_v25 = vld [vmem:[%s781_s29] ss:$0 sm:$0xff]  ;;  %v1513_v27 = vld [vmem:[%s781_s29 + $0x1] ss:$0 sm:$0xff]  ;;  %v771_v29 = vsel %vm1381_vm2, %v765_v24, 0.0 }
 0x2bf   : >>> { %v1512_v26 = vld [vmem:[%s781_s29 - $0x1] sm:$0x2]  ;;  %779 = vst [vmem:[%s1897_s22] sm:$0x3] %v771_v29  ;;  %s406_s22 = smov (%p462_p9), [#allocation20] }
 0x2c0   : >>> { %v790_v28 = vsel %vm789_vm14, %v783_v25, %v1512_v26  ;;  %v774_v31 = vpop.permute.xlu1 %773 }
 0x2c1   : >>> { %793 = vst [vmem:[%s781_s29] sm:$0x3] %v790_v28  ;;  %v807_v32 = vld [vmem:[%s805_s16] ss:$0 sm:$0xff]  ;;  %v1517_v34 = vld [vmem:[%s805_s16 + $0x1] ss:$0 sm:$0xff]  ;;  %v778_v35 = vsel %vm732_vm6, %v754_v30, %v774_v31 }
 0x2c2   : >>> { %v1516_v33 = vld [vmem:[%s805_s16 - $0x1] sm:$0x2]  ;;  %780 = vst [vmem:[%s1900_s27] sm:$0x3] %v778_v35 }
 0x2c3   : >>> { %v814_v36 = vsel %vm789_vm14, %v807_v32, %v1516_v33 }
 0x2c4   : >>> { %817 = vst [vmem:[%s805_s16] sm:$0x3] %v814_v36 }
 0x2c6   : >>> { %v794_v37 = vld [vmem:[%s782_s30] ss:$0 sm:$0xff]  ;;  %v1515_v38 = vld [vmem:[%s782_s30 + $0x1] sm:$0x1] }
 0x2c7   : >>> { %1514 = vst [vmem:[%s781_s29 + $0x1] sm:$0x1] %v794_v37  ;;  %v802_v39 = vsel %vm801_vm15, %v1513_v27, %v1515_v38  ;;  %464 = sbr.rel (!%p462_p9) target bundleno = 279 (0x117), region = 470 }
 0x2c8   : >>> { %804 = vst [vmem:[%s782_s30] sm:$0x3] %v802_v39 }
 0x2c9   : >>> { %v818_v40 = vld [vmem:[%s806_s21] ss:$0 sm:$0xff]  ;;  %v1519_v41 = vld [vmem:[%s806_s21 + $0x1] sm:$0x1] }
 0x2ca   : >>> { %1518 = vst [vmem:[%s805_s16 + $0x1] sm:$0x1] %v818_v40  ;;  %v826_v42 = vsel %vm801_vm15, %v1517_v34, %v1519_v41 }
 0x2cb   : >>> { %828 = vst [vmem:[%s806_s21] sm:$0x3] %v826_v42 }
 0x2ce   : >> { %v376_v43 = vld [vmem:[%s370_s26] sm:$0x3] }
 0x2cf   : >> { %v377_v45 = vsel %vm1381_vm2, %v376_v43, 0.0  ;;  %v412_v47 = vld [vmem:[%s406_s22] sm:$0x3] }
 0x2d0   : >> { %v378_v49 = vmul.f32 %v377_v45, %v377_v45  ;;  %v413_v51 = vsel %vm1381_vm2, %v412_v47, 0.0 }
 0x2d1   : >> { %v395_v44 = vld [vmem:[%s389_s11] sm:$0x3]  ;;  %v414_v53 = vmul.f32 %v413_v51, %v413_v51 }
 0x2d2   : >> { %v396_v46 = vsel %vm1381_vm2, %v395_v44, 0.0  ;;  %v429_v48 = vld [vmem:[%s423_s14] sm:$0x3]  ;;  %v382_v56 = vsel %vm381_vm7, 0.0, %v378_v49 }
 0x2d3   : >> { %v397_v50 = vmul.f32 %v396_v46, %v396_v46  ;;  %v430_v52 = vsel %vm1381_vm2, %v429_v48, 0.0 }
 0x2d4   : >> { %v431_v55 = vmul.f32 %v430_v52, %v430_v52 }
 0x2d5   : >> { %v399_v54 = vadd.f32 %v397_v50, %v378_v49  ;;  %v398_v57 = vadd.f32 %v397_v50, %v382_v56 }
 0x2d6   : >> { %v435_v60 = vsel %vm434_vm8, 0.0, %v431_v55 }
 0x2d7   : >> { %v416_v58 = vadd.f32 %v414_v53, %v399_v54  ;;  %v415_v59 = vadd.f32 %v414_v53, %v398_v57 }
 0x2d9   : >> { %v437_v61 = vadd.f32 %v431_v55, %v416_v58  ;;  %v436_v62 = vadd.f32 %v435_v60, %v415_v59 }
 0x2db   : >> { %438 = vadd.xlane.f32.xlu0 %v437_v61 }
 0x2df   : >> { %446 = vadd.xlane.f32.xlu0 %v436_v62 }
 0x368   : >> { %v439_v63 = vpop.xlane.xlu0 %438 }
 0x369   : >> { %v440_v0 = vrot.slane %v439_v63, 4 }
 0x36b   : >> { %v441_v1 = vadd.f32 %v440_v0, %v439_v63 }
 0x36c   : >> { %v447_v2 = vpop.xlane.xlu0 %446 }
 0x36d   : >> { %v442_v3 = vrot.slane %v441_v1, 2  ;;  %v448_v4 = vrot.slane %v447_v2, 4 }
 0x36f   : >> { %v449_v5 = vadd.f32 %v448_v4, %v447_v2  ;;  %v443_v8 = vadd.f32 %v442_v3, %v441_v1 }
 0x371   : >> { %v450_v9 = vrot.slane %v449_v5, 2  ;;  %v444_v11 = vrot.slane %v443_v8, 1 }
 0x373   : >> { %v451_v10 = vadd.f32 %v450_v9, %v449_v5  ;;  %v445_v14 = vadd.f32 %v444_v11, %v443_v8 }
 0x375   : >> { %v452_v12 = vrot.slane %v451_v10, 1 }
 0x377   : >> { %v453_v13 = vadd.f32 %v452_v12, %v451_v10 }
 0x379   : >> { %1546 = vpush %v453_v13 }
 0x37a   : >> { %1548 = vpush %v445_v14 }
 0x3aa   : >> { %s1547_s20 = spop %1546 }
 0x3ab   : >> { %s1549_s15 = spop %1548 }
 0x3ac   : >> { %s456_s24 = smul.f32 1e-10, %s1549_s15 }
 0x3ae   : >> { %p457_p11 = scmp.le.f32.partialorder %s1547_s20, %s456_s24 }
 0x3b0   : >> { %p459_p12 = por %p458_p10, %p457_p11 }
 0x3b2   : > { %907 = sbr.rel (!%p459_p12) target bundleno = 278 (0x116), region = 481 }
 0x3b9 PF: > { %s912_s23 = smov [#allocation18]  ;;  %v916_v6 = vmov %v1751_v6  ;;  %v919_v7 = vmov %v1753_v7  ;;  %v955_v15 = vld [vmem:[#allocation10] sm:$0x3]  ;;  %v961_v16 = vld [vmem:[#allocation12] sm:$0x3]  ;;  %s2033_s17 = scalar_lea.vmem [#allocation11], %s1747_s28 }
 0x3ba   : > { %v936_v6 = vmov %v1751_v6  ;;  %v939_v7 = vmov %v1753_v7  ;;  %v920_v17 = vld [vmem:[%s912_s23] sm:$0x3]  ;;  %vm923_vm9 = vcmp.eq.s32.totalorder %v919_v7, %v916_v6  ;;  %957 = vst [vmem:[%s2033_s17] sm:$0x3] %v955_v15  ;;  %s2034_s27 = scalar_lea.vmem [#allocation13], %s1747_s28  ;;  %v967_v18 = vld [vmem:[#allocation14] sm:$0x3] }
 0x3bb   : > { %vm943_vm10 = vcmp.eq.s32.totalorder %v939_v7, %v936_v6  ;;  %963 = vst [vmem:[%s2034_s27] sm:$0x3] %v961_v16  ;;  %v973_v19 = vld [vmem:[#allocation16] sm:$0x3]  ;;  %v924_v20 = vsel %vm923_vm9, %v920_v17, 0.0  ;;  %s932_s29 = smov [#allocation21]  ;;  %s2035_s16 = scalar_lea.vmem [#allocation15], %s1747_s28 }
 0x3bc   : > { %969 = vst [vmem:[%s2035_s16] sm:$0x3] %v967_v18  ;;  %s2036_s30 = scalar_lea.vmem [#allocation17], %s1747_s28  ;;  %v925_v21 = vrot.slane %v924_v20, 4  ;;  %v940_v22 = vld [vmem:[%s932_s29] sm:$0x3]  ;;  %s908_s21 = sand.u32 7, %s1710_s12  }
 0x3bd   : > { %975 = vst [vmem:[%s2036_s30] sm:$0x3] %v973_v19  ;;  %v944_v23 = vsel %vm943_vm10, %v940_v22, 0.0  ;;  %s2037_s25 = scalar_lea.vmem [#allocation8], %s1749_s18  ;;  %s2038_s11 = scalar_lea.vmem [#allocation9], %s1749_s18 }
 0x3be   : > { %v926_v24 = vadd.f32 %v925_v21, %v924_v20  ;;  %v945_v25 = vrot.slane %v944_v23, 4  ;;  %s909_s26 = scalar_lea.vmem %s2037_s25, %s908_s21 [#allocation8]  ;;  %s911_s22 = scalar_lea.vmem %s2038_s11, %s908_s21 [#allocation9] }
 0x3bf   : > { %s913_s26 = smov %s909_s26  ;;  %s933_s22 = smov %s911_s22 }
 0x3c0   : > { %v927_v6 = vrot.slane %v926_v24, 2  ;;  %v946_v7 = vadd.f32 %v945_v25, %v944_v23  ;;  %s1003_s14 = sshrl.u32 (%p1724_p3), %s1710_s12, 3  ;;  %s2039_s20 = scalar_lea.vmem (%p1724_p3), [#allocation8], %s1749_s18 }
 0x3c1   : > { %s1534_s15 = sshll.u32 (%p1724_p3), %s1003_s14, 3 }
 0x3c2   : > { %v928_v26 = vadd.f32 %v927_v6, %v926_v24  ;;  %v947_v27 = vrot.slane %v946_v7, 2  ;;  %s1005_s17 = scalar_lea.vmem (%p1724_p3), %s2024_s4, %s1534_s15 }
 0x3c4   : > { %v929_v28 = vrot.slane %v928_v26, 1  ;;  %v948_v29 = vadd.f32 %v947_v27, %v946_v7  ;;  %1002 = sbr.rel (!%p1724_p3) target bundleno = 977 (0x3d1), region = 158 }
 0x3c6   : > { %v930_v30 = vadd.f32 %v929_v28, %v928_v26  ;;  %v949_v31 = vrot.slane %v948_v29, 1 }
 0x3c8   : > { %931 = vst [vmem:[%s913_s26] sm:$0x1] %v930_v30  ;;  %v950_v32 = vadd.f32 %v949_v31, %v948_v29 }
 0x3ca   : > { %951 = vst [vmem:[%s933_s22] sm:$0x1] %v950_v32 }
 0x3cf   : > { %v1033_v33 = vld [vmem:[%s2039_s20] sm:$0xff] }
 0x3d0   : > { %1034 = vst [vmem:[%s1005_s17] sm:$0xff] %v1033_v33 }
 0x3d1 PF: > { %1040 = sbr.rel (!%p1724_p3) target bundleno = 985 (0x3d9), region = 196  ;;  %s1041_s27 = sshrl.u32 (%p1724_p3), %s1710_s12, 3 }
 0x3d2   : > { %s2040_s29 = scalar_lea.vmem (%p1724_p3), [#allocation9], %s1749_s18  ;;  %s1535_s16 = sshll.u32 (%p1724_p3), %s1041_s27, 3 }
 0x3d3   : > { %s1043_s25 = scalar_lea.vmem (%p1724_p3), %s2025_s5, %s1535_s16 }
 0x3d7   : > { %v1071_v34 = vld [vmem:[%s2040_s29] sm:$0xff] (%p1724_p3) }
 0x3d8   : > { %1072 = vst [vmem:[%s1043_s25] sm:$0xff] %v1071_v34 }
 0x3d9 PF: > { %s1536_s26 = sshll.u32 %s1710_s12, 1  ;;  %s2041_s19 = scalar_lea.vmem [#allocation11], %s1747_s28 }
 0x3da   : > { %v1093_v35 = vld [vmem:[%s2041_s19] sm:$0x3]  ;;  %s2042_s11 = scalar_lea.vmem [#allocation13], %s1747_s28  ;;  %s1077_s14 = scalar_lea.vmem %s2026_s6, %s1536_s26 }
 0x3db   : > { %v1126_v36 = vld [vmem:[%s2042_s11] sm:$0x3]  ;;  %s1110_s24 = scalar_lea.vmem %s2027_s7, %s1536_s26  ;;  %s2043_s23 = scalar_lea.vmem [#allocation15], %s1747_s28  ;;  %1094 = vst [vmem:[%s1077_s14] sm:$0x3] %v1093_v35 }
 0x3dc   : > { %v1159_v37 = vld [vmem:[%s2043_s23] sm:$0x3]  ;;  %s2044_s17 = scalar_lea.vmem [#allocation17], %s1747_s28  ;;  %1127 = vst [vmem:[%s1110_s24] sm:$0x3] %v1126_v36  ;;  %s1143_s29 = scalar_lea.vmem %s2028_s8, %s1536_s26 }
 0x3dd   : > { %v1192_v38 = vld [vmem:[%s2044_s17] sm:$0x3]  ;;  %s1176_s21 = scalar_lea.vmem %s2029_s9, %s1536_s26  ;;  %1160 = vst [vmem:[%s1143_s29] sm:$0x3] %v1159_v37 }
 0x3de   : > { %1193 = vst [vmem:[%s1176_s21] sm:$0x3] %v1192_v38 }
 0x3df PF: > { %s2045_s25 = sld [smem:[#allocation31_spill]]  ;;  %p13_p13 = scmp.ge.s32.totalorder %s1713_s13, 36  }
 0x3e0   : > { %s2046_s30 = smov %s1627_s10  ;;  %s2048_s11 = smov %s1713_s13 }
 0x3e1   :  { %15 = sbr.rel (!%p13_p13) target bundleno = 2 (0x2), region = 492 }
 0x3e5   : > { %s2047_s10 = smov %s2045_s25 }

// kernel: reverse
= control target key start
LH: loop header
LB: loop body
LE: loop exit
PB: predicated region body
PF: predicated region fallthrough
CT: control target
= control target key end

     0   :  { %v40_v1 = vld [vmem:[#allocation1] sm:$0xf]  ;;  %v50_v4 = vlaneseq  ;;  %s116_s0 = inlined_call_operand.vmem [shape: f32[34,4], index: 0, kind: input, shape index: {}]   ;;  %s117_s1 = inlined_call_operand.vmem [shape: f32[34,4], index: 1, kind: output, shape index: {}]  }
   0x1   :  { %v18_v0 = vld [vmem:[%s116_s0] sm:$0xf]  ;;  %41 = vst [vmem:[#allocation0] sm:$0xf] %v40_v1 }
   0x2   :  { %19 = vst [vmem:[#allocation1 + $0x4] sm:$0xf] %v18_v0  ;;  %v51_v6 = vshrl.u32 %v50_v4, 7 }
   0x4   :  { %vm52_vm0 = vcmp.lt.s32.totalorder %v51_v6, 4 }
   0x8   :  { %v43_v3 = vld [vmem:[#allocation0 + $0x7] ss:$-1 sm:$0xff] }
   0x9   :  { %v37_v2 = vld [vmem:[#allocation1 + $0x4] sm:$0xf]  ;;  %v44_v5 = vrot.slane %v43_v3, 4 }
   0xa   :  { %39 = vst [vmem:[#allocation0 + $0x8] sm:$0xf] %v37_v2 }
   0xb   :  { %45 = vst [vmem:[#allocation2] sm:$0xff] %v44_v5 }
  0x11   :  { %v48_v7 = vld [vmem:[#allocation0 + $0xf] ss:$-1 sm:$0xff] }
  0x12   :  { %v49_v8 = vrot.slane %v48_v7, 4 }
  0x14   :  { %53 = vst.msk [vmem:[#allocation2] sm:$0xff] %vm52_vm0, %v49_v8 }
  0x1b   :  { %v57_v9 = vld [vmem:[#allocation2] sm:$0xf] }
  0x1c   :  { %59 = vst [vmem:[#allocation3] sm:$0xf] %v57_v9 }
  0x23   :  { %v75_v10 = vld [vmem:[#allocation3] sm:$0xf] }
  0x24   :  { %76 = vst [vmem:[%s117_s1] sm:$0xf] %v75_v10 }

// kernel: uncoupled_lstm_forward.1
= control target key start
LH: loop header
LB: loop body
LE: loop exit
PB: predicated region body
PF: predicated region fallthrough
CT: control target
= control target key end

     0   :  { %s2178_s30 = smov 96   ;;  %s2179_s12 = smov 32   ;;  %v2180_v47 = vmov 0   ;;  %vm213_vm0 = vcmask 261120   ;;  %vm256_vm1 = vcmask 523264   ;;  %vm1261_vm4 = vcmask 130048   ;;  %s2763_s1 = inlined_call_operand.vmem [shape: f32[128,128], index: 1, kind: input, shape index: {}]   ;;  %s2764_s0 = inlined_call_operand.vmem [shape: f32[64,128], index: 0, kind: input, shape index: {}]   ;;  %s2765_s2 = inlined_call_operand.vmem [shape: f32[1,128], index: 2, kind: input, shape index: {}]   ;;  %s2766_s3 = inlined_call_operand.vmem [shape: bf16[64,256], index: 3, kind: input, shape index: {}]   ;;  %s2767_s4 = inlined_call_operand.vmem [shape: f32[1,128], index: 4, kind: input, shape index: {}]   ;;  %s2768_s5 = inlined_call_operand.vmem [shape: f32[32,16], index: 5, kind: input, shape index: {}]   ;;  %s2769_s7 = inlined_call_operand.vmem [shape: f32[16,8], index: 7, kind: input, shape index: {}]   ;;  %s2770_s6 = inlined_call_operand.vmem [shape: f32[1,16], index: 6, kind: input, shape index: {}]   ;;  %s2771_s9 = inlined_call_operand.vmem [shape: f32[8,2], index: 9, kind: input, shape index: {}]   ;;  %s2772_s8 = inlined_call_operand.vmem [shape: f32[1,8], index: 8, kind: input, shape index: {}]   ;;  %s2773_s10 = inlined_call_operand.vmem [shape: f32[1,2], index: 10, kind: input, shape index: {}]   ;;  %s2774_s11 = inlined_call_operand.vmem [shape: f32[72,128], index: 11, kind: output, shape index: {}]  }
   0x1   :  { %v55_v0 = vld [vmem:[%s2763_s1] sm:$0xff]  ;;  %v56_v1 = vld [vmem:[%s2763_s1 + $0x8] sm:$0xff]  ;;  %v57_v2 = vld [vmem:[%s2763_s1 + $0x10] sm:$0xff]  ;;  %292 = vmatprep.mubr.bf16.mxu1 %v2180_v47  ;;  %2029 = vset.pattern.permute.xlu0 %v2180_v47  ;;  %vm1423_vm13 = vcmask 64512  }
   0x2   :  { %v1976_v3 = vpack.c.bf16 %v56_v1, %v55_v0  ;;  %v58_v4 = vld [vmem:[%s2763_s1 + $0x18] sm:$0xff]  ;;  %v59_v6 = vld [vmem:[%s2763_s1 + $0x20] sm:$0xff]  ;;  %v60_v7 = vld [vmem:[%s2763_s1 + $0x28] sm:$0xff]  ;;  %2030 = vset.pattern.permute.xlu1 %v2180_v47 }
   0x3   :  { %v1980_v5 = vpack.c.bf16 %v58_v4, %v57_v2  ;;  %v1984_v8 = vpack.c.bf16 %v60_v7, %v59_v6  ;;  %v39_v9 = vld [vmem:[%s2764_s0] sm:$0xff]  ;;  %v61_v10 = vld [vmem:[%s2763_s1 + $0x30] sm:$0xff]  ;;  %v62_v11 = vld [vmem:[%s2763_s1 + $0x38] sm:$0xff] }
   0x4   :  { %1977 = vmatprep.subr.bf16.mxu0 %v1976_v3  ;;  %1914 = vmatprep.mubr.f32.mxu0 %v39_v9  ;;  %v1988_v12 = vpack.c.bf16 %v62_v11, %v61_v10  ;;  %v63_v13 = vld [vmem:[%s2763_s1 + $0x40] sm:$0xff]  ;;  %v64_v14 = vld [vmem:[%s2763_s1 + $0x48] sm:$0xff]  ;;  %v65_v16 = vld [vmem:[%s2763_s1 + $0x50] sm:$0xff] }
   0x5   :  { %1979 = vmatpush3.bf16.msra.mxu0 %v1976_v3  ;;  %v1992_v15 = vpack.c.bf16 %v64_v14, %v63_v13  ;;  %v66_v17 = vld [vmem:[%s2763_s1 + $0x58] sm:$0xff]  ;;  %v67_v19 = vld [vmem:[%s2763_s1 + $0x60] sm:$0xff]  ;;  %v68_v20 = vld [vmem:[%s2763_s1 + $0x68] sm:$0xff] }
   0x6   :  { %1981 = vmatprep.subr.bf16.mxu0 %v1980_v5  ;;  %v1996_v18 = vpack.c.bf16 %v66_v17, %v65_v16  ;;  %v2000_v21 = vpack.c.bf16 %v68_v20, %v67_v19  ;;  %v69_v22 = vld [vmem:[%s2763_s1 + $0x70] sm:$0xff]  ;;  %v70_v23 = vld [vmem:[%s2763_s1 + $0x78] sm:$0xff]  ;;  %v40_v25 = vld [vmem:[%s2764_s0 + $0x8] sm:$0xff]  ;;  %s2177_s1 = smov 64  }
   0x7   :  { %v2004_v24 = vpack.c.bf16 %v70_v23, %v69_v22  ;;  %v2299_v26 = vld [vmem:[%s2765_s2] ss:$0 sm:$0xff]  ;;  %v2308_v38 = vld [vmem:[%s2766_s3 + $0x4] ss:$8 sps:$4 sm:$0xff]   ;;  %v2319_v40 = vld [vmem:[%s2766_s3 + $0x14] ss:$8 sps:$4 sm:$0xff]  }
   0x8   :  { %v2313_v39 = vld [vmem:[%s2766_s3] ss:$8 sps:$4 sm:$0xff]   ;;  %260 = vmatprep.subr.bf16.mxu1 %v2308_v38  ;;  %v2326_v41 = vld [vmem:[%s2766_s3 + $0x10] ss:$8 sps:$4 sm:$0xff]   ;;  %v2333_v42 = vld [vmem:[%s2766_s3 + $0x24] ss:$8 sps:$4 sm:$0xff]  }
   0x9   :  { %1983 = vmatpush3.bf16.msra.mxu0 %v1980_v5  ;;  %261 = vmatpush1.bf16.msra.mxu1 %v2313_v39  ;;  %v2340_v43 = vld [vmem:[%s2766_s3 + $0x20] ss:$8 sps:$4 sm:$0xff]   ;;  %v2347_v45 = vld [vmem:[%s2766_s3 + $0x34] ss:$8 sps:$4 sm:$0xff]   ;;  %v2359_v46 = vld [vmem:[%s2766_s3 + $0x30] ss:$8 sps:$4 sm:$0xff]  }
   0xa   :  { %1985 = vmatprep.subr.bf16.mxu0 %v1984_v8  ;;  %262 = vmatprep.subr.bf16.mxu1 %v2319_v40  ;;  %v2385_v54 = vld [vmem:[%s2767_s4] ss:$0 sm:$0xff]  ;;  %v41_v22 = vld [vmem:[%s2764_s0 + $0x10] sm:$0xff]  ;;  %v42_v23 = vld [vmem:[%s2764_s0 + $0x18] sm:$0xff] }
   0xd   :  { %1987 = vmatpush3.bf16.msra.mxu0 %v1984_v8  ;;  %263 = vmatpush1.bf16.msra.mxu1 %v2326_v41 }
   0xe   :  { %1989 = vmatprep.subr.bf16.mxu0 %v1988_v12  ;;  %264 = vmatprep.subr.bf16.mxu1 %v2333_v42 }
  0x11   :  { %1991 = vmatpush3.bf16.msra.mxu0 %v1988_v12  ;;  %265 = vmatpush1.bf16.msra.mxu1 %v2340_v43 }
  0x12   :  { %1993 = vmatprep.subr.bf16.mxu0 %v1992_v15  ;;  %266 = vmatprep.subr.bf16.mxu1 %v2347_v45 }
  0x15   :  { %1995 = vmatpush3.bf16.msra.mxu0 %v1992_v15  ;;  %267 = vmatpush1.bf16.msra.mxu1 %v2359_v46 }
  0x16   :  { %1997 = vmatprep.subr.bf16.mxu0 %v1996_v18  ;;  %371 = vmatprep.subr.bf16.mxu1 %v2308_v38 }
  0x19   :  { %1999 = vmatpush3.bf16.msra.mxu0 %v1996_v18 }
  0x1a   :  { %2001 = vmatprep.subr.bf16.mxu0 %v2000_v21 }
  0x1d   :  { %2003 = vmatpush3.bf16.msra.mxu0 %v2000_v21 }
  0x1e   :  { %2005 = vmatprep.subr.bf16.mxu0 %v2004_v24 }
  0x21   :  { %2007 = vmatpush3.bf16.msra.mxu0 %v2004_v24 }
  0x22   :  { %478 = vmatprep.subr.bf16.mxu0 %v2308_v38 }
  0x24   :  { %1915 = vmatmul.mubr.f32.vlgmr.msra.gmra.mrb[0].mxu0 %v40_v25 }
  0x25   :  { %479 = vmatpush1.bf16.msra.mxu0 %v2313_v39  ;;  %1917 = vmatprep.mubr.f32.mxu0 %v41_v22 }
  0x26   :  { %480 = vmatprep.subr.bf16.mxu0 %v2319_v40 }
  0x28   :  { %1918 = vmatmul.mubr.f32.gmra.mrb[2].mxu0 %v42_v23 }
  0x29   :  { %481 = vmatpush1.bf16.msra.mxu0 %v2326_v41 }
  0x2a   :  { %482 = vmatprep.subr.bf16.mxu0 %v2333_v42 }
  0x2d   :  { %483 = vmatpush1.bf16.msra.mxu0 %v2340_v43 }
  0x2e   :  { %484 = vmatprep.subr.bf16.mxu0 %v2347_v45 }
  0x31   :  { %485 = vmatpush1.bf16.msra.mxu0 %v2359_v46 }
  0x32   :  { %692 = vmatprep.subr.bf16.mxu0 %v2308_v38 }
  0xf7   :  { %v2301_v27 = vpop.f32.mrb[0].mxu0 }
  0xf8   :  { %v144_v28 = vpop.f32.mrb[1].mxu0  ;;  %v150_v53 = vadd.f32 %v2301_v27, %v2299_v26 }
  0xf9   :  { %v145_v29 = vadd.f32 %v2299_v26, %v144_v28 }
  0xfb   :  { %v1744_v30 = vmul.f32 -1.442695, %v145_v29 }
  0xfd   :  { %2055 = vpow2.f32 %v1744_v30  ;;  %v2413_v30 = vpop.f32.mrb[2].mxu0 }
 0x107   :  { %v2056_v31 = vpop.eup %2055 }
 0x108   :  { %v193_v32 = vadd.f32 1.0, %v2056_v31  ;;  %v154_v31 = vpop.f32.mrb[3].mxu0 }
 0x10a   :  { %2057 = vrcp.f32 %v193_v32 }
 0x114   :  { %v2058_v33 = vpop.eup %2057 }
 0x115   :  { %v196_v34 = vmul.f32 2.0, %v2058_v33 }
 0x117   :  { %v1745_v35 = vadd.f32 -1.0, %v196_v34 }
 0x119   :  { %199 = vrot.lane.b32.xlu0 %v1745_v35, %s2177_s1 }
 0x18b   :  { %v200_v36 = vpop.permute.xlu0 %199 }
 0x18c   :  { %v202_v37 = vmul.f32 %v2058_v33, %v200_v36  ;;  %v155_v36 = vadd.f32 %v2299_v26, %v154_v31 }
 0x18e   :  { %2059 = vtanh.f32 %v202_v37 }
 0x198   :  { %v2060_v44 = vpop.eup %2059 }
 0x199   :  { %205 = vrot.lane.b32.xlu0 %v2060_v44, %s2178_s30 }
 0x19d   :  { %318 = vrot.lane.b32.xlu0 %v202_v37, %s2179_s12 }
 0x20b   :  { %v206_v48 = vpop.permute.xlu0 %205 }
 0x20c   :  { %v208_v49 = vmul.f32 %v2058_v33, %v206_v48 }
 0x20e   :  { %210 = vrot.lane.b32.xlu1 %v208_v49, %s2179_s12 }
 0x20f   :  { %v319_v13 = vpop.permute.xlu0 %318 }
 0x280   :  { %v211_v50 = vpop.permute.xlu1 %210 }
 0x281   :  { %v214_v51 = vsel %vm213_vm0, %v211_v50, 0.0 }
 0x282   :  { %v215_v52 = vpack.c.bf16 %v214_v51, %v214_v51 }
 0x284   :  { %1754 = vmatmul.mubr.msk.bf16.vlgmr.msra.gmra.mrb[0].mxu1 %vm256_vm1, %v215_v52 }
 0x285   :  { %372 = vmatpush1.bf16.msra.mxu1 %v2313_v39  ;;  %403 = vmatprep.mubr.bf16.mxu1 %v2180_v47 }
 0x286   :  { %373 = vmatprep.subr.bf16.mxu1 %v2319_v40 }
 0x289   :  { %374 = vmatpush1.bf16.msra.mxu1 %v2326_v41 }
 0x28a   :  { %375 = vmatprep.subr.bf16.mxu1 %v2333_v42 }
 0x28d   :  { %376 = vmatpush1.bf16.msra.mxu1 %v2340_v43 }
 0x28e   :  { %377 = vmatprep.subr.bf16.mxu1 %v2347_v45 }
 0x291   :  { %378 = vmatpush1.bf16.msra.mxu1 %v2359_v46 }
 0x292   :  { %585 = vmatprep.subr.bf16.mxu1 %v2308_v38 }
 0x357   :  { %v294_v55 = vpop.f32.mrb[0].mxu1 }
 0x358   :  { %v295_v56 = vadd.f32 %v294_v55, %v150_v53  ;;  %v296_v57 = vpop.f32.mrb[1].mxu1 }
 0x359   :  { %v297_v58 = vadd.f32 %v2385_v54, %v296_v57  ;;  %v298_v59 = vpop.f32.mrb[2].mxu1 }
 0x35a   :  { %v1755_v60 = vmul.f32 -1.442695, %v295_v56  ;;  %v299_v61 = vpop.f32.mrb[3].mxu1 }
 0x35b   :  { %v1756_v62 = vmul.f32 -1.442695, %v297_v58 }
 0x35c   :  { %2061 = vpow2.f32 %v1755_v60 }
 0x35d   :  { %2063 = vpow2.f32 %v1756_v62 }
 0x366   :  { %v2062_v63 = vpop.eup %2061 }
 0x367   :  { %v2064_v0 = vpop.eup %2063  ;;  %v307_v1 = vadd.f32 1.0, %v2062_v63 }
 0x368   :  { %v308_v2 = vadd.f32 1.0, %v2064_v0 }
 0x369   :  { %2065 = vrcp.f32 %v307_v1 }
 0x36a   :  { %2067 = vrcp.f32 %v308_v2 }
 0x373   :  { %v2066_v3 = vpop.eup %2065 }
 0x374   :  { %v2068_v4 = vpop.eup %2067  ;;  %v313_v5 = vmul.f32 2.0, %v2066_v3  ;;  %v321_v14 = vmul.f32 %v2066_v3, %v319_v13  ;;  %v43_v13 = vld [vmem:[%s2764_s0 + $0x20] sm:$0xff] }
 0x375   :  { %v315_v7 = vmul.f32 2.0, %v2068_v4  ;;  %v332_v18 = vmul.f32 0.0, %v2068_v4  ;;  %1920 = vmatprep.mubr.f32.mxu0 %v43_v13 }
 0x376   :  { %v1757_v6 = vadd.f32 -1.0, %v313_v5 }
 0x377   :  { %v1758_v8 = vadd.f32 -1.0, %v315_v7 }
 0x378   :  { %323 = vrot.lane.b32.xlu1 %v1757_v6, %s2177_s1 }
 0x37c   :  { %334 = vrot.lane.b32.xlu1 %v1758_v8, %s2177_s1 }
 0x3ea   :  { %v324_v9 = vpop.permute.xlu1 %323 }
 0x3eb   :  { %v326_v10 = vmul.f32 %v2066_v3, %v324_v9 }
 0x3ed   :  { %328 = vrot.lane.b32.xlu0 %v326_v10, %s2179_s12 }
 0x3ee   :  { %v335_v11 = vpop.permute.xlu1 %334 }
 0x3ef   :  { %v337_v12 = vmul.f32 %v2068_v4, %v335_v11 }
 0x3f1   :  { %339 = vrot.lane.b32.xlu1 %v337_v12, %s2179_s12 }
 0x45f   :  { %v329_v15 = vpop.permute.xlu0 %328 }
 0x460   :  { %v2392_v16 = vadd.f32 %v329_v15, %v321_v14  ;;  %v44_v14 = vld [vmem:[%s2764_s0 + $0x28] sm:$0xff]  ;;  %v45_v15 = vld [vmem:[%s2764_s0 + $0x30] sm:$0xff] }
 0x461   :  { %1921 = vmatmul.mubr.f32.gmra.mrb[4].mxu0 %v44_v14 }
 0x462   :  { %344 = vrot.lane.b32.xlu0 %v2392_v16, %s2178_s30  ;;  %1923 = vmatprep.mubr.f32.mxu0 %v45_v15 }
 0x463   :  { %v340_v17 = vpop.permute.xlu1 %339 }
 0x464   :  { %v2396_v19 = vadd.f32 %v340_v17, %v332_v18 }
 0x4d4   :  { %v345_v20 = vpop.permute.xlu0 %344 }
 0x4d5   :  { %v347_v21 = vsel %vm213_vm0, %v345_v20, %v2396_v19 }
 0x4d6   :  { %2069 = vtanh.f32 %v347_v21 }
 0x4e0   :  { %v2070_v24 = vpop.eup %2069 }
 0x4e1   :  { %354 = vrot.lane.b32.xlu0 %v2070_v24, %s2177_s1  ;;  %350 = vrot.lane.b32.xlu1 %v2070_v24, %s2178_s30 }
 0x534   :  { %v2462_v22 = vpop.f32.mrb[4].mxu0 }
 0x535   :  { %v2464_v23 = vpop.f32.mrb[5].mxu0 }
 0x553   :  { %v355_v25 = vpop.permute.xlu0 %354  ;;  %v351_v27 = vpop.permute.xlu1 %350 }
 0x554   :  { %v2408_v28 = vmul.f32 %v2068_v4, %v355_v25  ;;  %v353_v29 = vmul.f32 %v2066_v3, %v351_v27 }
 0x556   :  { %363 = vrot.lane.b32.xlu0 %v2408_v28, %s2177_s1  ;;  %359 = vrot.lane.b32.xlu1 %v353_v29, %s2179_s12 }
 0x5c8   :  { %v364_v32 = vpop.permute.xlu0 %363  ;;  %v360_v33 = vpop.permute.xlu1 %359 }
 0x5c9   :  { %v366_v34 = vsel %vm213_vm0, %v360_v33, %v364_v32  ;;  %v160_v33 = vadd.f32 %v2413_v30, %v2299_v26 }
 0x5ca   :  { %v367_v35 = vpack.c.bf16 %v366_v34, %v366_v34 }
 0x5cc   :  { %1759 = vmatmul.mubr.msk.bf16.vlgmr.msra.gmra.mrb[4].mxu1 %vm256_vm1, %v367_v35 }
 0x5cd   :  { %586 = vmatpush1.bf16.msra.mxu1 %v2313_v39  ;;  %617 = vmatprep.mubr.bf16.mxu1 %v2180_v47 }
 0x5ce   :  { %587 = vmatprep.subr.bf16.mxu1 %v2319_v40 }
 0x5d1   :  { %588 = vmatpush1.bf16.msra.mxu1 %v2326_v41 }
 0x5d2   :  { %589 = vmatprep.subr.bf16.mxu1 %v2333_v42 }
 0x5d5   :  { %590 = vmatpush1.bf16.msra.mxu1 %v2340_v43 }
 0x5d6   :  { %591 = vmatprep.subr.bf16.mxu1 %v2347_v45 }
 0x5d9   :  { %592 = vmatpush1.bf16.msra.mxu1 %v2359_v46 }
 0x5da   :  { %799 = vmatprep.subr.bf16.mxu1 %v2308_v38 }
 0x69f   :  { %v405_v37 = vpop.f32.mrb[4].mxu1 }
 0x6a0   :  { %v406_v44 = vadd.f32 %v405_v37, %v155_v36  ;;  %v407_v48 = vpop.f32.mrb[5].mxu1 }
 0x6a1   :  { %v408_v49 = vadd.f32 %v2385_v54, %v407_v48  ;;  %v409_v50 = vpop.f32.mrb[6].mxu1 }
 0x6a2   :  { %v1760_v51 = vmul.f32 -1.442695, %v406_v44  ;;  %v410_v52 = vpop.f32.mrb[7].mxu1 }
 0x6a3   :  { %v1761_v53 = vmul.f32 -1.442695, %v408_v49 }
 0x6a4   :  { %2071 = vpow2.f32 %v1760_v51 }
 0x6a5   :  { %2073 = vpow2.f32 %v1761_v53 }
 0x6ae   :  { %v2072_v55 = vpop.eup %2071 }
 0x6af   :  { %v2074_v56 = vpop.eup %2073  ;;  %v418_v57 = vadd.f32 1.0, %v2072_v55 }
 0x6b0   :  { %v419_v58 = vadd.f32 1.0, %v2074_v56 }
 0x6b1   :  { %2075 = vrcp.f32 %v418_v57 }
 0x6b2   :  { %2077 = vrcp.f32 %v419_v58 }
 0x6bb   :  { %v2076_v59 = vpop.eup %2075 }
 0x6bc   :  { %v2078_v60 = vpop.eup %2077  ;;  %v424_v61 = vmul.f32 2.0, %v2076_v59  ;;  %v428_v5 = vmul.f32 %v2076_v59, %v2392_v16  ;;  %v46_v16 = vld [vmem:[%s2764_s0 + $0x38] sm:$0xff] }
 0x6bd   :  { %v426_v62 = vmul.f32 2.0, %v2078_v60  ;;  %v439_v9 = vmul.f32 %v2078_v60, %v2396_v19  ;;  %1924 = vmatmul.mubr.f32.gmra.mrb[6].mxu0 %v46_v16 }
 0x6be   :  { %v1762_v63 = vadd.f32 -1.0, %v424_v61  ;;  %510 = vmatprep.mubr.bf16.mxu0 %v2180_v47 }
 0x6bf   :  { %v1763_v0 = vadd.f32 -1.0, %v426_v62 }
 0x6c0   :  { %430 = vrot.lane.b32.xlu1 %v1762_v63, %s2177_s1 }
 0x6c1   :  { %441 = vrot.lane.b32.xlu0 %v1763_v0, %s2177_s1 }
 0x732   :  { %v431_v1 = vpop.permute.xlu1 %430 }
 0x733   :  { %v433_v2 = vmul.f32 %v2076_v59, %v431_v1  ;;  %v442_v3 = vpop.permute.xlu0 %441 }
 0x734   :  { %v444_v4 = vmul.f32 %v2078_v60, %v442_v3 }
 0x735   :  { %435 = vrot.lane.b32.xlu1 %v433_v2, %s2179_s12 }
 0x736   :  { %446 = vrot.lane.b32.xlu0 %v444_v4, %s2179_s12 }
 0x790   :  { %v2466_v24 = vpop.f32.mrb[6].mxu0 }
 0x791   :  { %v2468_v25 = vpop.f32.mrb[7].mxu0 }
 0x7a7   :  { %v436_v6 = vpop.permute.xlu1 %435 }
 0x7a8   :  { %v2433_v7 = vadd.f32 %v436_v6, %v428_v5  ;;  %v447_v8 = vpop.permute.xlu0 %446 }
 0x7a9   :  { %v2438_v10 = vadd.f32 %v447_v8, %v439_v9 }
 0x7aa   :  { %451 = vrot.lane.b32.xlu1 %v2433_v7, %s2178_s30 }
 0x81c   :  { %v452_v11 = vpop.permute.xlu1 %451 }
 0x81d   :  { %v454_v12 = vsel %vm213_vm0, %v452_v11, %v2438_v10 }
 0x81e   :  { %2079 = vtanh.f32 %v454_v12 }
 0x828   :  { %v2080_v17 = vpop.eup %2079 }
 0x829   :  { %461 = vrot.lane.b32.xlu1 %v2080_v17, %s2177_s1  ;;  %457 = vrot.lane.b32.xlu0 %v2080_v17, %s2178_s30 }
 0x89b   :  { %v462_v18 = vpop.permute.xlu1 %461  ;;  %v458_v19 = vpop.permute.xlu0 %457 }
 0x89c   :  { %v2457_v20 = vmul.f32 %v2078_v60, %v462_v18  ;;  %v460_v21 = vmul.f32 %v2076_v59, %v458_v19  ;;  %v165_v18 = vadd.f32 %v2299_v26, %v2464_v23 }
 0x89e   :  { %470 = vrot.lane.b32.xlu1 %v2457_v20, %s2177_s1  ;;  %466 = vrot.lane.b32.xlu0 %v460_v21, %s2179_s12 }
 0x910   :  { %v471_v27 = vpop.permute.xlu1 %470  ;;  %v467_v29 = vpop.permute.xlu0 %466 }
 0x911   :  { %v473_v31 = vsel %vm213_vm0, %v467_v29, %v471_v27 }
 0x912   :  { %v474_v32 = vpack.c.bf16 %v473_v31, %v473_v31 }
 0x914   :  { %1764 = vmatmul.mubr.msk.bf16.vlgmr.msra.gmra.mrb[8].mxu0 %vm256_vm1, %v474_v32 }
 0x915   :  { %693 = vmatpush1.bf16.msra.mxu0 %v2313_v39  ;;  %724 = vmatprep.mubr.bf16.mxu0 %v2180_v47 }
 0x916   :  { %694 = vmatprep.subr.bf16.mxu0 %v2319_v40 }
 0x919   :  { %695 = vmatpush1.bf16.msra.mxu0 %v2326_v41 }
 0x91a   :  { %696 = vmatprep.subr.bf16.mxu0 %v2333_v42 }
 0x91d   :  { %697 = vmatpush1.bf16.msra.mxu0 %v2340_v43 }
 0x91e   :  { %698 = vmatprep.subr.bf16.mxu0 %v2347_v45 }
 0x921   :  { %699 = vmatpush1.bf16.msra.mxu0 %v2359_v46 }
 0x922   :  { %906 = vmatprep.subr.bf16.mxu0 %v2308_v38 }
 0x9e7   :  { %v512_v34 = vpop.f32.mrb[8].mxu0 }
 0x9e8   :  { %v513_v35 = vadd.f32 %v512_v34, %v160_v33  ;;  %v514_v36 = vpop.f32.mrb[9].mxu0 }
 0x9e9   :  { %v515_v37 = vadd.f32 %v2385_v54, %v514_v36  ;;  %v516_v44 = vpop.f32.mrb[10].mxu0 }
 0x9ea   :  { %v1765_v48 = vmul.f32 -1.442695, %v513_v35  ;;  %v517_v49 = vpop.f32.mrb[11].mxu0 }
 0x9eb   :  { %v1766_v50 = vmul.f32 -1.442695, %v515_v37 }
 0x9ec   :  { %2081 = vpow2.f32 %v1765_v48 }
 0x9ed   :  { %2083 = vpow2.f32 %v1766_v50 }
 0x9f6   :  { %v2082_v51 = vpop.eup %2081 }
 0x9f7   :  { %v2084_v52 = vpop.eup %2083  ;;  %v525_v53 = vadd.f32 1.0, %v2082_v51 }
 0x9f8   :  { %v526_v55 = vadd.f32 1.0, %v2084_v52 }
 0x9f9   :  { %2085 = vrcp.f32 %v525_v53 }
 0x9fa   :  { %2087 = vrcp.f32 %v526_v55 }
 0xa03   :  { %v2086_v56 = vpop.eup %2085 }
 0xa04   :  { %v2088_v57 = vpop.eup %2087  ;;  %v531_v30 = vmul.f32 2.0, %v2086_v56  ;;  %v535_v1 = vmul.f32 %v2086_v56, %v2433_v7 }
 0xa05   :  { %v533_v58 = vmul.f32 2.0, %v2088_v57  ;;  %v546_v5 = vmul.f32 %v2088_v57, %v2438_v10 }
 0xa06   :  { %v1767_v59 = vadd.f32 -1.0, %v531_v30 }
 0xa07   :  { %v1768_v60 = vadd.f32 -1.0, %v533_v58 }
 0xa08   :  { %537 = vrot.lane.b32.xlu0 %v1767_v59, %s2177_s1 }
 0xa09   :  { %548 = vrot.lane.b32.xlu1 %v1768_v60, %s2177_s1 }
 0xa7a   :  { %v538_v61 = vpop.permute.xlu0 %537 }
 0xa7b   :  { %v540_v62 = vmul.f32 %v2086_v56, %v538_v61  ;;  %v549_v63 = vpop.permute.xlu1 %548 }
 0xa7c   :  { %v551_v0 = vmul.f32 %v2088_v57, %v549_v63 }
 0xa7d   :  { %542 = vrot.lane.b32.xlu0 %v540_v62, %s2179_s12 }
 0xa7e   :  { %553 = vrot.lane.b32.xlu1 %v551_v0, %s2179_s12 }
 0xaef   :  { %v543_v2 = vpop.permute.xlu0 %542 }
 0xaf0   :  { %v545_v3 = vadd.f32 %v543_v2, %v535_v1  ;;  %v554_v4 = vpop.permute.xlu1 %553 }
 0xaf1   :  { %v2491_v6 = vadd.f32 %v554_v4, %v546_v5 }
 0xaf2   :  { %558 = vrot.lane.b32.xlu0 %v545_v3, %s2178_s30 }
 0xb64   :  { %v559_v8 = vpop.permute.xlu0 %558 }
 0xb65   :  { %v561_v9 = vsel %vm213_vm0, %v559_v8, %v2491_v6 }
 0xb66   :  { %2089 = vtanh.f32 %v561_v9 }
 0xb70   :  { %v2090_v11 = vpop.eup %2089 }
 0xb71   :  { %568 = vrot.lane.b32.xlu0 %v2090_v11, %s2177_s1  ;;  %564 = vrot.lane.b32.xlu1 %v2090_v11, %s2178_s30  ;;  %v170_v11 = vadd.f32 %v2462_v22, %v2299_v26 }
 0xbe3   :  { %v569_v7 = vpop.permute.xlu0 %568  ;;  %v565_v12 = vpop.permute.xlu1 %564 }
 0xbe4   :  { %v2497_v13 = vmul.f32 %v2088_v57, %v569_v7  ;;  %v567_v14 = vmul.f32 %v2086_v56, %v565_v12 }
 0xbe6   :  { %577 = vrot.lane.b32.xlu0 %v2497_v13, %s2177_s1  ;;  %573 = vrot.lane.b32.xlu1 %v567_v14, %s2179_s12 }
 0xc58   :  { %v578_v10 = vpop.permute.xlu0 %577  ;;  %v574_v15 = vpop.permute.xlu1 %573 }
 0xc59   :  { %v580_v16 = vsel %vm213_vm0, %v574_v15, %v578_v10 }
 0xc5a   :  { %v581_v17 = vpack.c.bf16 %v580_v16, %v580_v16 }
 0xc5c   :  { %1769 = vmatmul.mubr.msk.bf16.vlgmr.msra.gmra.mrb[8].mxu1 %vm256_vm1, %v581_v17 }
 0xc5d   :  { %800 = vmatpush1.bf16.msra.mxu1 %v2313_v39  ;;  %831 = vmatprep.mubr.bf16.mxu1 %v2180_v47 }
 0xc5e   :  { %801 = vmatprep.subr.bf16.mxu1 %v2319_v40 }
 0xc61   :  { %802 = vmatpush1.bf16.msra.mxu1 %v2326_v41 }
 0xc62   :  { %803 = vmatprep.subr.bf16.mxu1 %v2333_v42 }
 0xc65   :  { %804 = vmatpush1.bf16.msra.mxu1 %v2340_v43 }
 0xc66   :  { %805 = vmatprep.subr.bf16.mxu1 %v2347_v45 }
 0xc69   :  { %806 = vmatpush1.bf16.msra.mxu1 %v2359_v46 }
 0xc6a   :  { %1013 = vmatprep.subr.bf16.mxu1 %v2308_v38 }
 0xd2f   :  { %v619_v19 = vpop.f32.mrb[8].mxu1 }
 0xd30   :  { %v620_v21 = vadd.f32 %v619_v19, %v165_v18  ;;  %v621_v27 = vpop.f32.mrb[9].mxu1 }
 0xd31   :  { %v622_v29 = vadd.f32 %v2385_v54, %v621_v27  ;;  %v623_v31 = vpop.f32.mrb[10].mxu1 }
 0xd32   :  { %v1770_v32 = vmul.f32 -1.442695, %v620_v21  ;;  %v624_v33 = vpop.f32.mrb[11].mxu1 }
 0xd33   :  { %v1771_v34 = vmul.f32 -1.442695, %v622_v29 }
 0xd34   :  { %2091 = vpow2.f32 %v1770_v32 }
 0xd35   :  { %2093 = vpow2.f32 %v1771_v34 }
 0xd3e   :  { %v2092_v35 = vpop.eup %2091 }
 0xd3f   :  { %v2094_v36 = vpop.eup %2093  ;;  %v632_v37 = vadd.f32 1.0, %v2092_v35 }
 0xd40   :  { %v633_v44 = vadd.f32 1.0, %v2094_v36 }
 0xd41   :  { %2095 = vrcp.f32 %v632_v37 }
 0xd42   :  { %2097 = vrcp.f32 %v633_v44 }
 0xd4b   :  { %v2096_v38 = vpop.eup %2095 }
 0xd4c   :  { %v2098_v48 = vpop.eup %2097  ;;  %v638_v23 = vmul.f32 2.0, %v2096_v38  ;;  %v642_v57 = vmul.f32 %v2096_v38, %v545_v3 }
 0xd4d   :  { %v640_v49 = vmul.f32 2.0, %v2098_v48  ;;  %v653_v60 = vmul.f32 %v2098_v48, %v2491_v6 }
 0xd4e   :  { %v1772_v50 = vadd.f32 -1.0, %v638_v23 }
 0xd4f   :  { %v1773_v51 = vadd.f32 -1.0, %v640_v49 }
 0xd50   :  { %644 = vrot.lane.b32.xlu1 %v1772_v50, %s2177_s1 }
 0xd51   :  { %655 = vrot.lane.b32.xlu0 %v1773_v51, %s2177_s1 }
 0xdc2   :  { %v645_v52 = vpop.permute.xlu1 %644 }
 0xdc3   :  { %v647_v53 = vmul.f32 %v2096_v38, %v645_v52  ;;  %v656_v55 = vpop.permute.xlu0 %655 }
 0xdc4   :  { %v658_v56 = vmul.f32 %v2098_v48, %v656_v55 }
 0xdc5   :  { %649 = vrot.lane.b32.xlu1 %v647_v53, %s2179_s12 }
 0xdc6   :  { %660 = vrot.lane.b32.xlu0 %v658_v56, %s2179_s12 }
 0xe37   :  { %v650_v30 = vpop.permute.xlu1 %649 }
 0xe38   :  { %v652_v58 = vadd.f32 %v650_v30, %v642_v57  ;;  %v661_v59 = vpop.permute.xlu0 %660 }
 0xe39   :  { %v663_v61 = vadd.f32 %v661_v59, %v653_v60 }
 0xe3a   :  { %665 = vrot.lane.b32.xlu1 %v652_v58, %s2178_s30 }
 0xeac   :  { %v666_v62 = vpop.permute.xlu1 %665 }
 0xead   :  { %v668_v63 = vsel %vm213_vm0, %v666_v62, %v663_v61 }
 0xeae   :  { %2099 = vtanh.f32 %v668_v63 }
 0xeb8   :  { %v2100_v0 = vpop.eup %2099 }
 0xeb9   :  { %675 = vrot.lane.b32.xlu1 %v2100_v0, %s2177_s1  ;;  %671 = vrot.lane.b32.xlu0 %v2100_v0, %s2178_s30  ;;  %v175_v0 = vadd.f32 %v2299_v26, %v2468_v25 }
 0xf2b   :  { %v676_v1 = vpop.permute.xlu1 %675  ;;  %v672_v2 = vpop.permute.xlu0 %671 }
 0xf2c   :  { %v2525_v3 = vmul.f32 %v2098_v48, %v676_v1  ;;  %v674_v4 = vmul.f32 %v2096_v38, %v672_v2 }
 0xf2e   :  { %684 = vrot.lane.b32.xlu1 %v2525_v3, %s2177_s1  ;;  %680 = vrot.lane.b32.xlu0 %v674_v4, %s2179_s12 }
 0xfa0   :  { %v685_v5 = vpop.permute.xlu1 %684  ;;  %v681_v6 = vpop.permute.xlu0 %680 }
 0xfa1   :  { %v687_v8 = vsel %vm213_vm0, %v681_v6, %v685_v5 }
 0xfa2   :  { %v688_v9 = vpack.c.bf16 %v687_v8, %v687_v8 }
 0xfa4   :  { %1774 = vmatmul.mubr.msk.bf16.vlgmr.msra.gmra.mrb[12].mxu0 %vm256_vm1, %v688_v9 }
 0xfa5   :  { %907 = vmatpush1.bf16.msra.mxu0 %v2313_v39  ;;  %938 = vmatprep.mubr.bf16.mxu0 %v2180_v47 }
 0xfa6   :  { %908 = vmatprep.subr.bf16.mxu0 %v2319_v40 }
 0xfa9   :  { %909 = vmatpush1.bf16.msra.mxu0 %v2326_v41 }
 0xfaa   :  { %910 = vmatprep.subr.bf16.mxu0 %v2333_v42 }
 0xfad   :  { %911 = vmatpush1.bf16.msra.mxu0 %v2340_v43 }
 0xfae   :  { %912 = vmatprep.subr.bf16.mxu0 %v2347_v45 }
 0xfb1   :  { %913 = vmatpush1.bf16.msra.mxu0 %v2359_v46 }
0x1077   :  { %v726_v7 = vpop.f32.mrb[12].mxu0 }
0x1078   :  { %v727_v12 = vadd.f32 %v726_v7, %v170_v11  ;;  %v728_v14 = vpop.f32.mrb[13].mxu0 }
0x1079   :  { %v729_v10 = vadd.f32 %v2385_v54, %v728_v14  ;;  %v730_v15 = vpop.f32.mrb[14].mxu0 }
0x107a   :  { %v1775_v16 = vmul.f32 -1.442695, %v727_v12  ;;  %v731_v17 = vpop.f32.mrb[15].mxu0 }
0x107b   :  { %v1776_v18 = vmul.f32 -1.442695, %v729_v10 }
0x107c   :  { %2101 = vpow2.f32 %v1775_v16 }
0x107d   :  { %2103 = vpow2.f32 %v1776_v18 }
0x1086   :  { %v2102_v19 = vpop.eup %2101 }
0x1087   :  { %v2104_v21 = vpop.eup %2103  ;;  %v739_v27 = vadd.f32 1.0, %v2102_v19 }
0x1088   :  { %v740_v29 = vadd.f32 1.0, %v2104_v21 }
0x1089   :  { %2105 = vrcp.f32 %v739_v27 }
0x108a   :  { %2107 = vrcp.f32 %v740_v29 }
0x1093   :  { %v2106_v31 = vpop.eup %2105 }
0x1094   :  { %v2108_v32 = vpop.eup %2107  ;;  %v745_v22 = vmul.f32 2.0, %v2106_v31  ;;  %v749_v48 = vmul.f32 %v2106_v31, %v652_v58 }
0x1095   :  { %v747_v33 = vmul.f32 2.0, %v2108_v32  ;;  %v760_v51 = vmul.f32 %v2108_v32, %v663_v61 }
0x1096   :  { %v1777_v34 = vadd.f32 -1.0, %v745_v22 }
0x1097   :  { %v1778_v35 = vadd.f32 -1.0, %v747_v33 }
0x1098   :  { %751 = vrot.lane.b32.xlu0 %v1777_v34, %s2177_s1 }
0x1099   :  { %762 = vrot.lane.b32.xlu1 %v1778_v35, %s2177_s1 }
0x110a   :  { %v752_v36 = vpop.permute.xlu0 %751 }
0x110b   :  { %v754_v37 = vmul.f32 %v2106_v31, %v752_v36  ;;  %v763_v44 = vpop.permute.xlu1 %762 }
0x110c   :  { %v765_v38 = vmul.f32 %v2108_v32, %v763_v44 }
0x110d   :  { %756 = vrot.lane.b32.xlu0 %v754_v37, %s2179_s12 }
0x110e   :  { %767 = vrot.lane.b32.xlu1 %v765_v38, %s2179_s12 }
0x117f   :  { %v757_v23 = vpop.permute.xlu0 %756 }
0x1180   :  { %v759_v49 = vadd.f32 %v757_v23, %v749_v48  ;;  %v768_v50 = vpop.permute.xlu1 %767  ;;  %v180_v23 = vadd.f32 %v2466_v24, %v2299_v26 }
0x1181   :  { %v770_v52 = vadd.f32 %v768_v50, %v760_v51 }
0x1182   :  { %772 = vrot.lane.b32.xlu0 %v759_v49, %s2178_s30 }
0x11f4   :  { %v773_v53 = vpop.permute.xlu0 %772 }
0x11f5   :  { %v775_v55 = vsel %vm213_vm0, %v773_v53, %v770_v52 }
0x11f6   :  { %2109 = vtanh.f32 %v775_v55 }
0x1200   :  { %v2110_v56 = vpop.eup %2109 }
0x1201   :  { %782 = vrot.lane.b32.xlu0 %v2110_v56, %s2177_s1  ;;  %778 = vrot.lane.b32.xlu1 %v2110_v56, %s2178_s30 }
0x1273   :  { %v783_v57 = vpop.permute.xlu0 %782  ;;  %v779_v30 = vpop.permute.xlu1 %778 }
0x1274   :  { %v2551_v59 = vmul.f32 %v2108_v32, %v783_v57  ;;  %v781_v58 = vmul.f32 %v2106_v31, %v779_v30 }
0x1276   :  { %791 = vrot.lane.b32.xlu0 %v2551_v59, %s2177_s1  ;;  %787 = vrot.lane.b32.xlu1 %v781_v58, %s2179_s12 }
0x12e8   :  { %v792_v60 = vpop.permute.xlu0 %791  ;;  %v788_v61 = vpop.permute.xlu1 %787 }
0x12e9   :  { %v794_v62 = vsel %vm213_vm0, %v788_v61, %v792_v60 }
0x12ea   :  { %v795_v63 = vpack.c.bf16 %v794_v62, %v794_v62 }
0x12ec   :  { %1779 = vmatmul.mubr.msk.bf16.vlgmr.msra.gmra.mrb[12].mxu1 %vm256_vm1, %v795_v63 }
0x12ed   :  { %1014 = vmatpush1.bf16.msra.mxu1 %v2313_v39  ;;  %1045 = vmatprep.mubr.bf16.mxu1 %v2180_v47 }
0x12ee   :  { %1015 = vmatprep.subr.bf16.mxu1 %v2319_v40 }
0x12f1   :  { %1016 = vmatpush1.bf16.msra.mxu1 %v2326_v41 }
0x12f2   :  { %1017 = vmatprep.subr.bf16.mxu1 %v2333_v42 }
0x12f5   :  { %1018 = vmatpush1.bf16.msra.mxu1 %v2340_v43 }
0x12f6   :  { %1019 = vmatprep.subr.bf16.mxu1 %v2347_v45 }
0x12f9   :  { %1020 = vmatpush1.bf16.msra.mxu1 %v2359_v46 }
0x13bf   :  { %v833_v1 = vpop.f32.mrb[12].mxu1 }
0x13c0   :  { %v834_v2 = vadd.f32 %v833_v1, %v175_v0  ;;  %v835_v39 = vpop.f32.mrb[13].mxu1 }
0x13c1   :  { %v836_v4 = vadd.f32 %v2385_v54, %v835_v39  ;;  %v837_v5 = vpop.f32.mrb[14].mxu1 }
0x13c2   :  { %v1780_v40 = vmul.f32 -1.442695, %v834_v2  ;;  %v838_v6 = vpop.f32.mrb[15].mxu1 }
0x13c3   :  { %v1781_v41 = vmul.f32 -1.442695, %v836_v4 }
0x13c4   :  { %2111 = vpow2.f32 %v1780_v40 }
0x13c5   :  { %2113 = vpow2.f32 %v1781_v41 }
0x13ce   :  { %v2112_v42 = vpop.eup %2111 }
0x13cf   :  { %v2114_v43 = vpop.eup %2113  ;;  %v846_v8 = vadd.f32 1.0, %v2112_v42 }
0x13d0   :  { %v847_v45 = vadd.f32 1.0, %v2114_v43 }
0x13d1   :  { %2115 = vrcp.f32 %v846_v8 }
0x13d2   :  { %2117 = vrcp.f32 %v847_v45 }
0x13db   :  { %v2116_v46 = vpop.eup %2115 }
0x13dc   :  { %v2118_v9 = vpop.eup %2117  ;;  %v852_v25 = vmul.f32 2.0, %v2116_v46  ;;  %v856_v17 = vmul.f32 %v2116_v46, %v759_v49 }
0x13dd   :  { %v854_v11 = vmul.f32 2.0, %v2118_v9  ;;  %v867_v27 = vmul.f32 %v2118_v9, %v770_v52 }
0x13de   :  { %v1782_v7 = vadd.f32 -1.0, %v852_v25 }
0x13df   :  { %v1783_v12 = vadd.f32 -1.0, %v854_v11 }
0x13e0   :  { %858 = vrot.lane.b32.xlu1 %v1782_v7, %s2177_s1 }
0x13e1   :  { %869 = vrot.lane.b32.xlu0 %v1783_v12, %s2177_s1 }
0x1452   :  { %v859_v14 = vpop.permute.xlu1 %858 }
0x1453   :  { %v861_v10 = vmul.f32 %v2116_v46, %v859_v14  ;;  %v870_v15 = vpop.permute.xlu0 %869 }
0x1454   :  { %v872_v16 = vmul.f32 %v2118_v9, %v870_v15 }
0x1455   :  { %863 = vrot.lane.b32.xlu1 %v861_v10, %s2179_s12 }
0x1456   :  { %874 = vrot.lane.b32.xlu0 %v872_v16, %s2179_s12 }
0x14c7   :  { %v864_v18 = vpop.permute.xlu1 %863 }
0x14c8   :  { %v866_v19 = vadd.f32 %v864_v18, %v856_v17  ;;  %v875_v21 = vpop.permute.xlu0 %874 }
0x14c9   :  { %v877_v29 = vadd.f32 %v875_v21, %v867_v27 }
0x14ca   :  { %879 = vrot.lane.b32.xlu1 %v866_v19, %s2178_s30 }
0x153c   :  { %v880_v31 = vpop.permute.xlu1 %879 }
0x153d   :  { %v882_v32 = vsel %vm213_vm0, %v880_v31, %v877_v29 }
0x153e   :  { %2119 = vtanh.f32 %v882_v32 }
0x1548   :  { %v2120_v22 = vpop.eup %2119 }
0x1549   :  { %889 = vrot.lane.b32.xlu1 %v2120_v22, %s2177_s1  ;;  %885 = vrot.lane.b32.xlu0 %v2120_v22, %s2178_s30 }
0x15bb   :  { %v890_v33 = vpop.permute.xlu1 %889  ;;  %v886_v34 = vpop.permute.xlu0 %885 }
0x15bc   :  { %v2577_v35 = vmul.f32 %v2118_v9, %v890_v33  ;;  %v888_v36 = vmul.f32 %v2116_v46, %v886_v34 }
0x15be   :  { %898 = vrot.lane.b32.xlu1 %v2577_v35, %s2177_s1  ;;  %894 = vrot.lane.b32.xlu0 %v888_v36, %s2179_s12 }
0x1630   :  { %v899_v37 = vpop.permute.xlu1 %898  ;;  %v895_v44 = vpop.permute.xlu0 %894 }
0x1631   :  { %v901_v38 = vsel %vm213_vm0, %v895_v44, %v899_v37  ;;  %v1080_v44 = vld [vmem:[%s2768_s5 + $0x8] sm:$0xff] }
0x1632   :  { %v902_v48 = vpack.c.bf16 %v901_v38, %v901_v38 }
0x1634   :  { %1784 = vmatmul.mubr.msk.bf16.vlgmr.msra.gmra.mrb[16].mxu0 %vm256_vm1, %v902_v48 }
0x1707   :  { %v940_v49 = vpop.f32.mrb[16].mxu0 }
0x1708   :  { %v941_v50 = vadd.f32 %v940_v49, %v180_v23  ;;  %v942_v51 = vpop.f32.mrb[17].mxu0 }
0x1709   :  { %v943_v52 = vadd.f32 %v2385_v54, %v942_v51  ;;  %v944_v53 = vpop.f32.mrb[18].mxu0 }
0x170a   :  { %v1785_v55 = vmul.f32 -1.442695, %v941_v50  ;;  %v945_v56 = vpop.f32.mrb[19].mxu0 }
0x170b   :  { %v1786_v57 = vmul.f32 -1.442695, %v943_v52 }
0x170c   :  { %2121 = vpow2.f32 %v1785_v55 }
0x170d   :  { %2123 = vpow2.f32 %v1786_v57 }
0x1716   :  { %v2122_v30 = vpop.eup %2121 }
0x1717   :  { %v2124_v58 = vpop.eup %2123  ;;  %v953_v60 = vadd.f32 1.0, %v2122_v30 }
0x1718   :  { %v954_v61 = vadd.f32 1.0, %v2124_v58 }
0x1719   :  { %2125 = vrcp.f32 %v953_v60 }
0x171a   :  { %2127 = vrcp.f32 %v954_v61 }
0x1723   :  { %v2126_v62 = vpop.eup %2125 }
0x1724   :  { %v2128_v63 = vpop.eup %2127  ;;  %v959_v26 = vmul.f32 2.0, %v2126_v62  ;;  %v963_v40 = vmul.f32 %v2126_v62, %v866_v19 }
0x1725   :  { %v961_v24 = vmul.f32 2.0, %v2128_v63  ;;  %v974_v43 = vmul.f32 %v2128_v63, %v877_v29 }
0x1726   :  { %v1787_v0 = vadd.f32 -1.0, %v959_v26 }
0x1727   :  { %v1788_v1 = vadd.f32 -1.0, %v961_v24 }
0x1728   :  { %965 = vrot.lane.b32.xlu0 %v1787_v0, %s2177_s1 }
0x1729   :  { %976 = vrot.lane.b32.xlu1 %v1788_v1, %s2177_s1 }
0x179a   :  { %v966_v2 = vpop.permute.xlu0 %965 }
0x179b   :  { %v968_v39 = vmul.f32 %v2126_v62, %v966_v2  ;;  %v977_v4 = vpop.permute.xlu1 %976 }
0x179c   :  { %v979_v5 = vmul.f32 %v2128_v63, %v977_v4 }
0x179d   :  { %970 = vrot.lane.b32.xlu0 %v968_v39, %s2179_s12 }
0x179e   :  { %981 = vrot.lane.b32.xlu1 %v979_v5, %s2179_s12 }
0x180f   :  { %v971_v6 = vpop.permute.xlu0 %970 }
0x1810   :  { %v973_v41 = vadd.f32 %v971_v6, %v963_v40  ;;  %v982_v42 = vpop.permute.xlu1 %981 }
0x1811   :  { %v984_v8 = vadd.f32 %v982_v42, %v974_v43 }
0x1812   :  { %986 = vrot.lane.b32.xlu0 %v973_v41, %s2178_s30 }
0x1884   :  { %v987_v45 = vpop.permute.xlu0 %986 }
0x1885   :  { %v989_v46 = vsel %vm213_vm0, %v987_v45, %v984_v8 }
0x1886   :  { %2129 = vtanh.f32 %v989_v46 }
0x1890   :  { %v2130_v9 = vpop.eup %2129 }
0x1891   :  { %996 = vrot.lane.b32.xlu0 %v2130_v9, %s2177_s1  ;;  %992 = vrot.lane.b32.xlu1 %v2130_v9, %s2178_s30 }
0x1903   :  { %v997_v25 = vpop.permute.xlu0 %996  ;;  %v993_v11 = vpop.permute.xlu1 %992 }
0x1904   :  { %v999_v7 = vmul.f32 %v2128_v63, %v997_v25  ;;  %v995_v12 = vmul.f32 %v2126_v62, %v993_v11  ;;  %v1792_v62 = vld [vmem:[%s2770_s6] ss:$0 sm:$0xff] }
0x1906   :  { %1005 = vrot.lane.b32.xlu0 %v999_v7, %s2177_s1  ;;  %1001 = vrot.lane.b32.xlu1 %v995_v12, %s2179_s12 }
0x1978   :  { %v1006_v14 = vpop.permute.xlu0 %1005  ;;  %v1002_v10 = vpop.permute.xlu1 %1001 }
0x1979   :  { %v1008_v15 = vsel %vm213_vm0, %v1002_v10, %v1006_v14 }
0x197a   :  { %v1009_v16 = vpack.c.bf16 %v1008_v15, %v1008_v15  ;;  %v1415_v15 = vld [vmem:[%s2771_s9] sm:$0xff] }
0x197c   :  { %1789 = vmatmul.mubr.msk.bf16.vlgmr.msra.gmra.mrb[16].mxu1 %vm256_vm1, %v1009_v16 }
0x1a4f   :  { %v1047_v17 = vpop.f32.mrb[16].mxu1 }
0x1a50   :  { %v1048_v18 = vpop.f32.mrb[17].mxu1 }
0x1a51   :  { %v1053_v19 = vadd.f32 %v2385_v54, %v1048_v18  ;;  %v1050_v21 = vpop.f32.mrb[18].mxu1  ;;  %v1079_v54 = vld [vmem:[%s2768_s5] sm:$0xff] }
0x1a52   :  { %v1051_v27 = vpop.f32.mrb[19].mxu1  ;;  %v2008_v38 = vpack.c.bf16 %v1080_v44, %v1079_v54 }
0x1a53   :  { %v1790_v29 = vmul.f32 -1.442695, %v1053_v19 }
0x1a54   :  { %2009 = vmatprep.subr.bf16.mxu0 %v2008_v38  ;;  %2020 = vmatprep.subr.bf16.mxu1 %v2008_v38 }
0x1a55   :  { %2131 = vpow2.f32 %v1790_v29  ;;  %2011 = vmatpush3.bf16.msra.mxu0 %v2008_v38  ;;  %2022 = vmatpush3.bf16.msra.mxu1 %v2008_v38 }
0x1a5f   :  { %v2132_v31 = vpop.eup %2131 }
0x1a60   :  { %v1057_v32 = vadd.f32 1.0, %v2132_v31 }
0x1a62   :  { %2133 = vrcp.f32 %v1057_v32  ;;  %v1801_v32 = vld [vmem:[%s2772_s8] ss:$0 sm:$0xff] }
0x1a6c   :  { %v2134_v22 = vpop.eup %2133 }
0x1a6d   :  { %v1060_v33 = vmul.f32 2.0, %v2134_v22 }
0x1a6f   :  { %v1791_v34 = vadd.f32 -1.0, %v1060_v33 }
0x1a71   :  { %1064 = vrot.lane.b32.xlu1 %v1791_v34, %s2177_s1 }
0x1ae3   :  { %v1065_v36 = vpop.permute.xlu1 %1064 }
0x1ae4   :  { %v1067_v37 = vmul.f32 %v2134_v22, %v1065_v36 }
0x1ae6   :  { %1069 = vrot.lane.b32.xlu0 %v1067_v37, %s2179_s12 }
0x1aea   :  { %1091 = vrot.lane.b32.xlu0 %v2408_v28, %s2179_s12  ;;  %v1081_v28 = vld [vmem:[%s2768_s5 + $0x10] sm:$0xff] }
0x1aee   :  { %1095 = vrot.lane.b32.xlu0 %v2497_v13, %s2179_s12  ;;  %v1082_v13 = vld [vmem:[%s2768_s5 + $0x18] sm:$0xff] }
0x1aef   :  { %v2012_v48 = vpack.c.bf16 %v1082_v13, %v1081_v28 }
0x1af1   :  { %2013 = vmatprep.subr.bf16.mxu0 %v2012_v48  ;;  %2021 = vmatprep.subr.bf16.mxu1 %v2012_v48 }
0x1af2   :  { %1099 = vrot.lane.b32.xlu0 %v2551_v59, %s2179_s12  ;;  %v1062_v59 = vmul.f32 %v2134_v22, %v984_v8  ;;  %2015 = vmatpush3.bf16.msra.mxu0 %v2012_v48 }
0x1af3   :  { %2023 = vmatpush3.bf16.msra.mxu1 %v2012_v48  ;;  %1962 = vmatprep.subr.mxu0 %v1415_v15 }
0x1af6   :  { %1103 = vrot.lane.b32.xlu0 %v999_v7, %s2179_s12 }
0x1b58   :  { %v1070_v23 = vpop.permute.xlu0 %1069 }
0x1b59   :  { %v1072_v49 = vadd.f32 %v1070_v23, %v1062_v59 }
0x1b5b   :  { %2135 = vtanh.f32 %v1072_v49 }
0x1b5c   :  { %v1092_v50 = vpop.permute.xlu0 %1091 }
0x1b5d   :  { %1934 = vmatprep.mubr.msk.f32.mxu0 %vm213_vm0, %v1092_v50 }
0x1b60   :  { %v1096_v51 = vpop.permute.xlu0 %1095 }
0x1b64   :  { %v1100_v52 = vpop.permute.xlu0 %1099 }
0x1b65   :  { %v2136_v53 = vpop.eup %2135  ;;  %1940 = vmatprep.mubr.msk.f32.mxu1 %vm213_vm0, %v1100_v52 }
0x1b66   :  { %1075 = vrot.lane.b32.xlu1 %v2136_v53, %s2177_s1 }
0x1b6a   :  { %1093 = vrot.lane.b32.xlu1 %v2457_v20, %s2179_s12  ;;  %v1104_v20 = vpop.permute.xlu0 %1103 }
0x1b6e   :  { %1097 = vrot.lane.b32.xlu1 %v2525_v3, %s2179_s12  ;;  %v1252_v3 = vld [vmem:[%s2769_s7] sm:$0xff] }
0x1b72   :  { %1101 = vrot.lane.b32.xlu1 %v2577_v35, %s2179_s12  ;;  %v1253_v35 = vld [vmem:[%s2769_s7 + $0x8] sm:$0xff] }
0x1b73   :  { %v2016_v60 = vpack.c.bf16 %v1253_v35, %v1252_v3 }
0x1b75   :  { %2017 = vmatprep.subr.bf16.mxu1 %v2016_v60 }
0x1bd8   :  { %v1076_v55 = vpop.permute.xlu1 %1075 }
0x1bd9   :  { %v1078_v56 = vmul.f32 %v2134_v22, %v1076_v55 }
0x1bdb   :  { %1105 = vrot.lane.b32.xlu1 %v1078_v56, %s2179_s12 }
0x1bdc   :  { %v1094_v57 = vpop.permute.xlu1 %1093 }
0x1bdd   :  { %1935 = vmatmul.mubr.msk.f32.vlgmr.msra.gmra.mrb[20].mxu0 %vm213_vm0, %v1094_v57 }
0x1bde   :  { %1937 = vmatprep.mubr.msk.f32.mxu0 %vm213_vm0, %v1096_v51  ;;  %1963 = vmatpush3.msra.mxu0 %v1415_v15 }
0x1be0   :  { %v1098_v30 = vpop.permute.xlu1 %1097 }
0x1be1   :  { %1938 = vmatmul.mubr.msk.f32.gmra.mrb[22].mxu0 %vm213_vm0, %v1098_v30 }
0x1be4   :  { %v1102_v58 = vpop.permute.xlu1 %1101 }
0x1be5   :  { %1941 = vmatmul.mubr.msk.f32.vlgmr.msra.gmra.mrb[20].mxu1 %vm213_vm0, %v1102_v58 }
0x1be6   :  { %1943 = vmatprep.mubr.msk.f32.mxu1 %vm213_vm0, %v1104_v20  ;;  %2019 = vmatpush3.bf16.msra.mxu1 %v2016_v60 }
0x1c4d   :  { %v1106_v61 = vpop.permute.xlu1 %1105 }
0x1c4e   :  { %1944 = vmatmul.mubr.msk.f32.gmra.mrb[22].mxu1 %vm213_vm0, %v1106_v61 }
0x1cb0   :  { %v1936_v63 = vpop.f32.mrb[20].mxu0 }
0x1cb1   :  { %v1195_v26 = vadd.f32 %v1936_v63, %v1792_v62  ;;  %v1189_v24 = vpop.f32.mrb[21].mxu0 }
0x1cb2   :  { %v1190_v0 = vadd.f32 %v1792_v62, %v1189_v24 }
0x1cb3   :  { %v1237_v1 = vmul.f32 0.01, %v1195_v26  ;;  %vm1229_vm2 = vcmp.gt.f32.partialorder %v1195_v26, 0.0 }
0x1cb4   :  { %vm1228_vm3 = vcmp.gt.f32.partialorder %v1190_v0, 0.0  ;;  %v1236_v2 = vmul.f32 0.01, %v1190_v0  ;;  %v1939_v39 = vpop.f32.mrb[22].mxu0 }
0x1cb5   :  { %v1205_v4 = vadd.f32 %v1939_v39, %v1792_v62  ;;  %v1199_v5 = vpop.f32.mrb[23].mxu0  ;;  %v1245_v41 = vsel %vm1229_vm2, %v1195_v26, %v1237_v1 }
0x1cb6   :  { %v1200_v40 = vadd.f32 %v1792_v62, %v1199_v5  ;;  %v1244_v6 = vsel %vm1228_vm3, %v1190_v0, %v1236_v2  ;;  %v2671_v0 = vld [vmem:[%s2773_s10] ss:$0 sm:$0xff] }
0x1cb7   :  { %v1239_v42 = vmul.f32 0.01, %v1205_v4  ;;  %1950 = vmatprep.mubr.msk.f32.mxu1 %vm1261_vm4, %v1244_v6  ;;  %vm1231_vm5 = vcmp.gt.f32.partialorder %v1205_v4, 0.0 }
0x1cb8   :  { %vm1230_vm6 = vcmp.gt.f32.partialorder %v1200_v40, 0.0  ;;  %v1238_v43 = vmul.f32 0.01, %v1200_v40  ;;  %v1942_v8 = vpop.f32.mrb[20].mxu1  ;;  %1951 = vmatmul.mubr.msk.f32.vlgmr.msra.gmra.mrb[24].mxu1 %vm1261_vm4, %v1245_v41 }
0x1cb9   :  { %v1215_v45 = vadd.f32 %v1942_v8, %v1792_v62  ;;  %v1209_v46 = vpop.f32.mrb[21].mxu1  ;;  %v1247_v7 = vsel %vm1231_vm5, %v1205_v4, %v1239_v42 }
0x1cba   :  { %v1210_v9 = vadd.f32 %v1792_v62, %v1209_v46  ;;  %v1246_v25 = vsel %vm1230_vm6, %v1200_v40, %v1238_v43 }
0x1cbb   :  { %v1241_v11 = vmul.f32 0.01, %v1215_v45  ;;  %1953 = vmatprep.mubr.msk.f32.mxu1 %vm1261_vm4, %v1246_v25  ;;  %vm1233_vm7 = vcmp.gt.f32.partialorder %v1215_v45, 0.0 }
0x1cbc   :  { %vm1232_vm8 = vcmp.gt.f32.partialorder %v1210_v9, 0.0  ;;  %v1240_v12 = vmul.f32 0.01, %v1210_v9  ;;  %1954 = vmatmul.mubr.msk.f32.gmra.mrb[26].mxu1 %vm1261_vm4, %v1247_v7 }
0x1cbd   :  { %v1249_v10 = vsel %vm1233_vm7, %v1215_v45, %v1241_v11 }
0x1cbe   :  { %v1248_v14 = vsel %vm1232_vm8, %v1210_v9, %v1240_v12 }
0x1cbf   :  { %1956 = vmatprep.mubr.msk.f32.mxu1 %vm1261_vm4, %v1248_v14 }
0x1cc0   :  { %1957 = vmatmul.mubr.msk.f32.gmra.mrb[28].mxu1 %vm1261_vm4, %v1249_v10 }
0x1d21   :  { %v1945_v16 = vpop.f32.mrb[22].mxu1 }
0x1d22   :  { %v1225_v17 = vadd.f32 %v1945_v16, %v1792_v62  ;;  %v1219_v18 = vpop.f32.mrb[23].mxu1 }
0x1d23   :  { %v1220_v19 = vadd.f32 %v1792_v62, %v1219_v18 }
0x1d24   :  { %v1243_v21 = vmul.f32 0.01, %v1225_v17  ;;  %vm1235_vm9 = vcmp.gt.f32.partialorder %v1225_v17, 0.0 }
0x1d25   :  { %vm1234_vm10 = vcmp.gt.f32.partialorder %v1220_v19, 0.0  ;;  %v1242_v27 = vmul.f32 0.01, %v1220_v19 }
0x1d26   :  { %v1251_v31 = vsel %vm1235_vm9, %v1225_v17, %v1243_v21 }
0x1d27   :  { %v1250_v29 = vsel %vm1234_vm10, %v1220_v19, %v1242_v27 }
0x1d28   :  { %1959 = vmatprep.mubr.msk.f32.mxu1 %vm1261_vm4, %v1250_v29 }
0x1d29   :  { %1960 = vmatmul.mubr.msk.f32.gmra.mrb[30].mxu1 %vm1261_vm4, %v1251_v31  ;;  %vm1720_vm4 = vcmask 15360  }
0x1d8b   :  { %v1952_v22 = vpop.f32.mrb[24].mxu1 }
0x1d8c   :  { %v1358_v33 = vadd.f32 %v1952_v22, %v1801_v32  ;;  %v1352_v34 = vpop.f32.mrb[25].mxu1 }
0x1d8d   :  { %v1353_v36 = vadd.f32 %v1801_v32, %v1352_v34 }
0x1d8e   :  { %v1400_v37 = vmul.f32 0.01, %v1358_v33  ;;  %vm1392_vm11 = vcmp.gt.f32.partialorder %v1358_v33, 0.0 }
0x1d8f   :  { %vm1391_vm12 = vcmp.gt.f32.partialorder %v1353_v36, 0.0  ;;  %v1399_v54 = vmul.f32 0.01, %v1353_v36  ;;  %v1955_v44 = vpop.f32.mrb[26].mxu1 }
0x1d90   :  { %v1368_v38 = vadd.f32 %v1955_v44, %v1801_v32  ;;  %v1362_v28 = vpop.f32.mrb[27].mxu1  ;;  %v1408_v48 = vsel %vm1392_vm11, %v1358_v33, %v1400_v37 }
0x1d91   :  { %v1363_v13 = vadd.f32 %v1801_v32, %v1362_v28  ;;  %v1407_v59 = vsel %vm1391_vm12, %v1353_v36, %v1399_v54 }
0x1d92   :  { %v1402_v23 = vmul.f32 0.01, %v1368_v38  ;;  %1964 = vmatprep.mubr.msk.f32.mxu0 %vm1423_vm13, %v1407_v59  ;;  %vm1394_vm14 = vcmp.gt.f32.partialorder %v1368_v38, 0.0 }
0x1d93   :  { %vm1393_vm15 = vcmp.gt.f32.partialorder %v1363_v13, 0.0  ;;  %v1401_v49 = vmul.f32 0.01, %v1363_v13  ;;  %v1958_v50 = vpop.f32.mrb[28].mxu1  ;;  %1965 = vmatmul.mubr.msk.f32.vlgmr.msra.gmra.mrb[24].mxu0 %vm1423_vm13, %v1408_v48 }
0x1d94   :  { %v1378_v51 = vadd.f32 %v1958_v50, %v1801_v32  ;;  %v1372_v52 = vpop.f32.mrb[29].mxu1  ;;  %v1410_v57 = vsel %vm1394_vm14, %v1368_v38, %v1402_v23 }
0x1d95   :  { %v1373_v53 = vadd.f32 %v1801_v32, %v1372_v52  ;;  %v1409_v55 = vsel %vm1393_vm15, %v1363_v13, %v1401_v49 }
0x1d96   :  { %v1404_v56 = vmul.f32 0.01, %v1378_v51  ;;  %1967 = vmatprep.mubr.msk.f32.mxu0 %vm1423_vm13, %v1409_v55  ;;  %vm1396_vm0 = vcmp.gt.f32.partialorder %v1378_v51, 0.0 }
0x1d97   :  { %vm1395_vm1 = vcmp.gt.f32.partialorder %v1373_v53, 0.0  ;;  %v1403_v30 = vmul.f32 0.01, %v1373_v53  ;;  %1968 = vmatmul.mubr.msk.f32.gmra.mrb[26].mxu0 %vm1423_vm13, %v1410_v57 }
0x1d98   :  { %v1412_v20 = vsel %vm1396_vm0, %v1378_v51, %v1404_v56 }
0x1d99   :  { %v1411_v58 = vsel %vm1395_vm1, %v1373_v53, %v1403_v30 }
0x1d9a   :  { %1970 = vmatprep.mubr.msk.f32.mxu0 %vm1423_vm13, %v1411_v58 }
0x1d9b   :  { %1971 = vmatmul.mubr.msk.f32.gmra.mrb[28].mxu0 %vm1423_vm13, %v1412_v20 }
0x1dfc   :  { %v1961_v3 = vpop.f32.mrb[30].mxu1 }
0x1dfd   :  { %v1388_v35 = vadd.f32 %v1961_v3, %v1801_v32  ;;  %v1382_v60 = vpop.f32.mrb[31].mxu1 }
0x1dfe   :  { %v1383_v61 = vadd.f32 %v1801_v32, %v1382_v60 }
0x1dff   :  { %v1406_v62 = vmul.f32 0.01, %v1388_v35  ;;  %vm1398_vm2 = vcmp.gt.f32.partialorder %v1388_v35, 0.0 }
0x1e00   :  { %vm1397_vm3 = vcmp.gt.f32.partialorder %v1383_v61, 0.0  ;;  %v1405_v63 = vmul.f32 0.01, %v1383_v61 }
0x1e01   :  { %v1414_v24 = vsel %vm1398_vm2, %v1388_v35, %v1406_v62 }
0x1e02   :  { %v1413_v26 = vsel %vm1397_vm3, %v1383_v61, %v1405_v63 }
0x1e03   :  { %1973 = vmatprep.mubr.msk.f32.mxu0 %vm1423_vm13, %v1413_v26 }
0x1e04   :  { %1974 = vmatmul.mubr.msk.f32.gmra.mrb[30].mxu0 %vm1423_vm13, %v1414_v24 }
0x1e66   :  { %v1966_v1 = vpop.f32.mrb[24].mxu0 }
0x1e67   :  { %v1520_v2 = vadd.f32 %v1966_v1, %v2671_v0  ;;  %v1514_v39 = vpop.f32.mrb[25].mxu0 }
0x1e68   :  { %v1515_v4 = vadd.f32 %v2671_v0, %v1514_v39 }
0x1e69   :  { %v1820_v5 = vmul.f32 -1.442695, %v1520_v2 }
0x1e6a   :  { %v1819_v40 = vmul.f32 -1.442695, %v1515_v4  ;;  %v1969_v6 = vpop.f32.mrb[26].mxu0  ;;  %v2181_v4 = vmov 1  }
0x1e6b   :  { %2137 = vpow2.f32 %v1820_v5  ;;  %v1530_v41 = vadd.f32 %v1969_v6, %v2671_v0  ;;  %v1524_v42 = vpop.f32.mrb[27].mxu0 }
0x1e6c   :  { %2139 = vpow2.f32 %v1819_v40  ;;  %v1525_v43 = vadd.f32 %v2671_v0, %v1524_v42 }
0x1e6d   :  { %v1822_v8 = vmul.f32 -1.442695, %v1530_v41 }
0x1e6e   :  { %v1821_v45 = vmul.f32 -1.442695, %v1525_v43  ;;  %v1972_v46 = vpop.f32.mrb[28].mxu0 }
0x1e6f   :  { %2141 = vpow2.f32 %v1822_v8  ;;  %v1540_v9 = vadd.f32 %v1972_v46, %v2671_v0  ;;  %v1534_v25 = vpop.f32.mrb[29].mxu0 }
0x1e70   :  { %2143 = vpow2.f32 %v1821_v45  ;;  %v1535_v11 = vadd.f32 %v2671_v0, %v1534_v25 }
0x1e71   :  { %v1824_v7 = vmul.f32 -1.442695, %v1540_v9 }
0x1e72   :  { %v1823_v12 = vmul.f32 -1.442695, %v1535_v11 }
0x1e73   :  { %2145 = vpow2.f32 %v1824_v7 }
0x1e74   :  { %2147 = vpow2.f32 %v1823_v12 }
0x1e75   :  { %v2138_v14 = vpop.eup %2137 }
0x1e76   :  { %v2140_v10 = vpop.eup %2139  ;;  %v1578_v15 = vadd.f32 1.0, %v2138_v14 }
0x1e77   :  { %v1577_v16 = vadd.f32 1.0, %v2140_v10 }
0x1e78   :  { %2149 = vrcp.f32 %v1578_v15 }
0x1e79   :  { %v2142_v17 = vpop.eup %2141  ;;  %2151 = vrcp.f32 %v1577_v16 }
0x1e7a   :  { %v2144_v18 = vpop.eup %2143  ;;  %v1580_v19 = vadd.f32 1.0, %v2142_v17 }
0x1e7b   :  { %v1579_v21 = vadd.f32 1.0, %v2144_v18 }
0x1e7c   :  { %2153 = vrcp.f32 %v1580_v19 }
0x1e7d   :  { %v2146_v27 = vpop.eup %2145  ;;  %2155 = vrcp.f32 %v1579_v21 }
0x1e7e   :  { %v2148_v29 = vpop.eup %2147  ;;  %v1582_v31 = vadd.f32 1.0, %v2146_v27  ;;  %v1622_v27 = vlaneseq }
0x1e7f   :  { %v1581_v32 = vadd.f32 1.0, %v2148_v29 }
0x1e80   :  { %2157 = vrcp.f32 %v1582_v31  ;;  %v1623_v31 = vand.u32 127, %v1622_v27 }
0x1e81   :  { %2159 = vrcp.f32 %v1581_v32 }
0x1e82   :  { %v2679_v22 = vpop.eup %2149  ;;  %vm1624_vm5 = vcmp.lt.s32.totalorder %v1623_v31, 34 }
0x1e83   :  { %v2152_v33 = vpop.eup %2151  ;;  %v1722_v34 = vsel %vm1720_vm4, %v2679_v22, 0.0  ;;  %v1617_v45 = vsub.f32 1.0, %v2679_v22 }
0x1e84   :  { %1730 = vst [vmem:[%s2774_s11 + $0x8] sm:$0xff] %v1722_v34  ;;  %v1721_v36 = vsel %vm1720_vm4, %v2152_v33, 0.0  ;;  %v1620_v41 = vsub.f32 1.0, %v2152_v33 }
0x1e85   :  { %1729 = vst [vmem:[%s2774_s11] sm:$0xff] %v1721_v36 }
0x1e86   :  { %v2154_v37 = vpop.eup %2153 }
0x1e87   :  { %v2690_v54 = vpop.eup %2155  ;;  %v1724_v44 = vsel %vm1720_vm4, %v2154_v37, 0.0  ;;  %v1611_v42 = vsub.f32 1.0, %v2154_v37 }
0x1e88   :  { %1732 = vst [vmem:[%s2774_s11 + $0x18] sm:$0xff] %v1724_v44  ;;  %v1723_v38 = vsel %vm1720_vm4, %v2690_v54, 0.0  ;;  %v1614_v9 = vsub.f32 1.0, %v2690_v54  ;;  %v2169_v44 = vld [vmem:[%s2764_s0] sm:$0xff] }
0x1e89   :  { %1731 = vst [vmem:[%s2774_s11 + $0x10] sm:$0xff] %v1723_v38 }
0x1e8a   :  { %v2158_v28 = vpop.eup %2157 }
0x1e8b   :  { %v2160_v13 = vpop.eup %2159  ;;  %v1726_v59 = vsel %vm1720_vm4, %v2158_v28, 0.0  ;;  %v1605_v63 = vsub.f32 1.0, %v2158_v28 }
0x1e8c   :  { %1734 = vst [vmem:[%s2774_s11 + $0x28] sm:$0xff] %v1726_v59  ;;  %v1725_v48 = vsel %vm1720_vm4, %v2160_v13, 0.0  ;;  %v1608_v2 = vsub.f32 1.0, %v2160_v13  ;;  %v2170_v59 = vld [vmem:[%s2764_s0 + $0x20] sm:$0xff] }
0x1e8d   :  { %1733 = vst [vmem:[%s2774_s11 + $0x20] sm:$0xff] %v1725_v48 }
0x1ed7   :  { %v1975_v23 = vpop.f32.mrb[30].mxu0 }
0x1ed8   :  { %v1550_v49 = vadd.f32 %v1975_v23, %v2671_v0  ;;  %v1544_v50 = vpop.f32.mrb[31].mxu0  ;;  %v2171_v23 = vld [vmem:[%s2764_s0 + $0x10] sm:$0xff] }
0x1ed9   :  { %v1545_v51 = vadd.f32 %v2671_v0, %v1544_v50  ;;  %v2172_v50 = vld [vmem:[%s2764_s0 + $0x30] sm:$0xff] }
0x1eda   :  { %v1826_v52 = vmul.f32 -1.442695, %v1550_v49 }
0x1edb   :  { %v1825_v53 = vmul.f32 -1.442695, %v1545_v51 }
0x1edc   :  { %2161 = vpow2.f32 %v1826_v52  ;;  %v2173_v52 = vld [vmem:[%s2764_s0 + $0x8] sm:$0xff] }
0x1edd   :  { %2163 = vpow2.f32 %v1825_v53 }
0x1ee6   :  { %v2162_v55 = vpop.eup %2161 }
0x1ee7   :  { %v2164_v56 = vpop.eup %2163  ;;  %v1584_v57 = vadd.f32 1.0, %v2162_v55 }
0x1ee8   :  { %v1583_v30 = vadd.f32 1.0, %v2164_v56 }
0x1ee9   :  { %2165 = vrcp.f32 %v1584_v57  ;;  %v2174_v57 = vld [vmem:[%s2764_s0 + $0x28] sm:$0xff] }
0x1eea   :  { %2167 = vrcp.f32 %v1583_v30 }
0x1ef3   :  { %v2166_v58 = vpop.eup %2165 }
0x1ef4   :  { %v2168_v20 = vpop.eup %2167  ;;  %v1728_v3 = vsel %vm1720_vm4, %v2166_v58, 0.0  ;;  %v1601_v35 = vsub.f32 1.0, %v2166_v58 }
0x1ef5   :  { %1736 = vst [vmem:[%s2774_s11 + $0x38] sm:$0xff] %v1728_v3  ;;  %v1727_v60 = vsel %vm1720_vm4, %v2168_v20, 0.0  ;;  %v1602_v61 = vsub.f32 1.0, %v2168_v20  ;;  %v1604_v62 = vmul.f32 %v2168_v20, %v2166_v58 }
0x1ef6   :  { %1735 = vst [vmem:[%s2774_s11 + $0x30] sm:$0xff] %v1727_v60  ;;  %1662 = vperm.xlu0 %2029, %v1601_v35  }
0x1ef7   :  { %v1603_v26 = vmul.f32 %v2166_v58, %v1602_v61  ;;  %v1606_v24 = vmul.f32 %v1605_v63, %v1604_v62  ;;  %v1607_v0 = vmul.f32 %v2158_v28, %v1604_v62  ;;  %v2175_v58 = vld [vmem:[%s2764_s0 + $0x18] sm:$0xff] }
0x1ef9   :  { %1657 = vperm.xlu1 %2030, %v1603_v26   ;;  %v1610_v1 = vmul.f32 %v2160_v13, %v1607_v0  ;;  %v1609_v5 = vmul.f32 %v1608_v2, %v1607_v0 }
0x1efa   :  { %1652 = vperm.xlu0 %2029, %v1606_v24  }
0x1efb   :  { %v1613_v39 = vmul.f32 %v2154_v37, %v1610_v1  ;;  %v1612_v8 = vmul.f32 %v1611_v42, %v1610_v1 }
0x1efd   :  { %2031 = vset.pattern.permute.xlu1 %v2181_v4  ;;  %v1616_v40 = vmul.f32 %v2690_v54, %v1613_v39  ;;  %v1615_v25 = vmul.f32 %v1614_v9, %v1613_v39 }
0x1efe   :  { %2033 = vset.pattern.permute.xlu0 %v2181_v4  ;;  %1686 = vperm.xlu1 %2031, %v1606_v24  }
0x1eff   :  { %1682 = vperm.xlu0 %2033, %v1609_v5   ;;  %v1619_v6 = vmul.f32 %v2679_v22, %v1616_v40  ;;  %v1618_v46 = vmul.f32 %v1617_v45, %v1616_v40 }
0x1f01   :  { %v1621_v43 = vmul.f32 %v1620_v41, %v1619_v6 }
0x1f02   :  { %2032 = vset.pattern.permute.xlu1 %v2180_v47 }
0x1f03   :  { %2034 = vset.pattern.permute.xlu0 %v2180_v47  ;;  %1647 = vperm.xlu1 %2032, %v1609_v5  }
0x1f04   :  { %1642 = vperm.xlu0 %2034, %v1612_v8  }
0x1f07   :  { %2035 = vset.pattern.permute.xlu1 %v2181_v4 }
0x1f08   :  { %2039 = vset.pattern.permute.xlu0 %v2181_v4  ;;  %1678 = vperm.xlu1 %2035, %v1612_v8  }
0x1f09   :  { %1670 = vperm.xlu0 %2039, %v1618_v46  }
0x1f0c   :  { %2036 = vset.pattern.permute.xlu1 %v2180_v47 }
0x1f0d   :  { %2040 = vset.pattern.permute.xlu0 %v2180_v47  ;;  %1637 = vperm.xlu1 %2036, %v1615_v25  }
0x1f0e   :  { %1627 = vperm.xlu0 %2040, %v1621_v43  }
0x1f11   :  { %2037 = vset.pattern.permute.xlu1 %v2181_v4 }
0x1f12   :  { %2042 = vset.pattern.permute.xlu0 %v2181_v4  ;;  %1674 = vperm.xlu1 %2037, %v1615_v25  }
0x1f13   :  { %1690 = vperm.xlu0 %2042, %v1603_v26  }
0x1f16   :  { %2038 = vset.pattern.permute.xlu1 %v2180_v47 }
0x1f17   :  { %1632 = vperm.xlu1 %2038, %v1618_v46  }
0x1f1b   :  { %2041 = vset.pattern.permute.xlu1 %v2181_v4 }
0x1f1c   :  { %1666 = vperm.xlu1 %2041, %v1621_v43  }
0x1f20   :  { %1694 = vperm.xlu1 %2041, %v1601_v35   ;;  %v2176_v35 = vld [vmem:[%s2764_s0 + $0x38] sm:$0xff] }
0x1f75   :  { %v1663_v11 = vpop.permute.xlu0 %1662 }
0x1f78   :  { %v1658_v7 = vpop.permute.xlu1 %1657 }
0x1f79   :  { %v1653_v12 = vpop.permute.xlu0 %1652 }
0x1f7d   :  { %v1687_v14 = vpop.permute.xlu1 %1686 }
0x1f7e   :  { %v1683_v10 = vpop.permute.xlu0 %1682  ;;  %v1702_v28 = vsel %vm1624_vm5, %v1653_v12, %v1687_v14 }
0x1f7f   :  { %v1710_v30 = vmul.f32 %v2174_v57, %v1702_v28 }
0x1f82   :  { %v1648_v15 = vpop.permute.xlu1 %1647 }
0x1f83   :  { %v1643_v16 = vpop.permute.xlu0 %1642  ;;  %v1701_v22 = vsel %vm1624_vm5, %v1648_v15, %v1683_v10 }
0x1f84   :  { %v1709_v48 = vmul.f32 %v2170_v59, %v1701_v22 }
0x1f87   :  { %v1679_v17 = vpop.permute.xlu1 %1678 }
0x1f88   :  { %v1671_v19 = vpop.permute.xlu0 %1670  ;;  %v1700_v13 = vsel %vm1624_vm5, %v1643_v16, %v1679_v17 }
0x1f89   :  { %v1708_v20 = vmul.f32 %v2175_v58, %v1700_v13 }
0x1f8c   :  { %v1638_v18 = vpop.permute.xlu1 %1637 }
0x1f8d   :  { %v1628_v29 = vpop.permute.xlu0 %1627 }
0x1f91   :  { %v1675_v21 = vpop.permute.xlu1 %1674 }
0x1f92   :  { %v1691_v47 = vpop.permute.xlu0 %1690  ;;  %v1699_v34 = vsel %vm1624_vm5, %v1638_v18, %v1675_v21 }
0x1f93   :  { %v1703_v36 = vsel %vm1624_vm5, %v1658_v7, %v1691_v47  ;;  %v1707_v49 = vmul.f32 %v2171_v23, %v1699_v34 }
0x1f94   :  { %v1711_v51 = vmul.f32 %v2172_v50, %v1703_v36 }
0x1f96   :  { %v1633_v32 = vpop.permute.xlu1 %1632  ;;  %v1715_v61 = vadd.f32 %v1711_v51, %v1707_v49 }
0x1f97   :  { %v1698_v37 = vsel %vm1624_vm5, %v1633_v32, %v1671_v19 }
0x1f98   :  { %v1706_v53 = vmul.f32 %v2173_v52, %v1698_v37 }
0x1f9a   :  { %v1714_v62 = vadd.f32 %v1710_v30, %v1706_v53 }
0x1f9b   :  { %v1667_v33 = vpop.permute.xlu1 %1666 }
0x1f9c   :  { %v1697_v54 = vsel %vm1624_vm5, %v1628_v29, %v1667_v33 }
0x1f9d   :  { %v1705_v38 = vmul.f32 %v2169_v44, %v1697_v54 }
0x1f9f   :  { %v1695_v55 = vpop.permute.xlu1 %1694  ;;  %v1713_v3 = vadd.f32 %v1709_v48, %v1705_v38 }
0x1fa0   :  { %v1704_v56 = vsel %vm1624_vm5, %v1663_v11, %v1695_v55 }
0x1fa1   :  { %v1712_v60 = vmul.f32 %v2176_v35, %v1704_v56  ;;  %v1717_v26 = vadd.f32 %v1715_v61, %v1713_v3 }
0x1fa3   :  { %v1716_v63 = vadd.f32 %v1712_v60, %v1708_v20 }
0x1fa5   :  { %v1718_v24 = vadd.f32 %v1716_v63, %v1714_v62 }
0x1fa7   :  { %v1719_v0 = vadd.f32 %v1718_v24, %v1717_v26 }
0x1fa9   :  { %1737 = vst [vmem:[%s2774_s11 + $0x40] sm:$0xff] %v1719_v0 }

</bundles_post_ra>
